<compile_context>
chip_gen: v7x
topology: tpu7x:2x2x1
jax: 0.10.0
libtpu: 0.0.40
codegen_flags: <defaults>
</compile_context>

<pallas_src>
import numpy as np
import jax
import jax.numpy as jnp
from jax.experimental import pallas as pl
from jax.experimental.pallas import tpu as pltpu

# ---- module hyper-parameters (small, consistent with the PyTorch module) ----
DIM = 3                      # input point dimension
C_DIM_IN = 16                # latent code dim passed into forward()
T_DIM = 16                   # time embedding dim
C_DIM = C_DIM_IN + T_DIM     # what fc_c sees (c_dim += t_dim in __init__)
HIDDEN = 32                  # hidden_size
N_BLOCKS = 3                 # n_blocks
OUT_DIM = 1                  # out_dim

IN_FUSED = DIM + C_DIM                       # 35  = [p | c | t]
IN_PAD = ((IN_FUSED + 7) // 8) * 8           # 40  (zero-padded, sublane aligned)
PROJ = (1 + N_BLOCKS) * HIDDEN               # 128 = fused [fc_p ; fc_c[0..2]] rows


# ----------------------------- Pallas kernel --------------------------------
def _decoder_kernel(x_ref, wfused_ref, bfused_ref,
                    w0_ref, b0_ref, w1_ref, b1_ref,
                    wout_ref, bout_ref, out_ref):
    # x_ref: (IN_PAD, tile) bf16, rows = [p(3) | c(16) | t(16) | 0-pad], points on lanes.
    x = x_ref[...]

    # One fused matmul computes fc_p(logmap) and all N_BLOCKS fc_c(cat(c, t)).
    proj = jnp.dot(wfused_ref[...], x, preferred_element_type=jnp.float32)
    proj = proj + bfused_ref[...]                       # (PROJ, tile) f32, biases folded

    net = proj[0:HIDDEN, :]                             # fc_p(logmap)
    for i in range(N_BLOCKS):
        # net = net + fc_c[i](cat([c, t]))  -- aligned 32-row slice of the fused result
        net = net + proj[(i + 1) * HIDDEN:(i + 2) * HIDDEN, :]
        # ResnetBlockFC(hidden): h = fc_0(relu(net)); dx = fc_1(relu(h)); net += dx
        h = jnp.dot(w0_ref[i], jnp.maximum(net, 0.0).astype(jnp.bfloat16),
                    preferred_element_type=jnp.float32) + b0_ref[i]
        dx = jnp.dot(w1_ref[i], jnp.maximum(h, 0.0).astype(jnp.bfloat16),
                     preferred_element_type=jnp.float32) + b1_ref[i]
        net = net + dx

    # out = fc_out(relu(net))  -> lane-dense (OUT_DIM, tile) store
    out = jnp.dot(wout_ref[...], jnp.maximum(net, 0.0).astype(jnp.bfloat16),
                  preferred_element_type=jnp.float32) + bout_ref[...]
    out_ref[...] = out


# ------------------------------ JAX glue -------------------------------------
def _sinusoidal_pos_emb(x, dim):
    half = dim // 2
    emb = jnp.log(10000.0) / (half - 1)
    emb = jnp.exp(jnp.arange(half, dtype=jnp.float32) * -emb)
    emb = x.astype(jnp.float32)[:, None] * emb[None, :]
    return jnp.concatenate([jnp.sin(emb), jnp.cos(emb)], axis=-1)


def _mish(x):
    return x * jnp.tanh(jax.nn.softplus(x))


def _time_mlp(time, params):
    t = _sinusoidal_pos_emb(time.reshape(-1), T_DIM)           # (B, T_DIM)
    t = t @ params["wt1"].T + params["bt1"]                    # (B, 2*T_DIM)
    t = _mish(t)
    t = t @ params["wt2"].T + params["bt2"]                    # (B, T_DIM)
    return t


def pack_params(params):
    """Wrapper-side layout plumbing: fuse fc_p + fc_c into one packed weight,
    fold their biases into one vector, reshape biases to [out, 1] for the
    feature-major layout, and cast all matmul weights to bf16 (accumulation
    stays f32 inside the kernel)."""
    z_c = jnp.zeros((HIDDEN, C_DIM), jnp.float32)
    z_p = jnp.zeros((HIDDEN, DIM), jnp.float32)
    rows = [jnp.concatenate([params["wp"], z_c], axis=1)]          # fc_p sees only p
    for i in range(N_BLOCKS):
        rows.append(jnp.concatenate([z_p, params["wc"][i]], axis=1))  # fc_c sees only [c|t]
    w_fused = jnp.concatenate(rows, axis=0)                        # (PROJ, IN_FUSED)
    w_fused = jnp.pad(w_fused, ((0, 0), (0, IN_PAD - IN_FUSED)))   # (PROJ, IN_PAD)
    b_fused = jnp.concatenate(
        [params["bp"]] + [params["bc"][i] for i in range(N_BLOCKS)]
    ).reshape(PROJ, 1).astype(jnp.float32)
    return dict(
        w_fused=w_fused.astype(jnp.bfloat16), b_fused=b_fused,
        w0=params["w0"].astype(jnp.bfloat16), b0=params["b0"][..., None],
        w1=params["w1"].astype(jnp.bfloat16), b1=params["b1"][..., None],
        wout=params["wout"].astype(jnp.bfloat16),
        bout=params["bout"].reshape(OUT_DIM, 1),
    )


def time_local_decoder_forward(logmap, c, time, params, packed=None, *, tile=1024):
    B, N, _ = logmap.shape
    if packed is None:
        packed = pack_params(params)

    # time embedding (tiny per-batch MLP) + broadcast over sample_num: plain JAX glue
    t = _time_mlp(time, params)                                    # (B, T_DIM)
    t = jnp.broadcast_to(t[:, None, :], (B, N, T_DIM))

    # fused feature-major input: rows = [p | c | t | 0-pad], points on the lane axis
    x = jnp.concatenate([logmap.astype(jnp.float32),
                         c.astype(jnp.float32), t], axis=-1)       # (B, N, 35)
    P = B * N
    x = x.reshape(P, IN_FUSED)
    x = jnp.pad(x, ((0, 0), (0, IN_PAD - IN_FUSED)))               # (P, IN_PAD)
    x = x.astype(jnp.bfloat16).T                                   # (IN_PAD, P)

    # ragged point counts: pad P up to a multiple of the tile (garbage cols dropped)
    n_tiles = pl.cdiv(P, tile)
    p_pad = n_tiles * tile
    if p_pad != P:
        x = jnp.pad(x, ((0, 0), (0, p_pad - P)))

    def full(shape):
        return pl.BlockSpec(shape, lambda i: (0,) * len(shape))

    out = pl.pallas_call(
        _decoder_kernel,
        out_shape=jax.ShapeDtypeStruct((OUT_DIM, p_pad), jnp.float32),
        grid_spec=pltpu.PrefetchScalarGridSpec(
            num_scalar_prefetch=0,
            grid=(n_tiles,),
            in_specs=[
                pl.BlockSpec((IN_PAD, tile), lambda i: (0, i)),
                full((PROJ, IN_PAD)), full((PROJ, 1)),
                full((N_BLOCKS, HIDDEN, HIDDEN)), full((N_BLOCKS, HIDDEN, 1)),
                full((N_BLOCKS, HIDDEN, HIDDEN)), full((N_BLOCKS, HIDDEN, 1)),
                full((OUT_DIM, HIDDEN)), full((OUT_DIM, 1)),
            ],
            out_specs=pl.BlockSpec((OUT_DIM, tile), lambda i: (0, i)),
        ),
        compiler_params=pltpu.CompilerParams(
            dimension_semantics=("parallel",)),
    )(x, packed["w_fused"], packed["b_fused"],
      packed["w0"], packed["b0"], packed["w1"], packed["b1"],
      packed["wout"], packed["bout"])

    return out[0, :P].reshape(B, N)                                # (B, N)


# --------------------------- pure-JAX reference -------------------------------
def reference_forward(logmap, c, time, params):
    """Point-major reference with the same mixed precision as the kernel:
    bf16 matmul operands, f32 accumulation, f32 elementwise."""
    B, N, _ = logmap.shape
    t = _time_mlp(time, params)
    t = jnp.broadcast_to(t[:, None, :], (B, N, T_DIM))
    cf = jnp.concatenate([c.astype(jnp.float32), t], axis=-1)

    def mm(xv, w):
        return jnp.dot(xv.astype(jnp.bfloat16), w.astype(jnp.bfloat16).T,
                       preferred_element_type=jnp.float32)

    net = mm(logmap.astype(jnp.float32), params["wp"]) + params["bp"]
    for i in range(N_BLOCKS):
        net = net + mm(cf, params["wc"][i]) + params["bc"][i]
        h = mm(jnp.maximum(net, 0.0), params["w0"][i]) + params["b0"][i]
        dx = mm(jnp.maximum(h, 0.0), params["w1"][i]) + params["b1"][i]
        net = net + dx
    out = mm(jnp.maximum(net, 0.0), params["wout"]) + params["bout"]
    return out.squeeze(-1)


# ------------------------------ param init ------------------------------------
def init_params(key):
    # NOTE: ResnetBlockFC zero-inits fc_1.weight in the original code; here we use
    # nonzero deterministic random weights so the kernel is meaningfully exercised.
    def lin(k, out_f, in_f):
        kw, kb = jax.random.split(k)
        scale = 1.0 / np.sqrt(in_f)
        w = jax.random.normal(kw, (out_f, in_f), jnp.float32) * scale
        b = jax.random.normal(kb, (out_f,), jnp.float32) * scale
        return w, b

    keys = jax.random.split(key, 8)
    wp, bp = lin(keys[0], HIDDEN, DIM)
    wt1, bt1 = lin(keys[1], 2 * T_DIM, T_DIM)
    wt2, bt2 = lin(keys[2], T_DIM, 2 * T_DIM)
    wout, bout = lin(keys[3], OUT_DIM, HIDDEN)

    def stack_lin(k, out_f, in_f):
        ks = jax.random.split(k, N_BLOCKS)
        ws, bs = zip(*(lin(kk, out_f, in_f) for kk in ks))
        return jnp.stack(ws), jnp.stack(bs)

    wc, bc = stack_lin(keys[4], HIDDEN, C_DIM)
    w0, b0 = stack_lin(keys[5], HIDDEN, HIDDEN)
    w1, b1 = stack_lin(keys[6], HIDDEN, HIDDEN)

    return dict(wp=wp, bp=bp, wc=wc, bc=bc, w0=w0, b0=b0, w1=w1, b1=b1,
                wout=wout, bout=bout, wt1=wt1, bt1=bt1, wt2=wt2, bt2=bt2)


# ---------------------------------- main ---------------------------------------
if __name__ == "__main__":
    key = jax.random.PRNGKey(0)
    kp, kc, kt, kw = jax.random.split(key, 4)

    params = init_params(kw)
    packed = pack_params(params)

    # Main case: P = 4096 points, tile = 1024 -> grid of 4 (even, good for v7x's 2 TCs).
    B, N = 2, 2048
    logmap = jax.random.normal(kp, (B, N, DIM), jnp.float32)       # query points
    c = jax.random.normal(kc, (B, N, C_DIM_IN), jnp.float32)       # sampled local feats
    time = jax.random.uniform(kt, (B, 1), jnp.float32) * 10.0      # diffusion timestep

    out = time_local_decoder_forward(logmap, c, time, params, packed, tile=1024)
    out = jax.block_until_ready(out)
    assert out.shape == (B, N)
    ref = reference_forward(logmap, c, time, params)
    np.testing.assert_allclose(np.asarray(out), np.asarray(ref), rtol=1e-2, atol=1e-3)

    # Ragged case: P = 200 not a multiple of the tile -> exercised padding path.
    B2, N2 = 2, 100
    logmap2 = jax.random.normal(jax.random.PRNGKey(1), (B2, N2, DIM), jnp.float32)
    c2 = jax.random.normal(jax.random.PRNGKey(2), (B2, N2, C_DIM_IN), jnp.float32)
    time2 = jax.random.uniform(jax.random.PRNGKey(3), (B2, 1), jnp.float32) * 10.0
    out2 = jax.block_until_ready(
        time_local_decoder_forward(logmap2, c2, time2, params, packed, tile=1024))
    assert out2.shape == (B2, N2)
    ref2 = reference_forward(logmap2, c2, time2, params)
    np.testing.assert_allclose(np.asarray(out2), np.asarray(ref2), rtol=1e-2, atol=1e-3)

    print("KERNEL_OK")
</pallas_src>

<mosaic_0001>
module attributes {stable_mosaic.version = 11 : i64} {
  func.func @_decoder_kernel(%arg0: i32, %arg1: memref<40x1024xbf16, #tpu.memory_space<vmem>>, %arg2: memref<128x40xbf16, #tpu.memory_space<vmem>>, %arg3: memref<128x1xf32, #tpu.memory_space<vmem>>, %arg4: memref<3x32x32xbf16, #tpu.memory_space<vmem>>, %arg5: memref<3x32x1xf32, #tpu.memory_space<vmem>>, %arg6: memref<3x32x32xbf16, #tpu.memory_space<vmem>>, %arg7: memref<3x32x1xf32, #tpu.memory_space<vmem>>, %arg8: memref<1x32xbf16, #tpu.memory_space<vmem>>, %arg9: memref<1x1xf32, #tpu.memory_space<vmem>>, %arg10: memref<1x1024xf32, #tpu.memory_space<vmem>>) attributes {dimension_semantics = [#tpu.dimension_semantics<parallel>], iteration_bounds = array<i64: 4>, scalar_prefetch = 0 : i64, scratch_operands = 0 : i64, tpu.core_type = #tpu.core_type<tc>, window_params = [{transform_indices = @transform_0, window_bounds = array<i64: 40, 1024>}, {pipeline_mode = #tpu.pipeline_mode<synchronous>, transform_indices = @transform_1, window_bounds = array<i64: 128, 40>}, {pipeline_mode = #tpu.pipeline_mode<synchronous>, transform_indices = @transform_2, window_bounds = array<i64: 128, 1>}, {pipeline_mode = #tpu.pipeline_mode<synchronous>, transform_indices = @transform_3, window_bounds = array<i64: 3, 32, 32>}, {pipeline_mode = #tpu.pipeline_mode<synchronous>, transform_indices = @transform_4, window_bounds = array<i64: 3, 32, 1>}, {pipeline_mode = #tpu.pipeline_mode<synchronous>, transform_indices = @transform_5, window_bounds = array<i64: 3, 32, 32>}, {pipeline_mode = #tpu.pipeline_mode<synchronous>, transform_indices = @transform_6, window_bounds = array<i64: 3, 32, 1>}, {pipeline_mode = #tpu.pipeline_mode<synchronous>, transform_indices = @transform_7, window_bounds = array<i64: 1, 32>}, {pipeline_mode = #tpu.pipeline_mode<synchronous>, transform_indices = @transform_8, window_bounds = array<i64: 1, 1>}, {transform_indices = @transform_9, window_bounds = array<i64: 1, 1024>}]} {
    %c0 = arith.constant 0 : index
    %c0_0 = arith.constant 0 : index
    %0 = vector.load %arg1[%c0, %c0_0] : memref<40x1024xbf16, #tpu.memory_space<vmem>>, vector<40x1024xbf16>
    %c0_1 = arith.constant 0 : index
    %c0_2 = arith.constant 0 : index
    %1 = vector.load %arg2[%c0_1, %c0_2] : memref<128x40xbf16, #tpu.memory_space<vmem>>, vector<128x40xbf16>
    %cst = arith.constant dense<0.000000e+00> : vector<128x1024xf32>
    %2 = tpu.matmul %1, %0, %cst {dimension_numbers = #tpu.dot_dimension_numbers<[1], [0], [0], [1], [0, 0, 1, 1], [], []>} : vector<128x40xbf16>, vector<40x1024xbf16>, vector<128x1024xf32> -> vector<128x1024xf32>
    %c0_3 = arith.constant 0 : index
    %c0_4 = arith.constant 0 : index
    %3 = vector.load %arg3[%c0_3, %c0_4] : memref<128x1xf32, #tpu.memory_space<vmem>>, vector<128x1xf32>
    %4 = vector.broadcast %3 : vector<128x1xf32> to vector<128x1024xf32>
    %5 = arith.addf %2, %4 : vector<128x1024xf32>
    %6 = vector.extract_strided_slice %5 {offsets = [0, 0], sizes = [32, 1024], strides = [1, 1]} : vector<128x1024xf32> to vector<32x1024xf32>
    %7 = vector.extract_strided_slice %5 {offsets = [32, 0], sizes = [32, 1024], strides = [1, 1]} : vector<128x1024xf32> to vector<32x1024xf32>
    %8 = arith.addf %6, %7 : vector<32x1024xf32>
    %c0_5 = arith.constant 0 : index
    %c0_6 = arith.constant 0 : index
    %c0_7 = arith.constant 0 : index
    %9 = vector.load %arg4[%c0_5, %c0_6, %c0_7] : memref<3x32x32xbf16, #tpu.memory_space<vmem>>, vector<1x32x32xbf16>
    %10 = vector.shape_cast %9 : vector<1x32x32xbf16> to vector<32x32xbf16>
    %cst_8 = arith.constant 0.000000e+00 : f32
    %11 = vector.broadcast %cst_8 : f32 to vector<32x1024xf32>
    %12 = arith.maximumf %8, %11 : vector<32x1024xf32>
    %13 = arith.truncf %12 : vector<32x1024xf32> to vector<32x1024xbf16>
    %cst_9 = arith.constant dense<0.000000e+00> : vector<32x1024xf32>
    %14 = tpu.matmul %10, %13, %cst_9 {dimension_numbers = #tpu.dot_dimension_numbers<[1], [0], [0], [1], [0, 0, 1, 1], [], []>} : vector<32x32xbf16>, vector<32x1024xbf16>, vector<32x1024xf32> -> vector<32x1024xf32>
    %c0_10 = arith.constant 0 : index
    %c0_11 = arith.constant 0 : index
    %c0_12 = arith.constant 0 : index
    %15 = vector.load %arg5[%c0_10, %c0_11, %c0_12] : memref<3x32x1xf32, #tpu.memory_space<vmem>>, vector<1x32x1xf32>
    %16 = vector.shape_cast %15 : vector<1x32x1xf32> to vector<32x1xf32>
    %17 = vector.broadcast %16 : vector<32x1xf32> to vector<32x1024xf32>
    %18 = arith.addf %14, %17 : vector<32x1024xf32>
    %c0_13 = arith.constant 0 : index
    %c0_14 = arith.constant 0 : index
    %c0_15 = arith.constant 0 : index
    %19 = vector.load %arg6[%c0_13, %c0_14, %c0_15] : memref<3x32x32xbf16, #tpu.memory_space<vmem>>, vector<1x32x32xbf16>
    %20 = vector.shape_cast %19 : vector<1x32x32xbf16> to vector<32x32xbf16>
    %cst_16 = arith.constant 0.000000e+00 : f32
    %21 = vector.broadcast %cst_16 : f32 to vector<32x1024xf32>
    %22 = arith.maximumf %18, %21 : vector<32x1024xf32>
    %23 = arith.truncf %22 : vector<32x1024xf32> to vector<32x1024xbf16>
    %cst_17 = arith.constant dense<0.000000e+00> : vector<32x1024xf32>
    %24 = tpu.matmul %20, %23, %cst_17 {dimension_numbers = #tpu.dot_dimension_numbers<[1], [0], [0], [1], [0, 0, 1, 1], [], []>} : vector<32x32xbf16>, vector<32x1024xbf16>, vector<32x1024xf32> -> vector<32x1024xf32>
    %c0_18 = arith.constant 0 : index
    %c0_19 = arith.constant 0 : index
    %c0_20 = arith.constant 0 : index
    %25 = vector.load %arg7[%c0_18, %c0_19, %c0_20] : memref<3x32x1xf32, #tpu.memory_space<vmem>>, vector<1x32x1xf32>
    %26 = vector.shape_cast %25 : vector<1x32x1xf32> to vector<32x1xf32>
    %27 = vector.broadcast %26 : vector<32x1xf32> to vector<32x1024xf32>
    %28 = arith.addf %24, %27 : vector<32x1024xf32>
    %29 = arith.addf %8, %28 : vector<32x1024xf32>
    %30 = vector.extract_strided_slice %5 {offsets = [64, 0], sizes = [32, 1024], strides = [1, 1]} : vector<128x1024xf32> to vector<32x1024xf32>
    %31 = arith.addf %29, %30 : vector<32x1024xf32>
    %c1 = arith.constant 1 : index
    %c0_21 = arith.constant 0 : index
    %c0_22 = arith.constant 0 : index
    %32 = vector.load %arg4[%c1, %c0_21, %c0_22] : memref<3x32x32xbf16, #tpu.memory_space<vmem>>, vector<1x32x32xbf16>
    %33 = vector.shape_cast %32 : vector<1x32x32xbf16> to vector<32x32xbf16>
    %cst_23 = arith.constant 0.000000e+00 : f32
    %34 = vector.broadcast %cst_23 : f32 to vector<32x1024xf32>
    %35 = arith.maximumf %31, %34 : vector<32x1024xf32>
    %36 = arith.truncf %35 : vector<32x1024xf32> to vector<32x1024xbf16>
    %cst_24 = arith.constant dense<0.000000e+00> : vector<32x1024xf32>
    %37 = tpu.matmul %33, %36, %cst_24 {dimension_numbers = #tpu.dot_dimension_numbers<[1], [0], [0], [1], [0, 0, 1, 1], [], []>} : vector<32x32xbf16>, vector<32x1024xbf16>, vector<32x1024xf32> -> vector<32x1024xf32>
    %c1_25 = arith.constant 1 : index
    %c0_26 = arith.constant 0 : index
    %c0_27 = arith.constant 0 : index
    %38 = vector.load %arg5[%c1_25, %c0_26, %c0_27] : memref<3x32x1xf32, #tpu.memory_space<vmem>>, vector<1x32x1xf32>
    %39 = vector.shape_cast %38 : vector<1x32x1xf32> to vector<32x1xf32>
    %40 = vector.broadcast %39 : vector<32x1xf32> to vector<32x1024xf32>
    %41 = arith.addf %37, %40 : vector<32x1024xf32>
    %c1_28 = arith.constant 1 : index
    %c0_29 = arith.constant 0 : index
    %c0_30 = arith.constant 0 : index
    %42 = vector.load %arg6[%c1_28, %c0_29, %c0_30] : memref<3x32x32xbf16, #tpu.memory_space<vmem>>, vector<1x32x32xbf16>
    %43 = vector.shape_cast %42 : vector<1x32x32xbf16> to vector<32x32xbf16>
    %cst_31 = arith.constant 0.000000e+00 : f32
    %44 = vector.broadcast %cst_31 : f32 to vector<32x1024xf32>
    %45 = arith.maximumf %41, %44 : vector<32x1024xf32>
    %46 = arith.truncf %45 : vector<32x1024xf32> to vector<32x1024xbf16>
    %cst_32 = arith.constant dense<0.000000e+00> : vector<32x1024xf32>
    %47 = tpu.matmul %43, %46, %cst_32 {dimension_numbers = #tpu.dot_dimension_numbers<[1], [0], [0], [1], [0, 0, 1, 1], [], []>} : vector<32x32xbf16>, vector<32x1024xbf16>, vector<32x1024xf32> -> vector<32x1024xf32>
    %c1_33 = arith.constant 1 : index
    %c0_34 = arith.constant 0 : index
    %c0_35 = arith.constant 0 : index
    %48 = vector.load %arg7[%c1_33, %c0_34, %c0_35] : memref<3x32x1xf32, #tpu.memory_space<vmem>>, vector<1x32x1xf32>
    %49 = vector.shape_cast %48 : vector<1x32x1xf32> to vector<32x1xf32>
    %50 = vector.broadcast %49 : vector<32x1xf32> to vector<32x1024xf32>
    %51 = arith.addf %47, %50 : vector<32x1024xf32>
    %52 = arith.addf %31, %51 : vector<32x1024xf32>
    %53 = vector.extract_strided_slice %5 {offsets = [96, 0], sizes = [32, 1024], strides = [1, 1]} : vector<128x1024xf32> to vector<32x1024xf32>
    %54 = arith.addf %52, %53 : vector<32x1024xf32>
    %c2 = arith.constant 2 : index
    %c0_36 = arith.constant 0 : index
    %c0_37 = arith.constant 0 : index
    %55 = vector.load %arg4[%c2, %c0_36, %c0_37] : memref<3x32x32xbf16, #tpu.memory_space<vmem>>, vector<1x32x32xbf16>
    %56 = vector.shape_cast %55 : vector<1x32x32xbf16> to vector<32x32xbf16>
    %cst_38 = arith.constant 0.000000e+00 : f32
    %57 = vector.broadcast %cst_38 : f32 to vector<32x1024xf32>
    %58 = arith.maximumf %54, %57 : vector<32x1024xf32>
    %59 = arith.truncf %58 : vector<32x1024xf32> to vector<32x1024xbf16>
    %cst_39 = arith.constant dense<0.000000e+00> : vector<32x1024xf32>
    %60 = tpu.matmul %56, %59, %cst_39 {dimension_numbers = #tpu.dot_dimension_numbers<[1], [0], [0], [1], [0, 0, 1, 1], [], []>} : vector<32x32xbf16>, vector<32x1024xbf16>, vector<32x1024xf32> -> vector<32x1024xf32>
    %c2_40 = arith.constant 2 : index
    %c0_41 = arith.constant 0 : index
    %c0_42 = arith.constant 0 : index
    %61 = vector.load %arg5[%c2_40, %c0_41, %c0_42] : memref<3x32x1xf32, #tpu.memory_space<vmem>>, vector<1x32x1xf32>
    %62 = vector.shape_cast %61 : vector<1x32x1xf32> to vector<32x1xf32>
    %63 = vector.broadcast %62 : vector<32x1xf32> to vector<32x1024xf32>
    %64 = arith.addf %60, %63 : vector<32x1024xf32>
    %c2_43 = arith.constant 2 : index
    %c0_44 = arith.constant 0 : index
    %c0_45 = arith.constant 0 : index
    %65 = vector.load %arg6[%c2_43, %c0_44, %c0_45] : memref<3x32x32xbf16, #tpu.memory_space<vmem>>, vector<1x32x32xbf16>
    %66 = vector.shape_cast %65 : vector<1x32x32xbf16> to vector<32x32xbf16>
    %cst_46 = arith.constant 0.000000e+00 : f32
    %67 = vector.broadcast %cst_46 : f32 to vector<32x1024xf32>
    %68 = arith.maximumf %64, %67 : vector<32x1024xf32>
    %69 = arith.truncf %68 : vector<32x1024xf32> to vector<32x1024xbf16>
    %cst_47 = arith.constant dense<0.000000e+00> : vector<32x1024xf32>
    %70 = tpu.matmul %66, %69, %cst_47 {dimension_numbers = #tpu.dot_dimension_numbers<[1], [0], [0], [1], [0, 0, 1, 1], [], []>} : vector<32x32xbf16>, vector<32x1024xbf16>, vector<32x1024xf32> -> vector<32x1024xf32>
    %c2_48 = arith.constant 2 : index
    %c0_49 = arith.constant 0 : index
    %c0_50 = arith.constant 0 : index
    %71 = vector.load %arg7[%c2_48, %c0_49, %c0_50] : memref<3x32x1xf32, #tpu.memory_space<vmem>>, vector<1x32x1xf32>
    %72 = vector.shape_cast %71 : vector<1x32x1xf32> to vector<32x1xf32>
    %73 = vector.broadcast %72 : vector<32x1xf32> to vector<32x1024xf32>
    %74 = arith.addf %70, %73 : vector<32x1024xf32>
    %75 = arith.addf %54, %74 : vector<32x1024xf32>
    %c0_51 = arith.constant 0 : index
    %c0_52 = arith.constant 0 : index
    %76 = vector.load %arg8[%c0_51, %c0_52] : memref<1x32xbf16, #tpu.memory_space<vmem>>, vector<1x32xbf16>
    %cst_53 = arith.constant 0.000000e+00 : f32
    %77 = vector.broadcast %cst_53 : f32 to vector<32x1024xf32>
    %78 = arith.maximumf %75, %77 : vector<32x1024xf32>
    %79 = arith.truncf %78 : vector<32x1024xf32> to vector<32x1024xbf16>
    %cst_54 = arith.constant dense<0.000000e+00> : vector<1x1024xf32>
    %80 = tpu.matmul %76, %79, %cst_54 {dimension_numbers = #tpu.dot_dimension_numbers<[1], [0], [0], [1], [0, 0, 1, 1], [], []>} : vector<1x32xbf16>, vector<32x1024xbf16>, vector<1x1024xf32> -> vector<1x1024xf32>
    %c0_55 = arith.constant 0 : index
    %c0_56 = arith.constant 0 : index
    %81 = vector.load %arg9[%c0_55, %c0_56] : memref<1x1xf32, #tpu.memory_space<vmem>>, vector<1x1xf32>
    %82 = vector.broadcast %81 : vector<1x1xf32> to vector<1x1024xf32>
    %83 = arith.addf %80, %82 : vector<1x1024xf32>
    %c0_57 = arith.constant 0 : index
    %c0_58 = arith.constant 0 : index
    %84 = vector.load %arg10[%c0_57, %c0_58] : memref<1x1024xf32, #tpu.memory_space<vmem>>, vector<1x1024xf32>
    tpu.vector_store %arg10[%c0_57, %c0_58], %83 {strides = array<i32>} : memref<1x1024xf32, #tpu.memory_space<vmem>>, vector<1x1024xf32>,
    return
  }
  func.func @transform_0(%arg0: i32) -> (i32, i32) {
    %c0_i32 = arith.constant 0 : i32
    %c0_i32_0 = arith.constant 0 : i32
    return %c0_i32, %arg0 : i32, i32
  }
  func.func @transform_1(%arg0: i32) -> (i32, i32) {
    %c0_i32 = arith.constant 0 : i32
    %c0_i32_0 = arith.constant 0 : i32
    %c0_i32_1 = arith.constant 0 : i32
    return %c0_i32, %c0_i32_0 : i32, i32
  }
  func.func @transform_2(%arg0: i32) -> (i32, i32) {
    %c0_i32 = arith.constant 0 : i32
    %c0_i32_0 = arith.constant 0 : i32
    %c0_i32_1 = arith.constant 0 : i32
    return %c0_i32, %c0_i32_0 : i32, i32
  }
  func.func @transform_3(%arg0: i32) -> (i32, i32, i32) {
    %c0_i32 = arith.constant 0 : i32
    %c0_i32_0 = arith.constant 0 : i32
    %c0_i32_1 = arith.constant 0 : i32
    %c0_i32_2 = arith.constant 0 : i32
    return %c0_i32, %c0_i32_0, %c0_i32_1 : i32, i32, i32
  }
  func.func @transform_4(%arg0: i32) -> (i32, i32, i32) {
    %c0_i32 = arith.constant 0 : i32
    %c0_i32_0 = arith.constant 0 : i32
    %c0_i32_1 = arith.constant 0 : i32
    %c0_i32_2 = arith.constant 0 : i32
    return %c0_i32, %c0_i32_0, %c0_i32_1 : i32, i32, i32
  }
  func.func @transform_5(%arg0: i32) -> (i32, i32, i32) {
    %c0_i32 = arith.constant 0 : i32
    %c0_i32_0 = arith.constant 0 : i32
    %c0_i32_1 = arith.constant 0 : i32
    %c0_i32_2 = arith.constant 0 : i32
    return %c0_i32, %c0_i32_0, %c0_i32_1 : i32, i32, i32
  }
  func.func @transform_6(%arg0: i32) -> (i32, i32, i32) {
    %c0_i32 = arith.constant 0 : i32
    %c0_i32_0 = arith.constant 0 : i32
    %c0_i32_1 = arith.constant 0 : i32
    %c0_i32_2 = arith.constant 0 : i32
    return %c0_i32, %c0_i32_0, %c0_i32_1 : i32, i32, i32
  }
  func.func @transform_7(%arg0: i32) -> (i32, i32) {
    %c0_i32 = arith.constant 0 : i32
    %c0_i32_0 = arith.constant 0 : i32
    %c0_i32_1 = arith.constant 0 : i32
    return %c0_i32, %c0_i32_0 : i32, i32
  }
  func.func @transform_8(%arg0: i32) -> (i32, i32) {
    %c0_i32 = arith.constant 0 : i32
    %c0_i32_0 = arith.constant 0 : i32
    %c0_i32_1 = arith.constant 0 : i32
    return %c0_i32, %c0_i32_0 : i32, i32
  }
  func.func @transform_9(%arg0: i32) -> (i32, i32) {
    %c0_i32 = arith.constant 0 : i32
    %c0_i32_0 = arith.constant 0 : i32
    return %c0_i32, %arg0 : i32, i32
  }
}

</mosaic_0001>

<bundles_post_ra>
// kernel: tpu_custom_call.1
= control target key start
LH: loop header
LB: loop body
LE: loop exit
PB: predicated region body
PF: predicated region fallthrough
CT: control target
= control target key end

     0   :  { %s6014_s0 = inlined_call_operand.hbm [shape: bf16[40,4096], index: 0, kind: input, shape index: {}]   ;;  %s6015_s1 = inlined_call_operand.vmem [shape: bf16[128,40], index: 1, kind: input, shape index: {}]   ;;  %s6016_s2 = inlined_call_operand.vmem [shape: f32[128,1], index: 2, kind: input, shape index: {}]   ;;  %s6017_s3 = inlined_call_operand.vmem [shape: bf16[3,32,32], index: 3, kind: input, shape index: {}]   ;;  %s6018_s4 = inlined_call_operand.vmem [shape: f32[3,32,1], index: 4, kind: input, shape index: {}]   ;;  %s6019_s5 = inlined_call_operand.vmem [shape: bf16[3,32,32], index: 5, kind: input, shape index: {}]   ;;  %s6020_s6 = inlined_call_operand.vmem [shape: f32[3,32,1], index: 6, kind: input, shape index: {}]   ;;  %s6021_s7 = inlined_call_operand.vmem [shape: bf16[1,32], index: 7, kind: input, shape index: {}]   ;;  %s6022_s8 = inlined_call_operand.<no memory space> [shape: f32[1,1], index: 8, kind: input, shape index: {}]   ;;  %s6023_s9 = inlined_call_operand.hbm [shape: f32[1,4096], index: 9, kind: output, shape index: {}]  }
   0x1   :  { %v14_v0 = vstv %s6022_s8 }
   0x2   :  { %15 = vst [vmem:[#allocation2] sm:$0x1] %v14_v0 }
   0x3   :  { %16 = vsyncpa [#allocation4], 0 }
   0x4   :  { %18 = vsyncpa [#allocation4 + $0x1], 0 }
   0x5   :  { %19 = vsyncpa [#allocation5], 0 }
   0x6   :  { %21 = vsyncpa [#allocation5 + $0x1], 0  ;;  %s4296_s11 = smov 0   ;;  %s4298_s12 = smov 0  }
   0x7   :  { %s4300_s13 = smov 0   ;;  %s4302_s14 = smov 0  }
   0x8 LB: > { %s4317_s8 = sadd.s32 4294967295, %s4234_s14   ;;  %s3525_s15 = sadd.s32 4294967294, %s4234_s14   ;;  %s4234_s14 = sphi %s4302_s14, %s6185_s14   ;;  %s4230_s13 = sphi %s4300_s13, %s6184_s13   ;;  %s4226_s12 = sphi %s4298_s12, %s6183_s12   ;;  %s4222_s11 = sphi %s4296_s11, %s6182_s11  }
   0x9   : > { %s4321_s16 = sadd.s32 1, %s4234_s14   ;;  %s34_s17 = sadd.s32 1, %s4230_s13 }
   0xa   : > { %s31_s18 = ssub.s32 %s4234_s14, %s4321_s16  ;;  %p41_p0 = scmp.ne.s32.totalorder %s4230_s13, %s4226_s12 }
   0xb   : > { %p32_p1 = scmp.eq.s32.totalorder %s31_s18, 0  ;;  %p42_p2 = scmp.eq.s32.totalorder %s4234_s14, 0 }
   0xc   : > { %p47_p3 = scmp.ne.s32.totalorder %s4226_s12, %s4222_s11  ;;  %p48_p4 = scmp.eq.s32.totalorder %s4317_s8, 0 }
   0xd   : > { %s4333_s19 = scalar_select %p32_p1, %s4230_s13, %s34_s17  }
   0xe   : > { %p43_p5 = por %p42_p2, %p41_p0  ;;  %p4335_p6 = por %p48_p4, %p47_p3 }
   0xf   : > { %p239_p7 = scmp.eq.s32.totalorder %s4317_s8, 3  ;;  %p245_p8 = scmp.eq.s32.totalorder %s3525_s15, 3 }
  0x10   : > { %p4069_p9 = scmp.lt.s32.totalorder %s4234_s14, 4  ;;  %s289_s23 = sand.u32 1, %s4230_s13  }
  0x11   : > { %p4341_p10 = por %p239_p7, %p41_p0  ;;  %p4345_p11 = por %p245_p8, %p47_p3 }
  0x12   : > { %s3701_s24 = sshll.u32 %s4234_s14, 9  ;;  %s4055_s25 = smul.u32 160, %s289_s23 }
  0x13   : > { %s6077_s21 = scalar_select %p4341_p10, 1, 0 }
  0x14   : > { %s6078_s22 = scalar_select %p4345_p11, 1, 0 }
  0x15   : > { %s4354_s28 = scalar_lea.hbm %s6014_s0, %s3701_s24  ;;  %p4356_p12 = pnand %p4069_p9, %p43_p5 }
  0x16   : > { %s293_s30 = scalar_lea.vmem [#allocation3], %s4055_s25  ;;  %s4363_s15 = scalar_lea.sflag [#allocation4], %s289_s23 }
  0x17   : > { %s300_s10 = sshll.u32 %s293_s30, 4  ;;  %s4138_s17 = scalar_lea.hbm %s4354_s28, 2560  ;;  %s4360_s10 = int_to_ptr.vmem [resolvable:$true] %s300_s10 }
  0x18   : > { %p4139_p0 = scmp.ne.s32.totalorder %s4354_s28, %s4138_s17  ;;  %p4140_p1 = pneg %p4356_p12 }
  0x19   : > { %s4143_s26 = scalar_lea.hbm %s6014_s0, 10240  ;;  %p4144_p4 = scmp.lt.u32.totalorder %s4354_s28, %s6014_s0 }
  0x1a   : > { %p4141_p2 = pnand %p4140_p1, %p4139_p0  ;;  %p4145_p5 = scmp.lt.u32.totalorder %s4143_s26, %s4138_s17 }
  0x1b   : > { %p4147_p8 = scmp.lt.u32.totalorder %s4138_s17, %s4354_s28 }
  0x1c   : > { %p4142_p3 = pneg %p4141_p2  ;;  %p4146_p7 = por %p4145_p5, %p4144_p4 }
  0x1e   : > { %p4148_p9 = por %p4147_p8, %p4146_p7 }
  0x20   : > { %p4149_p13 = pnand %p4148_p9, %p4142_p3 }
  0x22   : > { %4152 = shalt.err (!%p4149_p13)
}
  0x23   : > { %s4153_s23 = scalar_lea.vmem %s4360_s10, 2560  ;;  %s4236_s30 = smov [#allocation3]  }
  0x24   : > { %p4154_p0 = scmp.ne.s32.totalorder %s4360_s10, %s4153_s23  ;;  %s4158_s18 = sshll.u32 %s4236_s30, 4  ;;  %s4159_s18 = int_to_ptr.vmem [resolvable:$false] %s4158_s18 }
  0x25   : > { %s4160_s24 = scalar_lea.vmem %s4159_s18, 5120  ;;  %p4161_p10 = scmp.lt.s32.totalorder %s4360_s10, %s4159_s18 }
  0x26   : > { %p4156_p2 = pnand %p4154_p0, %p4140_p1  ;;  %p4162_p4 = scmp.lt.s32.totalorder %s4160_s24, %s4153_s23 }
  0x28   : > { %p4157_p11 = pneg %p4156_p2  ;;  %p4163_p5 = por %p4162_p4, %p4161_p10 }
  0x2a   : > { %p4164_p7 = pnand %p4163_p5, %p4157_p11 }
  0x2c   : > { %4167 = shalt.err (!%p4164_p7)
}
  0x2d   : > { %s4237_s17 = smov 2048   ;;  %s4238_s26 = smov 512  }
  0x2e   : > { %s4239_s27 = smov 32   ;;  %p308_p13 = scmp.lt.s32.totalorder %s4234_s14, 5 }
  0x2f   : > { %4064 = dma.hbm_to_vmem [thread:$0]  (!%p4356_p12), %s4354_s28, 2560, %s4360_s10, %s4363_s15, %s4237_s17, %s4238_s26, %s4239_s27  }
  0x30   : > { %p6080_p1 = scmp.ge.s32.totalorder %s4234_s14, 1 }
  0x32   : > { %p309_p3 = pnand %p6080_p1, %p308_p13 }
  0x34   : > { %312 = sbr.rel (%p309_p3) target bundleno = 2032 (0x7f0), region = 56 }
  0x3b   : > { %s4395_s25 = sand.u32 1, %s4226_s12  }
  0x3c   : > { %s4056_s23 = smul.u32 160, %s4395_s25  ;;  %s315_s30 = scalar_lea.sflag [#allocation4], %s4395_s25 }
  0x3e   : > { %s4399_s18 = scalar_lea.vmem [#allocation3], %s4056_s23 }
  0x3f   : > { %4213 = dma.done.wait (%p4335_p6), %s315_s30, 2560  }
  0x40   : > { %4215 = vsyncadd (%p4335_p6), %s315_s30, 4294964736  ;;  %v6025_v1 = vmov 0   ;;  %v356_v2 = vld [vmem:[%s4399_s18] sm:$0xff]  ;;  %v357_v4 = vld [vmem:[%s4399_s18 + $0x8] sm:$0xff]  ;;  %vm653_vm0 = vcmask 1043456   ;;  %vm628_vm1 = vcmask 326656  }
  0x41   : > { %710 = vmatprep.mubr.bf16.mxu0 %v6025_v1  ;;  %823 = vmatprep.mubr.bf16.mxu1 %v6025_v1  ;;  %v360_v3 = vld [vmem:[%s4399_s18 + $0x20] sm:$0xff]  ;;  %v361_v6 = vld [vmem:[%s4399_s18 + $0x28] sm:$0xff]  ;;  %v358_v22 = vld [vmem:[%s4399_s18 + $0x10] sm:$0xff]  ;;  %vm1248_vm2 = vcmask 261120   ;;  %s3531_s10 = sshll.u32 %s4395_s25, 3  ;;  %s3702_s15 = sshll.u32 %s4317_s8, 7 }
  0x42   : > { %4108 = vset.pattern.permute.xlu0 %v6025_v1  ;;  %4109 = vset.pattern.permute.xlu1 %v6025_v1  ;;  %v3541_v5 = vcombine.high %v356_v2, %v360_v3  ;;  %v3540_v7 = vcombine.low %v356_v2, %v360_v3  ;;  %v364_v8 = vld [vmem:[%s4399_s18 + $0x40] sm:$0xff]  ;;  %v3543_v10 = vcombine.high %v357_v4, %v361_v6  ;;  %v365_v13 = vld [vmem:[%s4399_s18 + $0x48] sm:$0xff]  ;;  %v362_v23 = vld [vmem:[%s4399_s18 + $0x30] sm:$0xff]  ;;  %s352_s24 = scalar_lea.vmem [#allocation6], %s3531_s10  ;;  %s5971_s27 = scalar_lea.hbm %s6023_s9, %s3702_s15 }
  0x43   : > { %v368_v9 = vld [vmem:[%s4399_s18 + $0x60] sm:$0xff]  ;;  %v3542_v11 = vcombine.low %v357_v4, %v361_v6  ;;  %v369_v14 = vld [vmem:[%s4399_s18 + $0x68] sm:$0xff]  ;;  %v359_v26 = vld [vmem:[%s4399_s18 + $0x18] sm:$0xff]  ;;  %v3545_v31 = vcombine.high %v358_v22, %v362_v23  ;;  %v3544_v40 = vcombine.low %v358_v22, %v362_v23  ;;  %s3455_s17 = sshll.u32 %s352_s24, 4  ;;  %s3441_s23 = scalar_lea.sflag [#allocation5], %s4395_s25  ;;  %s5973_s17 = int_to_ptr.vmem [resolvable:$true] %s3455_s17 }
  0x44   : > { %v3549_v12 = vcombine.high %v364_v8, %v368_v9  ;;  %v372_v15 = vld [vmem:[%s4399_s18 + $0x80] sm:$0xff]  ;;  %678 = vmatprep.subr.bf16.mxu0 %v3541_v5  ;;  %v3551_v16 = vcombine.high %v365_v13, %v369_v14  ;;  %v373_v17 = vld [vmem:[%s4399_s18 + $0x88] sm:$0xff]  ;;  %791 = vmatprep.subr.bf16.mxu1 %v3543_v10  ;;  %v3548_v18 = vcombine.low %v364_v8, %v368_v9  ;;  %v363_v27 = vld [vmem:[%s4399_s18 + $0x38] sm:$0xff]  ;;  %s4168_s30 = scalar_lea.vmem %s5973_s17, 128  ;;  %p6180_p10 = scmp.ne.s32.totalorder %s6077_s21, 0 }
  0x45   : > { %679 = vmatpush1.bf16.msra.mxu0 %v3540_v7  ;;  %792 = vmatpush1.bf16.msra.mxu1 %v3542_v11  ;;  %v3550_v19 = vcombine.low %v365_v13, %v369_v14  ;;  %v3557_v20 = vcombine.high %v372_v15, %v372_v15  ;;  %v3556_v21 = vcombine.low %v372_v15, %v372_v15  ;;  %v392_v28 = vld [vmem:[%s6016_s2] sm:$0xff]  ;;  %v393_v32 = vld [vmem:[%s6016_s2 + $0x8] sm:$0xff]  ;;  %v366_v37 = vld [vmem:[%s4399_s18 + $0x50] sm:$0xff]  ;;  %p4169_p6 = scmp.ne.s32.totalorder %s5973_s17, %s4168_s30  ;;  %s4242_s8 = smov [#allocation6]  }
  0x46   : > { %680 = vmatprep.subr.bf16.mxu0 %v3549_v12  ;;  %793 = vmatprep.subr.bf16.mxu1 %v3551_v16  ;;  %v3559_v24 = vcombine.high %v373_v17, %v373_v17  ;;  %v3558_v25 = vcombine.low %v373_v17, %v373_v17  ;;  %v396_v29 = vld [vmem:[%s6016_s2 + $0x20] sm:$0xff]  ;;  %v3547_v35 = vcombine.high %v359_v26, %v363_v27  ;;  %v397_v36 = vld [vmem:[%s6016_s2 + $0x28] sm:$0xff]  ;;  %v370_v38 = vld [vmem:[%s4399_s18 + $0x70] sm:$0xff]  ;;  %s4172_s20 = sshll.u32 %s4242_s8, 4  ;;  %s4173_s20 = int_to_ptr.vmem [resolvable:$false] %s4172_s20 }
  0x47   : > { %410 = vperm.xlu0 %4108, %v392_v28   ;;  %v655_v30 = vsel %vm653_vm0, %v3556_v21, 0  ;;  %v4439_v34 = vld [vmem:[%s6015_s1] sm:$0xff]   ;;  %430 = vperm.xlu1 %4109, %v396_v29   ;;  %v3546_v42 = vcombine.low %v359_v26, %v363_v27  ;;  %v394_v43 = vld [vmem:[%s6016_s2 + $0x10] sm:$0xff]  ;;  %v3553_v44 = vcombine.high %v366_v37, %v370_v38  ;;  %v3552_v46 = vcombine.low %v366_v37, %v370_v38  ;;  %v395_v47 = vld [vmem:[%s6016_s2 + $0x18] sm:$0xff]  ;;  %p4170_p11 = pnand %p4169_p6, %p6180_p10  ;;  %s4174_s28 = scalar_lea.vmem %s4173_s20, 256 }
  0x48   : > { %v661_v33 = vsel %vm653_vm0, %v3558_v25, 0  ;;  %v367_v39 = vld [vmem:[%s4399_s18 + $0x58] sm:$0xff]  ;;  %v374_v49 = vld [vmem:[%s4399_s18 + $0x90] sm:$0xff]  ;;  %v4465_v53 = vld [vmem:[%s6015_s1 + $0x8] sm:$0xff]   ;;  %p4175_p8 = scmp.lt.s32.totalorder %s5973_s17, %s4173_s20  ;;  %p4176_p9 = scmp.lt.s32.totalorder %s4174_s28, %s4168_s30 }
  0x49   : > { %681 = vmatpush1.bf16.msra.mxu0 %v3548_v18  ;;  %794 = vmatpush1.bf16.msra.mxu1 %v3550_v19  ;;  %v371_v41 = vld [vmem:[%s4399_s18 + $0x78] sm:$0xff]  ;;  %v3561_v51 = vcombine.high %v374_v49, %v374_v49  ;;  %v398_v54 = vld [vmem:[%s6016_s2 + $0x30] sm:$0xff]  ;;  %v3560_v55 = vcombine.low %v374_v49, %v374_v49  ;;  %v1215_v61 = vld [vmem:[%s6018_s4 + $0x8] sm:$0xff]  ;;  %p4171_p12 = pneg %p4170_p11 }
  0x4a   : > { %3564 = vmatprep.subr.msk.bf16.mxu0 %vm653_vm0, %v3557_v20  ;;  %3573 = vmatprep.subr.msk.bf16.mxu1 %vm653_vm0, %v3559_v24  ;;  %v3555_v45 = vcombine.high %v367_v39, %v371_v41  ;;  %v3554_v48 = vcombine.low %v367_v39, %v371_v41  ;;  %v375_v50 = vld [vmem:[%s4399_s18 + $0x98] sm:$0xff]  ;;  %v4492_v62 = vld [vmem:[%s6015_s1 + $0x10] sm:$0xff]   ;;  %v401_v3 = vld [vmem:[%s6016_s2 + $0x48] sm:$0xff]  ;;  %p4177_p0 = por %p4176_p9, %p4175_p8 }
  0x4b   : > { %415 = vperm.xlu0 %4108, %v393_v32   ;;  %435 = vperm.xlu1 %4109, %v397_v36   ;;  %v3563_v52 = vcombine.high %v375_v50, %v375_v50  ;;  %v3562_v56 = vcombine.low %v375_v50, %v375_v50  ;;  %v399_v57 = vld [vmem:[%s6016_s2 + $0x38] sm:$0xff]  ;;  %v1214_v58 = vld [vmem:[%s6018_s4] sm:$0xff]  ;;  %v667_v59 = vsel %vm653_vm0, %v3560_v55, 0  ;;  %v1216_v63 = vld [vmem:[%s6018_s4 + $0x10] sm:$0xff] }
  0x4c   : > { %v1217_v0 = vld [vmem:[%s6018_s4 + $0x18] sm:$0xff]  ;;  %v400_v2 = vld [vmem:[%s6016_s2 + $0x40] sm:$0xff]  ;;  %v1520_v6 = vld [vmem:[%s6020_s6 + $0x8] sm:$0xff]  ;;  %p4178_p2 = pnand %p4177_p0, %p4171_p12 }
  0x4d   : > { %683 = vmatpush1.bf16.msra.mxu0 %v655_v30  ;;  %796 = vmatpush1.bf16.msra.mxu1 %v661_v33  ;;  %v673_v60 = vsel %vm653_vm0, %v3562_v56, 0  ;;  %v4515_v4 = vld [vmem:[%s6015_s1 + $0x18] sm:$0xff]   ;;  %v1519_v5 = vld [vmem:[%s6020_s6] sm:$0xff]  ;;  %v402_v7 = vld [vmem:[%s6016_s2 + $0x50] sm:$0xff] }
  0x4e   : > { %904 = vmatprep.subr.bf16.mxu0 %v3545_v31  ;;  %1017 = vmatprep.subr.bf16.mxu1 %v3547_v35  ;;  %v403_v8 = vld [vmem:[%s6016_s2 + $0x58] sm:$0xff]  ;;  %v4538_v9 = vld [vmem:[%s6015_s1 + $0x20] sm:$0xff]   ;;  %v1521_v10 = vld [vmem:[%s6020_s6 + $0x10] sm:$0xff] }
  0x4f   : > { %420 = vperm.xlu0 %4108, %v394_v43   ;;  %425 = vperm.xlu1 %4109, %v395_v47   ;;  %v1522_v11 = vld [vmem:[%s6020_s6 + $0x18] sm:$0xff]  ;;  %v3624_v12 = vld [vmem:[%s6018_s4 + $0x20] sm:$0xff]  ;;  %v3625_v13 = vld [vmem:[%s6018_s4 + $0x28] sm:$0xff] }
  0x50   : > { %3565 = vmatmul.mubr.msk.bf16.vlgmr.msra.gmra.mrb[0].mxu0 %vm628_vm1, %v4439_v34  ;;  %3574 = vmatmul.mubr.msk.bf16.vlgmr.msra.gmra.mrb[0].mxu1 %vm628_vm1, %v4439_v34  ;;  %v4561_v14 = vld [vmem:[%s6015_s1 + $0x28] sm:$0xff]   ;;  %v3626_v15 = vld [vmem:[%s6018_s4 + $0x30] sm:$0xff]  ;;  %v3627_v16 = vld [vmem:[%s6018_s4 + $0x38] sm:$0xff] }
  0x51   : > { %905 = vmatpush1.bf16.msra.mxu0 %v3544_v40  ;;  %1018 = vmatpush1.bf16.msra.mxu1 %v3546_v42  ;;  %v404_v17 = vld [vmem:[%s6016_s2 + $0x60] sm:$0xff]  ;;  %v405_v18 = vld [vmem:[%s6016_s2 + $0x68] sm:$0xff]  ;;  %v4584_v19 = vld [vmem:[%s6015_s1 + $0x30] sm:$0xff]  }
  0x52   : > { %720 = vmatprep.mubr.bf16.mxu0 %v6025_v1  ;;  %833 = vmatprep.mubr.bf16.mxu1 %v6025_v1  ;;  %v3642_v20 = vld [vmem:[%s6020_s6 + $0x20] sm:$0xff]  ;;  %v3643_v21 = vld [vmem:[%s6020_s6 + $0x28] sm:$0xff]  ;;  %v406_v22 = vld [vmem:[%s6016_s2 + $0x70] sm:$0xff] }
  0x53   : > { %906 = vmatprep.subr.bf16.mxu0 %v3553_v44  ;;  %1019 = vmatprep.subr.bf16.mxu1 %v3555_v45  ;;  %v407_v23 = vld [vmem:[%s6016_s2 + $0x78] sm:$0xff]  ;;  %v3644_v25 = vld [vmem:[%s6020_s6 + $0x30] sm:$0xff]  ;;  %v3660_v27 = vld [vmem:[%s6018_s4 + $0x40] sm:$0xff] }
  0x54   : > { %440 = vperm.xlu0 %4108, %v398_v54   ;;  %445 = vperm.xlu1 %4109, %v399_v57   ;;  %v4125_v24 = vld [vmem:[%s6015_s1 + $0x38] sm:$0xff]   ;;  %v3661_v28 = vld [vmem:[%s6018_s4 + $0x48] sm:$0xff]  ;;  %v3662_v29 = vld [vmem:[%s6018_s4 + $0x50] sm:$0xff] }
  0x55   : > { %907 = vmatpush1.bf16.msra.mxu0 %v3552_v46  ;;  %1020 = vmatpush1.bf16.msra.mxu1 %v3554_v48  ;;  %v3645_v26 = vld [vmem:[%s6020_s6 + $0x38] sm:$0xff]  ;;  %v3678_v31 = vld [vmem:[%s6020_s6 + $0x40] sm:$0xff]  ;;  %v3679_v32 = vld [vmem:[%s6020_s6 + $0x48] sm:$0xff] }
  0x56   : > { %3582 = vmatprep.subr.msk.bf16.mxu0 %vm653_vm0, %v3561_v51  ;;  %3591 = vmatprep.subr.msk.bf16.mxu1 %vm653_vm0, %v3563_v52  ;;  %v3663_v30 = vld [vmem:[%s6018_s4 + $0x58] sm:$0xff]  ;;  %v3680_v33 = vld [vmem:[%s6020_s6 + $0x50] sm:$0xff]  ;;  %v3204_v35 = vld [vmem:[#allocation2] sm:$0x1] }
  0x58   : > { %3566 = vmatmul.mubr.msk.bf16.gmra.mrb[4].mxu0 %vm628_vm1, %v4465_v53  ;;  %3575 = vmatmul.mubr.msk.bf16.gmra.mrb[4].mxu1 %vm628_vm1, %v4465_v53 }
  0x59   : > { %730 = vmatprep.mubr.bf16.mxu0 %v6025_v1  ;;  %843 = vmatprep.mubr.bf16.mxu1 %v6025_v1 }
  0x5a   : > { %1220 = vperm.xlu0 %4108, %v1214_v58   ;;  %909 = vmatpush1.bf16.msra.mxu0 %v667_v59 }
  0x5b   : > { %1022 = vmatpush1.bf16.msra.mxu1 %v673_v60  ;;  %1225 = vperm.xlu1 %4109, %v1215_v61  }
  0x5e   : > { %1230 = vperm.xlu0 %4108, %v1216_v63  }
  0x5f   : > { %1235 = vperm.xlu1 %4109, %v1217_v0  }
  0x60   : > { %3567 = vmatmul.mubr.msk.bf16.gmra.mrb[0].mxu0 %vm628_vm1, %v4492_v62  ;;  %3576 = vmatmul.mubr.msk.bf16.gmra.mrb[0].mxu1 %vm628_vm1, %v4492_v62 }
  0x61   : > { %740 = vmatprep.mubr.bf16.mxu0 %v6025_v1  ;;  %853 = vmatprep.mubr.bf16.mxu1 %v6025_v1 }
  0x62   : > { %450 = vperm.xlu0 %4108, %v400_v2  }
  0x63   : > { %455 = vperm.xlu1 %4109, %v401_v3  }
  0x66   : > { %1525 = vperm.xlu0 %4108, %v1519_v5  }
  0x67   : > { %1530 = vperm.xlu1 %4109, %v1520_v6  }
  0x68   : > { %3568 = vmatmul.mubr.msk.bf16.gmra.mrb[4].mxu0 %vm628_vm1, %v4515_v4  ;;  %3577 = vmatmul.mubr.msk.bf16.gmra.mrb[4].mxu1 %vm628_vm1, %v4515_v4 }
  0x69   : > { %750 = vmatprep.mubr.bf16.mxu0 %v6025_v1  ;;  %863 = vmatprep.mubr.bf16.mxu1 %v6025_v1 }
  0x6a   : > { %460 = vperm.xlu0 %4108, %v402_v7  }
  0x6b   : > { %465 = vperm.xlu1 %4109, %v403_v8  }
  0x6e   : > { %1535 = vperm.xlu0 %4108, %v1521_v10  }
  0x6f   : > { %1540 = vperm.xlu1 %4109, %v1522_v11  }
  0x70   : > { %3569 = vmatmul.mubr.msk.bf16.gmra.mrb[8].mxu0 %vm628_vm1, %v4538_v9  ;;  %3578 = vmatmul.mubr.msk.bf16.gmra.mrb[8].mxu1 %vm628_vm1, %v4538_v9 }
  0x71   : > { %760 = vmatprep.mubr.bf16.mxu0 %v6025_v1  ;;  %873 = vmatprep.mubr.bf16.mxu1 %v6025_v1 }
  0x72   : > { %1895 = vperm.xlu0 %4108, %v3624_v12  }
  0x73   : > { %1900 = vperm.xlu1 %4109, %v3625_v13  }
  0x76   : > { %1905 = vperm.xlu0 %4108, %v3626_v15  }
  0x77   : > { %1910 = vperm.xlu1 %4109, %v3627_v16  }
  0x78   : > { %3570 = vmatmul.mubr.msk.bf16.gmra.mrb[12].mxu0 %vm628_vm1, %v4561_v14  ;;  %3579 = vmatmul.mubr.msk.bf16.gmra.mrb[12].mxu1 %vm628_vm1, %v4561_v14 }
  0x79   : > { %770 = vmatprep.mubr.bf16.mxu0 %v6025_v1  ;;  %883 = vmatprep.mubr.bf16.mxu1 %v6025_v1 }
  0x7a   : > { %470 = vperm.xlu0 %4108, %v404_v17  }
  0x7b   : > { %475 = vperm.xlu1 %4109, %v405_v18  }
  0x7e   : > { %2201 = vperm.xlu0 %4108, %v3642_v20  }
  0x7f   : > { %2206 = vperm.xlu1 %4109, %v3643_v21  }
  0x80   : > { %3571 = vmatmul.mubr.msk.bf16.gmra.mrb[16].mxu0 %vm628_vm1, %v4584_v19  ;;  %3580 = vmatmul.mubr.msk.bf16.gmra.mrb[16].mxu1 %vm628_vm1, %v4584_v19 }
  0x81   : > { %780 = vmatprep.mubr.bf16.mxu0 %v6025_v1  ;;  %893 = vmatprep.mubr.bf16.mxu1 %v6025_v1 }
  0x82   : > { %480 = vperm.xlu0 %4108, %v406_v22  }
  0x83   : > { %485 = vperm.xlu1 %4109, %v407_v23  }
  0x86   : > { %2211 = vperm.xlu0 %4108, %v3644_v25  }
  0x87   : > { %2216 = vperm.xlu1 %4109, %v3645_v26  }
  0x88   : > { %3572 = vmatmul.mubr.msk.bf16.gmra.mrb[20].mxu0 %vm628_vm1, %v4125_v24  ;;  %3581 = vmatmul.mubr.msk.bf16.gmra.mrb[20].mxu1 %vm628_vm1, %v4125_v24 }
  0x89   : > { %936 = vmatprep.mubr.bf16.mxu0 %v6025_v1  ;;  %1049 = vmatprep.mubr.bf16.mxu1 %v6025_v1 }
  0x8a   : > { %2571 = vperm.xlu0 %4108, %v3660_v27  }
  0x8b   : > { %2576 = vperm.xlu1 %4109, %v3661_v28  }
  0x8e   : > { %2581 = vperm.xlu0 %4108, %v3662_v29  }
  0x8f   : > { %2586 = vperm.xlu1 %4109, %v3663_v30  }
  0x90   : > { %3583 = vmatmul.mubr.msk.bf16.vlgmr.msra.gmra.mrb[24].mxu0 %vm628_vm1, %v4439_v34  ;;  %3592 = vmatmul.mubr.msk.bf16.vlgmr.msra.gmra.mrb[24].mxu1 %vm628_vm1, %v4439_v34  ;;  %v3681_v34 = vld [vmem:[%s6020_s6 + $0x58] sm:$0xff] }
  0x91   : > { %946 = vmatprep.mubr.bf16.mxu0 %v6025_v1  ;;  %1059 = vmatprep.mubr.bf16.mxu1 %v6025_v1 }
  0x92   : > { %2877 = vperm.xlu0 %4108, %v3678_v31  }
  0x93   : > { %2882 = vperm.xlu1 %4109, %v3679_v32  }
  0x96   : > { %2887 = vperm.xlu0 %4108, %v3680_v33  }
  0x97   : > { %2892 = vperm.xlu1 %4109, %v3681_v34  }
  0x98   : > { %3584 = vmatmul.mubr.msk.bf16.gmra.mrb[28].mxu0 %vm628_vm1, %v4465_v53  ;;  %3593 = vmatmul.mubr.msk.bf16.gmra.mrb[28].mxu1 %vm628_vm1, %v4465_v53 }
  0x99   : > { %956 = vmatprep.mubr.bf16.mxu0 %v6025_v1  ;;  %1069 = vmatprep.mubr.bf16.mxu1 %v6025_v1 }
  0x9a   : > { %3207 = vperm.xlu0 %4108, %v3204_v35  }
  0xa0   : > { %3585 = vmatmul.mubr.msk.bf16.gmra.mrb[24].mxu0 %vm628_vm1, %v4492_v62  ;;  %3594 = vmatmul.mubr.msk.bf16.gmra.mrb[24].mxu1 %vm628_vm1, %v4492_v62 }
  0xa1   : > { %966 = vmatprep.mubr.bf16.mxu0 %v6025_v1  ;;  %1079 = vmatprep.mubr.bf16.mxu1 %v6025_v1 }
  0xa8   : > { %3586 = vmatmul.mubr.msk.bf16.gmra.mrb[28].mxu0 %vm628_vm1, %v4515_v4  ;;  %3595 = vmatmul.mubr.msk.bf16.gmra.mrb[28].mxu1 %vm628_vm1, %v4515_v4 }
  0xa9   : > { %976 = vmatprep.mubr.bf16.mxu0 %v6025_v1  ;;  %1089 = vmatprep.mubr.bf16.mxu1 %v6025_v1 }
  0xb0   : > { %3587 = vmatmul.mubr.msk.bf16.gmra.mrb[32].mxu0 %vm628_vm1, %v4538_v9  ;;  %3596 = vmatmul.mubr.msk.bf16.gmra.mrb[32].mxu1 %vm628_vm1, %v4538_v9 }
  0xb1   : > { %986 = vmatprep.mubr.bf16.mxu0 %v6025_v1  ;;  %1099 = vmatprep.mubr.bf16.mxu1 %v6025_v1 }
  0xb8   : > { %3588 = vmatmul.mubr.msk.bf16.gmra.mrb[36].mxu0 %vm628_vm1, %v4561_v14  ;;  %3597 = vmatmul.mubr.msk.bf16.gmra.mrb[36].mxu1 %vm628_vm1, %v4561_v14 }
  0xb9   : > { %996 = vmatprep.mubr.bf16.mxu0 %v6025_v1  ;;  %1109 = vmatprep.mubr.bf16.mxu1 %v6025_v1 }
  0xc0   : > { %3589 = vmatmul.mubr.msk.bf16.gmra.mrb[40].mxu0 %vm628_vm1, %v4584_v19  ;;  %3598 = vmatmul.mubr.msk.bf16.gmra.mrb[40].mxu1 %vm628_vm1, %v4584_v19 }
  0xc1   : > { %1006 = vmatprep.mubr.bf16.mxu0 %v6025_v1  ;;  %1119 = vmatprep.mubr.bf16.mxu1 %v6025_v1 }
  0xc6   : > { %v4687_v36 = vpop.permute.xlu0 %410  ;;  %v4689_v37 = vpop.permute.xlu1 %430 }
  0xc7   : > { %v4721_v51 = vadd.f32 %v4689_v37, %v4687_v36 }
  0xc8   : > { %3590 = vmatmul.mubr.msk.bf16.gmra.mrb[44].mxu0 %vm628_vm1, %v4125_v24  ;;  %3599 = vmatmul.mubr.msk.bf16.gmra.mrb[44].mxu1 %vm628_vm1, %v4125_v24 }
  0xc9   : > { %1287 = vmatprep.mubr.bf16.mxu0 %v6025_v1  ;;  %1340 = vmatprep.mubr.bf16.mxu1 %v6025_v1 }
  0xca   : > { %v4691_v38 = vpop.permute.xlu0 %415  ;;  %v4693_v39 = vpop.permute.xlu1 %435 }
  0xcb   : > { %v4711_v47 = vadd.f32 %v4693_v39, %v4691_v38 }
  0xce   : > { %v4695_v40 = vpop.permute.xlu0 %420  ;;  %v4697_v41 = vpop.permute.xlu1 %425 }
  0xd3   : > { %v4723_v52 = vpop.permute.xlu0 %440  ;;  %v4733_v55 = vpop.permute.xlu1 %445 }
  0xd4   : > { %v4763_v0 = vadd.f32 %v4723_v52, %v4695_v40  ;;  %v4767_v2 = vadd.f32 %v4733_v55, %v4697_v41 }
 0x133   : > { %v4699_v42 = vpop.f32.mrb[0].mxu0  ;;  %v4701_v43 = vpop.f32.mrb[0].mxu1 }
 0x134   : > { %v4703_v44 = vpop.f32.mrb[1].mxu0  ;;  %v4705_v45 = vpop.f32.mrb[1].mxu1  ;;  %v4747_v59 = vadd.f32 %v4721_v51, %v4699_v42  ;;  %v4771_v3 = vadd.f32 %v4721_v51, %v4701_v43 }
 0x135   : > { %v4707_v46 = vpop.f32.mrb[2].mxu0  ;;  %v4713_v48 = vpop.f32.mrb[2].mxu1  ;;  %v4751_v60 = vadd.f32 %v4721_v51, %v4703_v44  ;;  %v4755_v61 = vadd.f32 %v4721_v51, %v4705_v45 }
 0x136   : > { %v4715_v49 = vpop.f32.mrb[3].mxu0  ;;  %v4717_v50 = vpop.f32.mrb[3].mxu1  ;;  %v4737_v56 = vadd.f32 %v4711_v47, %v4707_v46  ;;  %v4741_v57 = vadd.f32 %v4711_v47, %v4713_v48  ;;  %6085 = vst [vmem:[#allocation13_spill] sm:$0xff] %v4747_v59  ;;  %6088 = vst [vmem:[#allocation16_spill] sm:$0xff] %v4771_v3  ;;  %v1166_v13 = vmax.f32 %v4747_v59, 0.0  ;;  %v1168_v16 = vmax.f32 %v4771_v3, 0.0 }
 0x137   : > { %v4727_v53 = vadd.f32 %v4711_v47, %v4715_v49  ;;  %v4731_v54 = vadd.f32 %v4711_v47, %v4717_v50  ;;  %6086 = vst [vmem:[#allocation14_spill] sm:$0xff] %v4751_v60  ;;  %6087 = vst [vmem:[#allocation15_spill] sm:$0xff] %v4755_v61  ;;  %v1167_v14 = vmax.f32 %v4751_v60, 0.0  ;;  %v1169_v15 = vmax.f32 %v4755_v61, 0.0 }
 0x138   : > { %6083 = vst [vmem:[#allocation11_spill] sm:$0xff] %v4737_v56  ;;  %6084 = vst [vmem:[#allocation12_spill] sm:$0xff] %v4741_v57  ;;  %v1174_v10 = vmax.f32 %v4737_v56, 0.0  ;;  %v1176_v11 = vmax.f32 %v4741_v57, 0.0 }
 0x139   : > { %6081 = vst [vmem:[#allocation9_spill] sm:$0xff] %v4727_v53  ;;  %6082 = vst [vmem:[#allocation10_spill] sm:$0xff] %v4731_v54  ;;  %v1175_v6 = vmax.f32 %v4727_v53, 0.0  ;;  %v1177_v7 = vmax.f32 %v4731_v54, 0.0 }
 0x13a   : > { %v1198_v24 = vpack.c.bf16 %v1174_v10, %v1166_v13  ;;  %v1200_v25 = vpack.c.bf16 %v1176_v11, %v1168_v16 }
 0x13b   : > { %v4743_v58 = vpop.f32.mrb[4].mxu0  ;;  %v4757_v62 = vpop.f32.mrb[4].mxu1  ;;  %v1199_v22 = vpack.c.bf16 %v1175_v6, %v1167_v14  ;;  %v1201_v23 = vpack.c.bf16 %v1177_v7, %v1169_v15  ;;  %v4834_v14 = vld [vmem:[%s6017_s3] sm:$0xff]   ;;  %v4845_v15 = vld [vmem:[%s6017_s3 + $0x8] sm:$0xff]  }
 0x13c   : > { %v4759_v63 = vpop.f32.mrb[5].mxu0  ;;  %v4773_v4 = vpop.f32.mrb[5].mxu1  ;;  %v4805_v20 = vadd.f32 %v4763_v0, %v4743_v58  ;;  %v4813_v26 = vadd.f32 %v4763_v0, %v4757_v62 }
 0x13d   : > { %v4775_v5 = vpop.f32.mrb[6].mxu0  ;;  %v4779_v8 = vpop.f32.mrb[6].mxu1  ;;  %v4793_v17 = vadd.f32 %v4763_v0, %v4759_v63  ;;  %v4809_v21 = vadd.f32 %v4763_v0, %v4773_v4  ;;  %1255 = vmatprep.subr.bf16.mxu0 %v1199_v22  ;;  %1308 = vmatprep.subr.bf16.mxu1 %v1201_v23 }
 0x13e   : > { %v4781_v9 = vpop.f32.mrb[7].mxu0  ;;  %v4785_v12 = vpop.f32.mrb[7].mxu1  ;;  %v4797_v18 = vadd.f32 %v4767_v2, %v4775_v5  ;;  %v4801_v19 = vadd.f32 %v4767_v2, %v4779_v8  ;;  %6092 = vst [vmem:[#allocation20_spill] sm:$0xff] %v4805_v20  ;;  %6094 = vst [vmem:[#allocation22_spill] sm:$0xff] %v4813_v26  ;;  %1256 = vmatpush1.bf16.msra.mxu0 %v1198_v24  ;;  %1309 = vmatpush1.bf16.msra.mxu1 %v1200_v25  ;;  %v1182_v33 = vmax.f32 %v4805_v20, 0.0 }
 0x13f   : > { %6089 = vst [vmem:[#allocation17_spill] sm:$0xff] %v4793_v17  ;;  %6093 = vst [vmem:[#allocation21_spill] sm:$0xff] %v4809_v21  ;;  %v4817_v27 = vadd.f32 %v4767_v2, %v4781_v9  ;;  %v4822_v29 = vadd.f32 %v4767_v2, %v4785_v12  ;;  %v1183_v30 = vmax.f32 %v4793_v17, 0.0  ;;  %v1185_v34 = vmax.f32 %v4809_v21, 0.0 }
 0x140   : > { %6090 = vst [vmem:[#allocation18_spill] sm:$0xff] %v4797_v18  ;;  %6091 = vst [vmem:[#allocation19_spill] sm:$0xff] %v4801_v19  ;;  %v1190_v28 = vmax.f32 %v4797_v18, 0.0  ;;  %v1192_v31 = vmax.f32 %v4801_v19, 0.0  ;;  %v1184_v6 = vmax.f32 %v4813_v26, 0.0 }
 0x141   : > { %6095 = vst [vmem:[#allocation23_spill] sm:$0xff] %v4817_v27  ;;  %6096 = vst [vmem:[#allocation24_spill] sm:$0xff] %v4822_v29  ;;  %v1191_v32 = vmax.f32 %v4817_v27, 0.0  ;;  %v1193_v35 = vmax.f32 %v4822_v29, 0.0 }
 0x142   : > { %v1206_v10 = vpack.c.bf16 %v1190_v28, %v1182_v33  ;;  %v1208_v13 = vpack.c.bf16 %v1192_v31, %v1184_v6 }
 0x143   : > { %v1207_v7 = vpack.c.bf16 %v1191_v32, %v1183_v30  ;;  %v1209_v11 = vpack.c.bf16 %v1193_v35, %v1185_v34 }
 0x145   : > { %1257 = vmatprep.subr.bf16.mxu0 %v1207_v7  ;;  %1310 = vmatprep.subr.bf16.mxu1 %v1209_v11 }
 0x146   : > { %1258 = vmatpush1.bf16.msra.mxu0 %v1206_v10  ;;  %1311 = vmatpush1.bf16.msra.mxu1 %v1208_v13 }
 0x149   : > { %3602 = vmatmul.mubr.msk.bf16.vlgmr.msra.gmra.mrb[48].mxu0 %vm1248_vm2, %v4834_v14  ;;  %3604 = vmatmul.mubr.msk.bf16.vlgmr.msra.gmra.mrb[48].mxu1 %vm1248_vm2, %v4834_v14 }
 0x14a   : > { %1297 = vmatprep.mubr.bf16.mxu0 %v6025_v1  ;;  %1350 = vmatprep.mubr.bf16.mxu1 %v6025_v1 }
 0x151   : > { %3603 = vmatmul.mubr.msk.bf16.gmra.mrb[52].mxu0 %vm1248_vm2, %v4845_v15  ;;  %3605 = vmatmul.mubr.msk.bf16.gmra.mrb[52].mxu1 %vm1248_vm2, %v4845_v15 }
 0x152   : > { %1393 = vmatprep.mubr.bf16.mxu0 %v6025_v1  ;;  %1446 = vmatprep.mubr.bf16.mxu1 %v6025_v1 }
 0x173   : > { %v4853_v16 = vpop.f32.mrb[24].mxu0  ;;  %v4855_v22 = vpop.f32.mrb[24].mxu1 }
 0x174   : > { %v4857_v23 = vpop.f32.mrb[25].mxu0  ;;  %v4859_v24 = vpop.f32.mrb[25].mxu1  ;;  %v4889_v7 = vadd.f32 %v4721_v51, %v4853_v16 }
 0x175   : > { %v4861_v25 = vpop.f32.mrb[26].mxu0  ;;  %v4863_v28 = vpop.f32.mrb[26].mxu1  ;;  %v4893_v10 = vadd.f32 %v4721_v51, %v4857_v23  ;;  %v4897_v11 = vadd.f32 %v4721_v51, %v4859_v24 }
 0x176   : > { %v4865_v30 = vpop.f32.mrb[27].mxu0  ;;  %v4867_v31 = vpop.f32.mrb[27].mxu1  ;;  %v4879_v34 = vadd.f32 %v4711_v47, %v4861_v25  ;;  %v4883_v35 = vadd.f32 %v4711_v47, %v4863_v28  ;;  %6101 = vst [vmem:[#allocation29_spill] sm:$0xff] %v4889_v7 }
 0x177   : > { %v4871_v32 = vadd.f32 %v4711_v47, %v4865_v30  ;;  %v4875_v33 = vadd.f32 %v4711_v47, %v4867_v31  ;;  %6102 = vst [vmem:[#allocation30_spill] sm:$0xff] %v4893_v10  ;;  %6103 = vst [vmem:[#allocation31_spill] sm:$0xff] %v4897_v11  ;;  %v4905_v47 = vadd.f32 %v4721_v51, %v4855_v22  ;;  %v1170_v51 = vmax.f32 %v4889_v7, 0.0 }
 0x178   : > { %6099 = vst [vmem:[#allocation27_spill] sm:$0xff] %v4879_v34  ;;  %6100 = vst [vmem:[#allocation28_spill] sm:$0xff] %v4883_v35  ;;  %v1178_v26 = vmax.f32 %v4879_v34, 0.0  ;;  %v1180_v20 = vmax.f32 %v4883_v35, 0.0  ;;  %v1171_v57 = vmax.f32 %v4893_v10, 0.0  ;;  %v1173_v53 = vmax.f32 %v4897_v11, 0.0 }
 0x179   : > { %6097 = vst [vmem:[#allocation25_spill] sm:$0xff] %v4871_v32  ;;  %6098 = vst [vmem:[#allocation26_spill] sm:$0xff] %v4875_v33  ;;  %v1179_v19 = vmax.f32 %v4871_v32, 0.0  ;;  %v1181_v18 = vmax.f32 %v4875_v33, 0.0  ;;  %v1172_v32 = vmax.f32 %v4905_v47, 0.0 }
 0x17a   : > { %6106 = vst [vmem:[#allocation34_spill] sm:$0xff] %v4905_v47  ;;  %v1202_v7 = vpack.c.bf16 %v1178_v26, %v1170_v51 }
 0x17b   : > { %v4885_v6 = vpop.f32.mrb[28].mxu0  ;;  %v4899_v13 = vpop.f32.mrb[28].mxu1  ;;  %v1203_v47 = vpack.c.bf16 %v1179_v19, %v1171_v57  ;;  %v1205_v10 = vpack.c.bf16 %v1181_v18, %v1173_v53  ;;  %v1204_v3 = vpack.c.bf16 %v1180_v20, %v1172_v32 }
 0x17c   : > { %6104 = vst [vmem:[#allocation32_spill] sm:$0xff] %v4899_v13  ;;  %v4901_v1 = vpop.f32.mrb[29].mxu0  ;;  %v4907_v29 = vpop.f32.mrb[29].mxu1  ;;  %v4939_v34 = vadd.f32 %v4763_v0, %v4885_v6  ;;  %v4947_v56 = vadd.f32 %v4763_v0, %v4899_v13 }
 0x17d   : > { %6105 = vst [vmem:[#allocation33_spill] sm:$0xff] %v4901_v1  ;;  %6107 = vst [vmem:[#allocation35_spill] sm:$0xff] %v4907_v29  ;;  %v4909_v27 = vpop.f32.mrb[30].mxu0  ;;  %v4913_v21 = vpop.f32.mrb[30].mxu1  ;;  %v4927_v33 = vadd.f32 %v4763_v0, %v4901_v1  ;;  %v4943_v11 = vadd.f32 %v4763_v0, %v4907_v29  ;;  %1361 = vmatprep.subr.bf16.mxu0 %v1203_v47  ;;  %1414 = vmatprep.subr.bf16.mxu1 %v1205_v10 }
 0x17e   : > { %6108 = vst [vmem:[#allocation36_spill] sm:$0xff] %v4909_v27  ;;  %6109 = vst [vmem:[#allocation37_spill] sm:$0xff] %v4913_v21  ;;  %v4915_v17 = vpop.f32.mrb[31].mxu0  ;;  %v4919_v54 = vpop.f32.mrb[31].mxu1  ;;  %v4931_v61 = vadd.f32 %v4767_v2, %v4909_v27  ;;  %v4935_v35 = vadd.f32 %v4767_v2, %v4913_v21  ;;  %1362 = vmatpush1.bf16.msra.mxu0 %v1202_v7  ;;  %1415 = vmatpush1.bf16.msra.mxu1 %v1204_v3  ;;  %v1186_v0 = vmax.f32 %v4939_v34, 0.0  ;;  %v6120_v3 = vmov 0  }
 0x17f   : > { %6110 = vst [vmem:[#allocation38_spill] sm:$0xff] %v4915_v17  ;;  %6111 = vst [vmem:[#allocation39_spill] sm:$0xff] %v4919_v54  ;;  %v4951_v60 = vadd.f32 %v4767_v2, %v4915_v17  ;;  %v4956_v21 = vadd.f32 %v4767_v2, %v4919_v54  ;;  %v1187_v53 = vmax.f32 %v4927_v33, 0.0  ;;  %v1189_v19 = vmax.f32 %v4943_v11, 0.0  ;;  %v4979_v7 = vpop.permute.xlu1 %1225 }
 0x180   : > { %6112 = vst [vmem:[#allocation40_spill] sm:$0xff] %v4927_v33  ;;  %6113 = vst [vmem:[#allocation41_spill] sm:$0xff] %v4931_v61  ;;  %v1194_v59 = vmax.f32 %v4931_v61, 0.0  ;;  %v1196_v57 = vmax.f32 %v4935_v35, 0.0  ;;  %v1188_v26 = vmax.f32 %v4947_v56, 0.0 }
 0x181   : > { %6114 = vst [vmem:[#allocation42_spill] sm:$0xff] %v4935_v35  ;;  %6115 = vst [vmem:[#allocation43_spill] sm:$0xff] %v4939_v34  ;;  %v1195_v18 = vmax.f32 %v4951_v60, 0.0  ;;  %v1197_v20 = vmax.f32 %v4956_v21, 0.0 }
 0x182   : > { %6116 = vst [vmem:[#allocation44_spill] sm:$0xff] %v4943_v11  ;;  %6117 = vst [vmem:[#allocation45_spill] sm:$0xff] %v4947_v56  ;;  %v1210_v10 = vpack.c.bf16 %v1194_v59, %v1186_v0  ;;  %v1212_v47 = vpack.c.bf16 %v1196_v57, %v1188_v26  ;;  %v4977_v59 = vpop.permute.xlu0 %1220 }
 0x183   : > { %6118 = vst [vmem:[#allocation46_spill] sm:$0xff] %v4951_v60  ;;  %6119 = vst [vmem:[#allocation47_spill] sm:$0xff] %v4956_v21  ;;  %v1211_v32 = vpack.c.bf16 %v1195_v18, %v1187_v53  ;;  %v1213_v2 = vpack.c.bf16 %v1197_v20, %v1189_v19  ;;  %v4991_v34 = vpop.permute.xlu1 %1235 }
 0x185   : > { %1363 = vmatprep.subr.bf16.mxu0 %v1211_v32  ;;  %1416 = vmatprep.subr.bf16.mxu1 %v1213_v2 }
 0x186   : > { %1364 = vmatpush1.bf16.msra.mxu0 %v1210_v10  ;;  %1417 = vmatpush1.bf16.msra.mxu1 %v1212_v47  ;;  %v4989_v33 = vpop.permute.xlu0 %1230 }
 0x189   : > { %3606 = vmatmul.mubr.msk.bf16.vlgmr.msra.gmra.mrb[56].mxu0 %vm1248_vm2, %v4834_v14  ;;  %3608 = vmatmul.mubr.msk.bf16.vlgmr.msra.gmra.mrb[56].mxu1 %vm1248_vm2, %v4834_v14 }
 0x18a   : > { %1403 = vmatprep.mubr.bf16.mxu0 %v6120_v3  ;;  %1456 = vmatprep.mubr.bf16.mxu1 %v6120_v3 }
 0x191   : > { %3607 = vmatmul.mubr.msk.bf16.gmra.mrb[60].mxu0 %vm1248_vm2, %v4845_v15  ;;  %3609 = vmatmul.mubr.msk.bf16.gmra.mrb[60].mxu1 %vm1248_vm2, %v4845_v15 }
 0x192   : > { %1591 = vmatprep.mubr.bf16.mxu0 %v6120_v3  ;;  %1644 = vmatprep.mubr.bf16.mxu1 %v6120_v3 }
 0x21c   : > { %v1289_v51 = vpop.f32.mrb[48].mxu0  ;;  %v1342_v53 = vpop.f32.mrb[48].mxu1 }
 0x21d   : > { %v1290_v14 = vadd.f32 %v1289_v51, %v4977_v59  ;;  %v1291_v57 = vpop.f32.mrb[49].mxu0  ;;  %v1343_v18 = vadd.f32 %v1342_v53, %v4977_v59  ;;  %v1344_v19 = vpop.f32.mrb[49].mxu1 }
 0x21e   : > { %v1292_v0 = vadd.f32 %v1291_v57, %v4977_v59  ;;  %v1293_v20 = vpop.f32.mrb[50].mxu0  ;;  %v1345_v15 = vadd.f32 %v1344_v19, %v4977_v59  ;;  %v1346_v32 = vpop.f32.mrb[50].mxu1 }
 0x21f   : > { %v1294_v26 = vadd.f32 %v1293_v20, %v4979_v7  ;;  %v1295_v10 = vpop.f32.mrb[51].mxu0  ;;  %v1347_v2 = vadd.f32 %v1346_v32, %v4979_v7  ;;  %v1348_v21 = vpop.f32.mrb[51].mxu1  ;;  %v1471_v51 = vmax.f32 %v1290_v14, 0.0  ;;  %v1473_v53 = vmax.f32 %v1343_v18, 0.0 }
 0x220   : > { %v1296_v47 = vadd.f32 %v1295_v10, %v4979_v7  ;;  %v1349_v35 = vadd.f32 %v1348_v21, %v4979_v7  ;;  %v1472_v61 = vmax.f32 %v1292_v0, 0.0  ;;  %v1474_v19 = vmax.f32 %v1345_v15, 0.0 }
 0x221   : > { %v1479_v60 = vmax.f32 %v1294_v26, 0.0  ;;  %v1481_v57 = vmax.f32 %v1347_v2, 0.0 }
 0x222   : > { %v1480_v11 = vmax.f32 %v1296_v47, 0.0  ;;  %v1482_v20 = vmax.f32 %v1349_v35, 0.0 }
 0x223   : > { %v1503_v56 = vpack.c.bf16 %v1479_v60, %v1471_v51  ;;  %v1505_v54 = vpack.c.bf16 %v1481_v57, %v1473_v53 }
 0x224   : > { %v1504_v32 = vpack.c.bf16 %v1480_v11, %v1472_v61  ;;  %v1299_v17 = vpop.f32.mrb[52].mxu0  ;;  %v1506_v10 = vpack.c.bf16 %v1482_v20, %v1474_v19  ;;  %v1352_v26 = vpop.f32.mrb[52].mxu1 }
 0x225   : > { %v1300_v14 = vadd.f32 %v1299_v17, %v4989_v33  ;;  %v1301_v27 = vpop.f32.mrb[53].mxu0  ;;  %v1353_v21 = vadd.f32 %v1352_v26, %v4989_v33  ;;  %v1354_v0 = vpop.f32.mrb[53].mxu1 }
 0x226   : > { %v1302_v18 = vadd.f32 %v1301_v27, %v4989_v33  ;;  %v1303_v2 = vpop.f32.mrb[54].mxu0  ;;  %1559 = vmatprep.subr.bf16.mxu0 %v1504_v32  ;;  %v1355_v60 = vadd.f32 %v1354_v0, %v4989_v33  ;;  %v1356_v15 = vpop.f32.mrb[54].mxu1  ;;  %1612 = vmatprep.subr.bf16.mxu1 %v1506_v10 }
 0x227   : > { %v1304_v35 = vadd.f32 %v1303_v2, %v4991_v34  ;;  %v1305_v61 = vpop.f32.mrb[55].mxu0  ;;  %1560 = vmatpush1.bf16.msra.mxu0 %v1503_v56  ;;  %v1357_v11 = vadd.f32 %v1356_v15, %v4991_v34  ;;  %v1358_v47 = vpop.f32.mrb[55].mxu1  ;;  %1613 = vmatpush1.bf16.msra.mxu1 %v1505_v54  ;;  %v1487_v51 = vmax.f32 %v1300_v14, 0.0  ;;  %v1489_v57 = vmax.f32 %v1353_v21, 0.0  ;;  %v5004_v15 = vld [vmem:[%s6019_s5] sm:$0xff]   ;;  %v5015_v54 = vld [vmem:[%s6019_s5 + $0x8] sm:$0xff]  }
 0x228   : > { %v1306_v17 = vadd.f32 %v1305_v61, %v4991_v34  ;;  %v1359_v27 = vadd.f32 %v1358_v47, %v4991_v34  ;;  %v1488_v19 = vmax.f32 %v1302_v18, 0.0  ;;  %v1490_v26 = vmax.f32 %v1355_v60, 0.0 }
 0x229   : > { %v1495_v53 = vmax.f32 %v1304_v35, 0.0  ;;  %v1497_v20 = vmax.f32 %v1357_v11, 0.0 }
 0x22a   : > { %v1496_v32 = vmax.f32 %v1306_v17, 0.0  ;;  %v1498_v2 = vmax.f32 %v1359_v27, 0.0 }
 0x22b   : > { %v1511_v0 = vpack.c.bf16 %v1495_v53, %v1487_v51  ;;  %v1513_v10 = vpack.c.bf16 %v1497_v20, %v1489_v57 }
 0x22c   : > { %v1512_v29 = vpack.c.bf16 %v1496_v32, %v1488_v19  ;;  %v1514_v56 = vpack.c.bf16 %v1498_v2, %v1490_v26 }
 0x22e   : > { %1561 = vmatprep.subr.bf16.mxu0 %v1512_v29  ;;  %1614 = vmatprep.subr.bf16.mxu1 %v1514_v56 }
 0x22f   : > { %1562 = vmatpush1.bf16.msra.mxu0 %v1511_v0  ;;  %1615 = vmatpush1.bf16.msra.mxu1 %v1513_v10 }
 0x232   : > { %3612 = vmatmul.mubr.msk.bf16.vlgmr.msra.gmra.mrb[8].mxu0 %vm1248_vm2, %v5004_v15  ;;  %3614 = vmatmul.mubr.msk.bf16.vlgmr.msra.gmra.mrb[8].mxu1 %vm1248_vm2, %v5004_v15 }
 0x233   : > { %1601 = vmatprep.mubr.bf16.mxu0 %v6120_v3  ;;  %1654 = vmatprep.mubr.bf16.mxu1 %v6120_v3 }
 0x23a   : > { %3613 = vmatmul.mubr.msk.bf16.gmra.mrb[12].mxu0 %vm1248_vm2, %v5015_v54  ;;  %3615 = vmatmul.mubr.msk.bf16.gmra.mrb[12].mxu1 %vm1248_vm2, %v5015_v54 }
 0x23b   : > { %1697 = vmatprep.mubr.bf16.mxu0 %v6120_v3  ;;  %1750 = vmatprep.mubr.bf16.mxu1 %v6120_v3 }
 0x25c   : > { %v1395_v29 = vpop.f32.mrb[56].mxu0  ;;  %v1448_v21 = vpop.f32.mrb[56].mxu1 }
 0x25d   : > { %v1396_v14 = vadd.f32 %v1395_v29, %v4977_v59  ;;  %v1397_v18 = vpop.f32.mrb[57].mxu0  ;;  %v1449_v60 = vadd.f32 %v1448_v21, %v4977_v59  ;;  %v1450_v61 = vpop.f32.mrb[57].mxu1 }
 0x25e   : > { %v1398_v35 = vadd.f32 %v1397_v18, %v4977_v59  ;;  %v1399_v11 = vpop.f32.mrb[58].mxu0  ;;  %v1451_v17 = vadd.f32 %v1450_v61, %v4977_v59  ;;  %v1452_v51 = vpop.f32.mrb[58].mxu1 }
 0x25f   : > { %v1400_v47 = vadd.f32 %v1399_v11, %v4979_v7  ;;  %v1401_v53 = vpop.f32.mrb[59].mxu0  ;;  %v1453_v27 = vadd.f32 %v1452_v51, %v4979_v7  ;;  %v1454_v19 = vpop.f32.mrb[59].mxu1  ;;  %v1475_v20 = vmax.f32 %v1396_v14, 0.0  ;;  %v1477_v0 = vmax.f32 %v1449_v60, 0.0 }
 0x260   : > { %v1402_v57 = vadd.f32 %v1401_v53, %v4979_v7  ;;  %v1455_v26 = vadd.f32 %v1454_v19, %v4979_v7  ;;  %v1476_v2 = vmax.f32 %v1398_v35, 0.0  ;;  %v1478_v29 = vmax.f32 %v1451_v17, 0.0 }
 0x261   : > { %v1483_v32 = vmax.f32 %v1400_v47, 0.0  ;;  %v1485_v10 = vmax.f32 %v1453_v27, 0.0 }
 0x262   : > { %v1484_v56 = vmax.f32 %v1402_v57, 0.0  ;;  %v1486_v59 = vmax.f32 %v1455_v26, 0.0 }
 0x263   : > { %v1507_v21 = vpack.c.bf16 %v1483_v32, %v1475_v20  ;;  %v1509_v18 = vpack.c.bf16 %v1485_v10, %v1477_v0 }
 0x264   : > { %v1508_v61 = vpack.c.bf16 %v1484_v56, %v1476_v2  ;;  %v1405_v11 = vpop.f32.mrb[60].mxu0  ;;  %v1510_v1 = vpack.c.bf16 %v1486_v59, %v1478_v29  ;;  %v1458_v13 = vpop.f32.mrb[60].mxu1 }
 0x265   : > { %v1406_v51 = vadd.f32 %v1405_v11, %v4989_v33  ;;  %v1407_v53 = vpop.f32.mrb[61].mxu0  ;;  %v1459_v14 = vadd.f32 %v1458_v13, %v4989_v33  ;;  %v1460_v7 = vpop.f32.mrb[61].mxu1 }
 0x266   : > { %v1408_v47 = vadd.f32 %v1407_v53, %v4989_v33  ;;  %v1409_v60 = vpop.f32.mrb[62].mxu0  ;;  %1665 = vmatprep.subr.bf16.mxu0 %v1508_v61  ;;  %v1461_v35 = vadd.f32 %v1460_v7, %v4989_v33  ;;  %v1462_v27 = vpop.f32.mrb[62].mxu1  ;;  %1718 = vmatprep.subr.bf16.mxu1 %v1510_v1  ;;  %v735_v53 = vadd.f32 %v4703_v44, %v4689_v37 }
 0x267   : > { %v1410_v17 = vadd.f32 %v1409_v60, %v4991_v34  ;;  %v1411_v57 = vpop.f32.mrb[63].mxu0  ;;  %1666 = vmatpush1.bf16.msra.mxu0 %v1507_v21  ;;  %v1463_v19 = vadd.f32 %v1462_v27, %v4991_v34  ;;  %v1464_v32 = vpop.f32.mrb[63].mxu1  ;;  %1719 = vmatpush1.bf16.msra.mxu1 %v1509_v18  ;;  %v1491_v13 = vmax.f32 %v1406_v51, 0.0  ;;  %v1493_v2 = vmax.f32 %v1459_v14, 0.0 }
 0x268   : > { %v1412_v20 = vadd.f32 %v1411_v57, %v4991_v34  ;;  %v1465_v0 = vadd.f32 %v1464_v32, %v4991_v34  ;;  %v1492_v10 = vmax.f32 %v1408_v47, 0.0  ;;  %v1494_v29 = vmax.f32 %v1461_v35, 0.0  ;;  %v5056_v18 = vpop.permute.xlu0 %450  ;;  %v5072_v60 = vpop.permute.xlu1 %455 }
 0x269   : > { %v1499_v26 = vmax.f32 %v1410_v17, 0.0  ;;  %v1501_v56 = vmax.f32 %v1463_v19, 0.0  ;;  %v5052_v34 = vadd.f32 nan, %v4687_v36  ;;  %v846_v51 = vadd.f32 %v4701_v43, %v4689_v37 }
 0x26a   : > { %v1500_v33 = vmax.f32 %v1412_v20, 0.0  ;;  %v1502_v61 = vmax.f32 %v1465_v0, 0.0  ;;  %v5066_v47 = vadd.f32 nan, %v4691_v38  ;;  %v737_v7 = vadd.f32 %v4707_v46, %v4693_v39 }
 0x26b   : > { %v1515_v59 = vpack.c.bf16 %v1499_v26, %v1491_v13  ;;  %v1517_v1 = vpack.c.bf16 %v1501_v56, %v1493_v2  ;;  %v1132_v36 = vadd.f32 %v846_v51, %v5052_v34  ;;  %v850_v44 = vadd.f32 %v4713_v48, %v4693_v39 }
 0x26c   : > { %v1516_v11 = vpack.c.bf16 %v1500_v33, %v1492_v10  ;;  %v1518_v21 = vpack.c.bf16 %v1502_v61, %v1494_v29  ;;  %v739_v38 = vadd.f32 %v4715_v49, %v4693_v39  ;;  %v852_v35 = vadd.f32 %v4717_v50, %v4693_v39  ;;  %v5101_v13 = vpop.permute.xlu1 %1530 }
 0x26d   : > { %v5084_v17 = vadd.f32 nan, %v4695_v40  ;;  %v743_v46 = vadd.f32 %v4743_v58, %v4723_v52  ;;  %v1138_v57 = vadd.f32 %v737_v7, %v5066_v47  ;;  %v3783_v48 = vadd.f32 %v1132_v36, %v5056_v18 }
 0x26e   : > { %1667 = vmatprep.subr.bf16.mxu0 %v1516_v11  ;;  %1720 = vmatprep.subr.bf16.mxu1 %v1518_v21  ;;  %v1140_v20 = vadd.f32 %v850_v44, %v5066_v47  ;;  %v5095_v50 = vadd.f32 nan, %v4697_v41  ;;  %v1139_v40 = vadd.f32 %v739_v38, %v5066_v47  ;;  %v1141_v32 = vadd.f32 %v852_v35, %v5066_v47 }
 0x26f   : > { %1668 = vmatpush1.bf16.msra.mxu0 %v1515_v59  ;;  %1721 = vmatpush1.bf16.msra.mxu1 %v1517_v1  ;;  %v856_v58 = vadd.f32 %v4757_v62, %v4723_v52  ;;  %v1146_v26 = vadd.f32 %v743_v46, %v5084_v17  ;;  %v745_v0 = vadd.f32 %v4759_v63, %v4723_v52 }
 0x270   : > { %v858_v2 = vadd.f32 %v4773_v4, %v4723_v52  ;;  %v747_v56 = vadd.f32 %v4775_v5, %v4733_v55  ;;  %v3725_v59 = vadd.f32 %v1138_v57, %v5072_v60  ;;  %v860_v63 = vadd.f32 %v4779_v8, %v4733_v55 }
 0x271   : > { %v3789_v5 = vadd.f32 %v1140_v20, %v5072_v60  ;;  %v1148_v21 = vadd.f32 %v856_v58, %v5084_v17  ;;  %v749_v57 = vadd.f32 %v4781_v9, %v4733_v55  ;;  %v862_v58 = vadd.f32 %v4785_v12, %v4733_v55 }
 0x272   : > { %3616 = vmatmul.mubr.msk.bf16.vlgmr.msra.gmra.mrb[32].mxu0 %vm1248_vm2, %v5004_v15  ;;  %3618 = vmatmul.mubr.msk.bf16.vlgmr.msra.gmra.mrb[32].mxu1 %vm1248_vm2, %v5004_v15  ;;  %v733_v15 = vadd.f32 %v4699_v42, %v4689_v37  ;;  %v1131_v42 = vadd.f32 %v735_v53, %v5052_v34  ;;  %v1149_v44 = vadd.f32 %v858_v2, %v5084_v17 }
 0x273   : > { %1707 = vmatprep.mubr.bf16.mxu0 %v6120_v3  ;;  %1760 = vmatprep.mubr.bf16.mxu1 %v6120_v3  ;;  %v3726_v38 = vadd.f32 %v3725_v59, %v5101_v13  ;;  %v1154_v46 = vadd.f32 %v747_v56, %v5095_v50 }
 0x274   : > { %v1130_v14 = vadd.f32 %v733_v15, %v5052_v34  ;;  %v3722_v19 = vadd.f32 %v1131_v42, %v5056_v18 }
 0x276   : > { %v3719_v27 = vadd.f32 %v1130_v14, %v5056_v18  ;;  %v1147_v14 = vadd.f32 %v745_v0, %v5084_v17 }
 0x27a   : > { %3617 = vmatmul.mubr.msk.bf16.gmra.mrb[36].mxu0 %vm1248_vm2, %v5015_v54  ;;  %3619 = vmatmul.mubr.msk.bf16.gmra.mrb[36].mxu1 %vm1248_vm2, %v5015_v54  ;;  %v848_v54 = vadd.f32 %v4705_v45, %v4689_v37  ;;  %v5077_v45 = vpop.permute.xlu0 %1525 }
 0x27b   : > { %1961 = vmatprep.mubr.bf16.mxu0 %v6120_v3  ;;  %2014 = vmatprep.mubr.bf16.mxu1 %v6120_v3  ;;  %v3720_v41 = vadd.f32 %v3719_v27, %v5077_v45  ;;  %v3784_v62 = vadd.f32 %v3783_v48, %v5077_v45  ;;  %v3723_v29 = vadd.f32 %v3722_v19, %v5077_v45 }
 0x27c   : > { %v1133_v43 = vadd.f32 %v848_v54, %v5052_v34  ;;  %v3728_v54 = vadd.f32 %v1139_v40, %v5072_v60  ;;  %v1156_v27 = vadd.f32 %v860_v63, %v5095_v50  ;;  %v3790_v48 = vadd.f32 %v3789_v5, %v5101_v13 }
 0x27d   : > { %v1155_v63 = vadd.f32 %v749_v57, %v5095_v50 }
 0x27e   : > { %v3786_v49 = vadd.f32 %v1133_v43, %v5056_v18  ;;  %v5109_v10 = vpop.permute.xlu0 %460  ;;  %v3792_v43 = vadd.f32 %v1141_v32, %v5072_v60  ;;  %v3729_v20 = vadd.f32 %v3728_v54, %v5101_v13  ;;  %v5159_v32 = vpop.permute.xlu1 %465 }
 0x27f   : > { %v3795_v40 = vadd.f32 %v1148_v21, %v5109_v10  ;;  %v3734_v9 = vadd.f32 %v1147_v14, %v5109_v10  ;;  %v3798_v59 = vadd.f32 %v1149_v44, %v5109_v10  ;;  %v3737_v44 = vadd.f32 %v1154_v46, %v5159_v32 }
 0x280   : > { %v3787_v11 = vadd.f32 %v3786_v49, %v5077_v45  ;;  %v3731_v49 = vadd.f32 %v1146_v26, %v5109_v10  ;;  %v3793_v2 = vadd.f32 %v3792_v43, %v5101_v13 }
 0x282   : > { %v5197_v46 = vpop.permute.xlu1 %1540 }
 0x305   : > { %v5113_v33 = vpop.f32.mrb[8].mxu0  ;;  %v5121_v61 = vpop.f32.mrb[8].mxu1 }
 0x306   : > { %v3721_v4 = vadd.f32 %v3720_v41, %v5113_v33  ;;  %v5123_v1 = vpop.f32.mrb[9].mxu0  ;;  %v3785_v15 = vadd.f32 %v3784_v62, %v5121_v61  ;;  %v5132_v53 = vpop.f32.mrb[9].mxu1 }
 0x307   : > { %v5130_v51 = vadd.f32 %v3723_v29, %v5123_v1  ;;  %v5134_v8 = vpop.f32.mrb[10].mxu0  ;;  %v5139_v36 = vadd.f32 %v3787_v11, %v5132_v53  ;;  %v5141_v42 = vpop.f32.mrb[10].mxu1 }
 0x308   : > { %6121 = vst [vmem:[#allocation48_spill] sm:$0xff] %v5141_v42  ;;  %v5143_v7 = vpop.f32.mrb[11].mxu0  ;;  %v5148_v35 = vpop.f32.mrb[11].mxu1  ;;  %v3727_v19 = vadd.f32 %v3726_v38, %v5134_v8  ;;  %v3791_v0 = vadd.f32 %v3790_v48, %v5141_v42  ;;  %v1840_v56 = vmax.f32 %v3721_v4, 0.0  ;;  %v1842_v11 = vmax.f32 %v3785_v15, 0.0 }
 0x309   : > { %6122 = vst [vmem:[#allocation49_spill] sm:$0xff] %v5148_v35  ;;  %v5166_v41 = vpop.permute.xlu0 %1535  ;;  %v3730_v29 = vadd.f32 %v3729_v20, %v5143_v7  ;;  %v3794_v5 = vadd.f32 %v3793_v2, %v5148_v35  ;;  %v3801_v20 = vadd.f32 %v1156_v27, %v5159_v32  ;;  %v1157_v2 = vadd.f32 %v862_v58, %v5095_v50 }
 0x30a   : > { %v1848_v62 = vmax.f32 %v3727_v19, 0.0  ;;  %v1850_v12 = vmax.f32 %v3791_v0, 0.0  ;;  %v3732_v4 = vadd.f32 %v3731_v49, %v5166_v41  ;;  %v3796_v43 = vadd.f32 %v3795_v40, %v5166_v41 }
 0x30b   : > { %v3735_v15 = vadd.f32 %v3734_v9, %v5166_v41  ;;  %v1851_v27 = vmax.f32 %v3794_v5, 0.0  ;;  %v3738_v58 = vadd.f32 %v3737_v44, %v5197_v46 }
 0x30c   : > { %v1872_v14 = vpack.c.bf16 %v1848_v62, %v1840_v56  ;;  %v1874_v57 = vpack.c.bf16 %v1850_v12, %v1842_v11  ;;  %v3799_v56 = vadd.f32 %v3798_v59, %v5166_v41  ;;  %v3740_v11 = vadd.f32 %v1155_v63, %v5159_v32 }
 0x30d   : > { %v5169_v26 = vpop.f32.mrb[12].mxu0  ;;  %v5174_v21 = vpop.f32.mrb[12].mxu1  ;;  %v1849_v12 = vmax.f32 %v3730_v29, 0.0  ;;  %v1843_v59 = vmax.f32 %v5139_v36, 0.0 }
 0x30e   : > { %6123 = vst [vmem:[#allocation50_spill] sm:$0xff] %v5169_v26  ;;  %6124 = vst [vmem:[#allocation51_spill] sm:$0xff] %v5174_v21  ;;  %v5176_v54 = vpop.f32.mrb[13].mxu0  ;;  %v5180_v38 = vpop.f32.mrb[13].mxu1  ;;  %v3733_v49 = vadd.f32 %v3732_v4, %v5169_v26  ;;  %v3797_v40 = vadd.f32 %v3796_v43, %v5174_v21  ;;  %v3802_v4 = vadd.f32 %v3801_v20, %v5197_v46  ;;  %v1841_v43 = vmax.f32 %v5130_v51, 0.0 }
 0x30f   : > { %6125 = vst [vmem:[#allocation52_spill] sm:$0xff] %v5176_v54  ;;  %6126 = vst [vmem:[#allocation53_spill] sm:$0xff] %v5180_v38  ;;  %v5182_v48 = vpop.f32.mrb[14].mxu0  ;;  %v5186_v19 = vpop.f32.mrb[14].mxu1  ;;  %v3736_v9 = vadd.f32 %v3735_v15, %v5176_v54  ;;  %v3800_v35 = vadd.f32 %v3799_v56, %v5180_v38  ;;  %v3804_v26 = vadd.f32 %v1157_v2, %v5159_v32 }
 0x310   : > { %v5189_v0 = vpop.f32.mrb[15].mxu0  ;;  %v5195_v62 = vpop.f32.mrb[15].mxu1  ;;  %v3739_v21 = vadd.f32 %v3738_v58, %v5182_v48  ;;  %v3803_v15 = vadd.f32 %v3802_v4, %v5186_v19  ;;  %v3741_v63 = vadd.f32 %v3740_v11, %v5197_v46  ;;  %v1856_v29 = vmax.f32 %v3733_v49, 0.0 }
 0x311   : > { %v1873_v54 = vpack.c.bf16 %v1849_v12, %v1841_v43  ;;  %v1875_v56 = vpack.c.bf16 %v1851_v27, %v1843_v59  ;;  %v1858_v38 = vmax.f32 %v3797_v40, 0.0  ;;  %v3805_v51 = vadd.f32 %v3804_v26, %v5197_v46  ;;  %v5216_v40 = vld [vmem:[%s6017_s3 + $0x10] sm:$0xff]  }
 0x312   : > { %v1864_v5 = vmax.f32 %v3739_v21, 0.0  ;;  %v1866_v44 = vmax.f32 %v3803_v15, 0.0  ;;  %v3742_v20 = vadd.f32 %v3741_v63, %v5189_v0  ;;  %v1857_v36 = vmax.f32 %v3736_v9, 0.0 }
 0x313   : > { %1929 = vmatprep.subr.bf16.mxu0 %v1873_v54  ;;  %1982 = vmatprep.subr.bf16.mxu1 %v1875_v56  ;;  %v3806_v11 = vadd.f32 %v3805_v51, %v5195_v62  ;;  %v1859_v21 = vmax.f32 %v3800_v35, 0.0  ;;  %v5227_v35 = vld [vmem:[%s6017_s3 + $0x18] sm:$0xff]   ;;  %v1072_v26 = vadd.f32 %v4855_v22, %v4689_v37  ;;  %v963_v4 = vadd.f32 %v4861_v25, %v4693_v39  ;;  %v6129_v56 = vld [vmem:[#allocation35_spill] sm:$0xff]  ;;  %v6130_v51 = vld [vmem:[#allocation36_spill] sm:$0xff] }
 0x314   : > { %v1880_v42 = vpack.c.bf16 %v1864_v5, %v1856_v29  ;;  %v1882_v58 = vpack.c.bf16 %v1866_v44, %v1858_v38  ;;  %v1865_v2 = vmax.f32 %v3742_v20, 0.0  ;;  %1930 = vmatpush1.bf16.msra.mxu0 %v1872_v14  ;;  %1983 = vmatpush1.bf16.msra.mxu1 %v1874_v57  ;;  %v961_v14 = vadd.f32 %v4857_v23, %v4689_v37  ;;  %v6128_v29 = vld [vmem:[#allocation33_spill] sm:$0xff] }
 0x315   : > { %v1867_v12 = vmax.f32 %v3806_v11, 0.0  ;;  %v1074_v38 = vadd.f32 %v4859_v24, %v4689_v37  ;;  %v1136_v9 = vadd.f32 %v1072_v26, %v5052_v34  ;;  %v1076_v22 = vadd.f32 %v4863_v28, %v4693_v39 }
 0x316   : > { %v1881_v49 = vpack.c.bf16 %v1865_v2, %v1857_v36  ;;  %v1135_v27 = vadd.f32 %v961_v14, %v5052_v34  ;;  %v965_v23 = vadd.f32 %v4865_v30, %v4693_v39  ;;  %v969_v24 = vadd.f32 %v4885_v6, %v4723_v52 }
 0x317   : > { %v1883_v54 = vpack.c.bf16 %v1867_v12, %v1859_v21  ;;  %v1142_v59 = vadd.f32 %v963_v4, %v5066_v47  ;;  %v3911_v25 = vadd.f32 %v1136_v9, %v5056_v18  ;;  %v1144_v15 = vadd.f32 %v1076_v22, %v5066_v47 }
 0x318   : > { %1931 = vmatprep.subr.bf16.mxu0 %v1881_v49  ;;  %v1143_v30 = vadd.f32 %v965_v23, %v5066_v47  ;;  %v1150_v6 = vadd.f32 %v969_v24, %v5084_v17  ;;  %v971_v5 = vadd.f32 %v6128_v29, %v4723_v52  ;;  %v1084_v44 = vadd.f32 %v6129_v56, %v4723_v52  ;;  %v6131_v49 = vld [vmem:[#allocation37_spill] sm:$0xff] }
 0x319   : > { %1932 = vmatpush1.bf16.msra.mxu0 %v1880_v42  ;;  %1984 = vmatprep.subr.bf16.mxu1 %v1883_v54  ;;  %v959_v42 = vadd.f32 %v4853_v16, %v4689_v37  ;;  %v1137_v16 = vadd.f32 %v1074_v38, %v5052_v34  ;;  %v1078_v37 = vadd.f32 %v4867_v31, %v4693_v39  ;;  %v6127_v39 = vld [vmem:[#allocation32_spill] sm:$0xff] }
 0x31a   : > { %1985 = vmatpush1.bf16.msra.mxu1 %v1882_v58  ;;  %v1082_v31 = vadd.f32 %v6127_v39, %v4723_v52  ;;  %v973_v36 = vadd.f32 %v6130_v51, %v4733_v55  ;;  %v3853_v11 = vadd.f32 %v1142_v59, %v5072_v60  ;;  %v1086_v21 = vadd.f32 %v6131_v49, %v4733_v55 }
 0x31b   : > { %v1134_v57 = vadd.f32 %v959_v42, %v5052_v34  ;;  %v3850_v34 = vadd.f32 %v1135_v27, %v5056_v18  ;;  %v3914_v28 = vadd.f32 %v1137_v16, %v5056_v18  ;;  %v1145_v63 = vadd.f32 %v1078_v37, %v5066_v47 }
 0x31c   : > { %3630 = vmatmul.mubr.msk.bf16.vlgmr.msra.gmra.mrb[64].mxu0 %vm1248_vm2, %v5216_v40  ;;  %v3912_v47 = vadd.f32 %v3911_v25, %v5077_v45  ;;  %v3917_v26 = vadd.f32 %v1144_v15, %v5072_v60  ;;  %v1152_v14 = vadd.f32 %v1082_v31, %v5084_v17  ;;  %v3856_v4 = vadd.f32 %v1143_v30, %v5072_v60 }
 0x31d   : > { %1971 = vmatprep.mubr.bf16.mxu0 %v6120_v3  ;;  %3632 = vmatmul.mubr.msk.bf16.vlgmr.msra.gmra.mrb[64].mxu1 %vm1248_vm2, %v5216_v40  ;;  %v3847_v43 = vadd.f32 %v1134_v57, %v5056_v18  ;;  %v3851_v2 = vadd.f32 %v3850_v34, %v5077_v45  ;;  %v3915_v42 = vadd.f32 %v3914_v28, %v5077_v45  ;;  %v6132_v28 = vld [vmem:[#allocation38_spill] sm:$0xff] }
 0x31e   : > { %2024 = vmatprep.mubr.bf16.mxu1 %v6120_v3  ;;  %v1151_v16 = vadd.f32 %v971_v5, %v5084_v17  ;;  %v3920_v24 = vadd.f32 %v1145_v63, %v5072_v60  ;;  %v3854_v59 = vadd.f32 %v3853_v11, %v5101_v13  ;;  %v1158_v34 = vadd.f32 %v973_v36, %v5095_v50  ;;  %v6133_v5 = vld [vmem:[#allocation39_spill] sm:$0xff] }
 0x31f   : > { %v3848_v20 = vadd.f32 %v3847_v43, %v5077_v45  ;;  %v1153_v43 = vadd.f32 %v1084_v44, %v5084_v17  ;;  %v1160_v15 = vadd.f32 %v1086_v21, %v5095_v50  ;;  %v975_v30 = vadd.f32 %v6132_v28, %v4733_v55 }
 0x320   : > { %v3918_v39 = vadd.f32 %v3917_v26, %v5101_v13  ;;  %v3857_v29 = vadd.f32 %v3856_v4, %v5101_v13  ;;  %v3859_v63 = vadd.f32 %v1150_v6, %v5109_v10  ;;  %v3923_v17 = vadd.f32 %v1152_v14, %v5109_v10 }
 0x321   : > { %v1088_v56 = vadd.f32 %v6133_v5, %v4733_v55  ;;  %v3862_v51 = vadd.f32 %v1151_v16, %v5109_v10  ;;  %v3926_v49 = vadd.f32 %v1153_v43, %v5109_v10  ;;  %v1159_v6 = vadd.f32 %v975_v30, %v5095_v50 }
 0x322   : > { %v3924_v16 = vadd.f32 %v3923_v17, %v5166_v41  ;;  %v3865_v43 = vadd.f32 %v1158_v34, %v5159_v32 }
 0x323   : > { %v3927_v5 = vadd.f32 %v3926_v49, %v5166_v41 }
 0x324   : > { %3631 = vmatmul.mubr.msk.bf16.gmra.mrb[68].mxu0 %vm1248_vm2, %v5227_v35 }
 0x325   : > { %2067 = vmatprep.mubr.bf16.mxu0 %v6120_v3  ;;  %3633 = vmatmul.mubr.msk.bf16.gmra.mrb[68].mxu1 %vm1248_vm2, %v5227_v35 }
 0x326   : > { %2120 = vmatprep.mubr.bf16.mxu1 %v6120_v3 }
 0x345   : > { %v5275_v58 = vpop.f32.mrb[32].mxu0  ;;  %v5283_v54 = vpop.f32.mrb[32].mxu1 }
 0x346   : > { %v3849_v12 = vadd.f32 %v3848_v20, %v5275_v58  ;;  %v5285_v52 = vpop.f32.mrb[33].mxu0  ;;  %v3913_v38 = vadd.f32 %v3912_v47, %v5283_v54  ;;  %v5294_v9 = vpop.f32.mrb[33].mxu1  ;;  %v3921_v20 = vadd.f32 %v3920_v24, %v5101_v13 }
 0x347   : > { %v5292_v57 = vadd.f32 %v3851_v2, %v5285_v52  ;;  %v5296_v27 = vpop.f32.mrb[34].mxu0  ;;  %v5301_v22 = vadd.f32 %v3915_v42, %v5294_v9  ;;  %v5303_v23 = vpop.f32.mrb[34].mxu1 }
 0x348   : > { %v5305_v37 = vpop.f32.mrb[35].mxu0  ;;  %v5310_v25 = vpop.f32.mrb[35].mxu1  ;;  %v3855_v31 = vadd.f32 %v3854_v59, %v5296_v27  ;;  %v3919_v44 = vadd.f32 %v3918_v39, %v5303_v23  ;;  %v1844_v36 = vmax.f32 %v3849_v12, 0.0  ;;  %v1846_v21 = vmax.f32 %v3913_v38, 0.0 }
 0x349   : > { %v3858_v2 = vadd.f32 %v3857_v29, %v5305_v37  ;;  %v3922_v55 = vadd.f32 %v3921_v20, %v5310_v25  ;;  %v3860_v12 = vadd.f32 %v3859_v63, %v5166_v41  ;;  %v3863_v38 = vadd.f32 %v3862_v51, %v5166_v41 }
 0x34a   : > { %v1852_v47 = vmax.f32 %v3855_v31, 0.0  ;;  %v1854_v42 = vmax.f32 %v3919_v44, 0.0  ;;  %v3929_v39 = vadd.f32 %v1160_v15, %v5159_v32  ;;  %v1161_v29 = vadd.f32 %v1088_v56, %v5095_v50 }
 0x34b   : > { %v3868_v20 = vadd.f32 %v1159_v6, %v5159_v32  ;;  %v1853_v51 = vmax.f32 %v3858_v2, 0.0  ;;  %v1845_v56 = vmax.f32 %v5292_v57, 0.0 }
 0x34c   : > { %v1876_v4 = vpack.c.bf16 %v1852_v47, %v1844_v36  ;;  %v1878_v28 = vpack.c.bf16 %v1854_v42, %v1846_v21  ;;  %v1855_v36 = vmax.f32 %v3922_v55, 0.0  ;;  %v3866_v47 = vadd.f32 %v3865_v43, %v5197_v46 }
 0x34d   : > { %v5327_v11 = vpop.f32.mrb[36].mxu0  ;;  %v5332_v26 = vpop.f32.mrb[36].mxu1  ;;  %v3930_v50 = vadd.f32 %v3929_v39, %v5197_v46  ;;  %v1847_v21 = vmax.f32 %v5301_v22, 0.0  ;;  %v3932_v42 = vadd.f32 %v1161_v29, %v5159_v32  ;;  %v3869_v6 = vadd.f32 %v3868_v20, %v5197_v46 }
 0x34e   : > { %v5334_v14 = vpop.f32.mrb[37].mxu0  ;;  %v5338_v24 = vpop.f32.mrb[37].mxu1  ;;  %v3861_v63 = vadd.f32 %v3860_v12, %v5327_v11  ;;  %v3925_v17 = vadd.f32 %v3924_v16, %v5332_v26  ;;  %v1877_v16 = vpack.c.bf16 %v1853_v51, %v1845_v56 }
 0x34f   : > { %6134 = vst [vmem:[#allocation32_spill] sm:$0xff] %v5338_v24  ;;  %v5340_v59 = vpop.f32.mrb[38].mxu0  ;;  %v5344_v30 = vpop.f32.mrb[38].mxu1  ;;  %v3864_v34 = vadd.f32 %v3863_v38, %v5334_v14  ;;  %v3928_v15 = vadd.f32 %v3927_v5, %v5338_v24  ;;  %v1879_v38 = vpack.c.bf16 %v1855_v36, %v1847_v21  ;;  %v3933_v57 = vadd.f32 %v3932_v42, %v5197_v46 }
 0x350   : > { %v5347_v31 = vpop.f32.mrb[39].mxu0  ;;  %v5353_v44 = vpop.f32.mrb[39].mxu1  ;;  %v3867_v49 = vadd.f32 %v3866_v47, %v5340_v59  ;;  %v3931_v12 = vadd.f32 %v3930_v50, %v5344_v30  ;;  %v1860_v2 = vmax.f32 %v3861_v63, 0.0  ;;  %v1862_v5 = vmax.f32 %v3925_v17, 0.0  ;;  %2035 = vmatprep.subr.bf16.mxu0 %v1877_v16 }
 0x351   : > { %v3870_v39 = vadd.f32 %v3869_v6, %v5347_v31  ;;  %2088 = vmatprep.subr.bf16.mxu1 %v1879_v38  ;;  %v1861_v22 = vmax.f32 %v3864_v34, 0.0  ;;  %2036 = vmatpush1.bf16.msra.mxu0 %v1876_v4  ;;  %v3934_v20 = vadd.f32 %v3933_v57, %v5353_v44  ;;  %v1863_v50 = vmax.f32 %v3928_v15, 0.0  ;;  %v5381_v4 = vpop.permute.xlu0 %1895  ;;  %v5384_v36 = vpop.permute.xlu1 %1900 }
 0x352   : > { %v1868_v55 = vmax.f32 %v3867_v49, 0.0  ;;  %v1870_v43 = vmax.f32 %v3931_v12, 0.0  ;;  %2089 = vmatpush1.bf16.msra.mxu1 %v1878_v28 }
 0x353   : > { %v1869_v29 = vmax.f32 %v3870_v39, 0.0  ;;  %v1871_v51 = vmax.f32 %v3934_v20, 0.0 }
 0x354   : > { %v1884_v24 = vpack.c.bf16 %v1868_v55, %v1860_v2  ;;  %v1886_v47 = vpack.c.bf16 %v1870_v43, %v1862_v5 }
 0x355   : > { %v1885_v63 = vpack.c.bf16 %v1869_v29, %v1861_v22  ;;  %v1887_v17 = vpack.c.bf16 %v1871_v51, %v1863_v50 }
 0x357   : > { %2037 = vmatprep.subr.bf16.mxu0 %v1885_v63  ;;  %2090 = vmatprep.subr.bf16.mxu1 %v1887_v17 }
 0x358   : > { %2038 = vmatpush1.bf16.msra.mxu0 %v1884_v24  ;;  %2091 = vmatpush1.bf16.msra.mxu1 %v1886_v47  ;;  %v5393_v47 = vpop.permute.xlu0 %1905 }
 0x35b   : > { %3634 = vmatmul.mubr.msk.bf16.vlgmr.msra.gmra.mrb[72].mxu0 %vm1248_vm2, %v5216_v40  ;;  %3636 = vmatmul.mubr.msk.bf16.vlgmr.msra.gmra.mrb[72].mxu1 %vm1248_vm2, %v5216_v40 }
 0x35c   : > { %2077 = vmatprep.mubr.bf16.mxu0 %v6120_v3  ;;  %2130 = vmatprep.mubr.bf16.mxu1 %v6120_v3 }
 0x363   : > { %3635 = vmatmul.mubr.msk.bf16.gmra.mrb[76].mxu0 %vm1248_vm2, %v5227_v35  ;;  %3637 = vmatmul.mubr.msk.bf16.gmra.mrb[76].mxu1 %vm1248_vm2, %v5227_v35 }
 0x364   : > { %2267 = vmatprep.mubr.bf16.mxu0 %v6120_v3  ;;  %2320 = vmatprep.mubr.bf16.mxu1 %v6120_v3 }
 0x3ef   : > { %v1963_v24 = vpop.f32.mrb[64].mxu0 }
 0x3f0   : > { %v1964_v28 = vadd.f32 %v1963_v24, %v5381_v4  ;;  %v1965_v34 = vpop.f32.mrb[65].mxu0  ;;  %v2016_v56 = vpop.f32.mrb[64].mxu1 }
 0x3f1   : > { %v1966_v40 = vadd.f32 %v1965_v34, %v5381_v4  ;;  %v1967_v15 = vpop.f32.mrb[66].mxu0  ;;  %v2017_v42 = vadd.f32 %v2016_v56, %v5381_v4  ;;  %v2018_v35 = vpop.f32.mrb[65].mxu1 }
 0x3f2   : > { %v1968_v21 = vadd.f32 %v1967_v15, %v5384_v36  ;;  %v1969_v49 = vpop.f32.mrb[67].mxu0  ;;  %v2146_v6 = vmax.f32 %v1964_v28, 0.0  ;;  %v2019_v2 = vadd.f32 %v2018_v35, %v5381_v4  ;;  %v2020_v16 = vpop.f32.mrb[66].mxu1 }
 0x3f3   : > { %v1970_v12 = vadd.f32 %v1969_v49, %v5384_v36  ;;  %v2147_v38 = vmax.f32 %v1966_v40, 0.0  ;;  %v2021_v5 = vadd.f32 %v2020_v16, %v5384_v36  ;;  %v2022_v39 = vpop.f32.mrb[67].mxu1  ;;  %v2148_v29 = vmax.f32 %v2017_v42, 0.0  ;;  %v5396_v34 = vpop.permute.xlu1 %1910 }
 0x3f4   : > { %v2154_v55 = vmax.f32 %v1968_v21, 0.0  ;;  %v2023_v22 = vadd.f32 %v2022_v39, %v5384_v36  ;;  %v2149_v51 = vmax.f32 %v2019_v2, 0.0 }
 0x3f5   : > { %v2155_v43 = vmax.f32 %v1970_v12, 0.0  ;;  %v2156_v20 = vmax.f32 %v2021_v5, 0.0 }
 0x3f6   : > { %v2178_v57 = vpack.c.bf16 %v2154_v55, %v2146_v6  ;;  %v2157_v17 = vmax.f32 %v2023_v22, 0.0 }
 0x3f7   : > { %v2179_v63 = vpack.c.bf16 %v2155_v43, %v2147_v38  ;;  %v1973_v50 = vpop.f32.mrb[68].mxu0  ;;  %v2180_v40 = vpack.c.bf16 %v2156_v20, %v2148_v29 }
 0x3f8   : > { %v1974_v24 = vadd.f32 %v1973_v50, %v5393_v47  ;;  %v1975_v28 = vpop.f32.mrb[69].mxu0  ;;  %v2181_v21 = vpack.c.bf16 %v2157_v17, %v2149_v51  ;;  %v2026_v49 = vpop.f32.mrb[68].mxu1 }
 0x3f9   : > { %v1976_v15 = vadd.f32 %v1975_v28, %v5393_v47  ;;  %v1977_v56 = vpop.f32.mrb[70].mxu0  ;;  %2235 = vmatprep.subr.bf16.mxu0 %v2179_v63  ;;  %v2027_v12 = vadd.f32 %v2026_v49, %v5393_v47  ;;  %v2028_v6 = vpop.f32.mrb[69].mxu1 }
 0x3fa   : > { %v1978_v35 = vadd.f32 %v1977_v56, %v5396_v34  ;;  %v1979_v42 = vpop.f32.mrb[71].mxu0  ;;  %2236 = vmatpush1.bf16.msra.mxu0 %v2178_v57  ;;  %v2162_v55 = vmax.f32 %v1974_v24, 0.0  ;;  %v2029_v16 = vadd.f32 %v2028_v6, %v5393_v47  ;;  %v2030_v5 = vpop.f32.mrb[70].mxu1  ;;  %2288 = vmatprep.subr.bf16.mxu1 %v2181_v21  ;;  %v5408_v56 = vld [vmem:[%s6019_s5 + $0x10] sm:$0xff]  }
 0x3fb   : > { %v1980_v2 = vadd.f32 %v1979_v42, %v5396_v34  ;;  %v2163_v43 = vmax.f32 %v1976_v15, 0.0  ;;  %v2031_v39 = vadd.f32 %v2030_v5, %v5396_v34  ;;  %v2032_v29 = vpop.f32.mrb[71].mxu1  ;;  %2289 = vmatpush1.bf16.msra.mxu1 %v2180_v40  ;;  %v2164_v63 = vmax.f32 %v2027_v12, 0.0  ;;  %v5419_v40 = vld [vmem:[%s6019_s5 + $0x18] sm:$0xff]  }
 0x3fc   : > { %v2170_v38 = vmax.f32 %v1978_v35, 0.0  ;;  %v2033_v57 = vadd.f32 %v2032_v29, %v5396_v34  ;;  %v2165_v17 = vmax.f32 %v2029_v16, 0.0 }
 0x3fd   : > { %v2171_v22 = vmax.f32 %v1980_v2, 0.0  ;;  %v2172_v50 = vmax.f32 %v2031_v39, 0.0 }
 0x3fe   : > { %v2186_v20 = vpack.c.bf16 %v2170_v38, %v2162_v55  ;;  %v2173_v28 = vmax.f32 %v2033_v57, 0.0 }
 0x3ff   : > { %v2187_v51 = vpack.c.bf16 %v2171_v22, %v2163_v43  ;;  %v2188_v24 = vpack.c.bf16 %v2172_v50, %v2164_v63 }
 0x400   : > { %v2189_v15 = vpack.c.bf16 %v2173_v28, %v2165_v17 }
 0x401   : > { %2237 = vmatprep.subr.bf16.mxu0 %v2187_v51 }
 0x402   : > { %2238 = vmatpush1.bf16.msra.mxu0 %v2186_v20  ;;  %2290 = vmatprep.subr.bf16.mxu1 %v2189_v15 }
 0x403   : > { %2291 = vmatpush1.bf16.msra.mxu1 %v2188_v24 }
 0x405   : > { %3648 = vmatmul.mubr.msk.bf16.vlgmr.msra.gmra.mrb[16].mxu0 %vm1248_vm2, %v5408_v56 }
 0x406   : > { %2277 = vmatprep.mubr.bf16.mxu0 %v6120_v3  ;;  %3650 = vmatmul.mubr.msk.bf16.vlgmr.msra.gmra.mrb[16].mxu1 %vm1248_vm2, %v5408_v56 }
 0x407   : > { %2330 = vmatprep.mubr.bf16.mxu1 %v6120_v3 }
 0x40d   : > { %3649 = vmatmul.mubr.msk.bf16.gmra.mrb[20].mxu0 %vm1248_vm2, %v5419_v40 }
 0x40e   : > { %2373 = vmatprep.mubr.bf16.mxu0 %v6120_v3  ;;  %3651 = vmatmul.mubr.msk.bf16.gmra.mrb[20].mxu1 %vm1248_vm2, %v5419_v40 }
 0x40f   : > { %2426 = vmatprep.mubr.bf16.mxu1 %v6120_v3 }
 0x42e   : > { %v2069_v21 = vpop.f32.mrb[72].mxu0  ;;  %v2122_v6 = vpop.f32.mrb[72].mxu1 }
 0x42f   : > { %v2070_v49 = vadd.f32 %v2069_v21, %v5381_v4  ;;  %v2071_v35 = vpop.f32.mrb[73].mxu0  ;;  %v2123_v16 = vadd.f32 %v2122_v6, %v5381_v4  ;;  %v2124_v38 = vpop.f32.mrb[73].mxu1 }
 0x430   : > { %v2072_v42 = vadd.f32 %v2071_v35, %v5381_v4  ;;  %v2073_v12 = vpop.f32.mrb[74].mxu0  ;;  %v2125_v39 = vadd.f32 %v2124_v38, %v5381_v4  ;;  %v2126_v29 = vpop.f32.mrb[74].mxu1 }
 0x431   : > { %v2074_v2 = vadd.f32 %v2073_v12, %v5384_v36  ;;  %v2075_v55 = vpop.f32.mrb[75].mxu0  ;;  %v2150_v43 = vmax.f32 %v2070_v49, 0.0  ;;  %v2127_v57 = vadd.f32 %v2126_v29, %v5384_v36  ;;  %v2128_v50 = vpop.f32.mrb[75].mxu1  ;;  %v2152_v28 = vmax.f32 %v2123_v16, 0.0 }
 0x432   : > { %v2076_v5 = vadd.f32 %v2075_v55, %v5384_v36  ;;  %v2151_v20 = vmax.f32 %v2072_v42, 0.0  ;;  %v2129_v17 = vadd.f32 %v2128_v50, %v5384_v36  ;;  %v2153_v35 = vmax.f32 %v2125_v39, 0.0 }
 0x433   : > { %v2158_v22 = vmax.f32 %v2074_v2, 0.0  ;;  %v2160_v24 = vmax.f32 %v2127_v57, 0.0 }
 0x434   : > { %v2159_v63 = vmax.f32 %v2076_v5, 0.0  ;;  %v2161_v12 = vmax.f32 %v2129_v17, 0.0 }
 0x435   : > { %v2182_v51 = vpack.c.bf16 %v2158_v22, %v2150_v43  ;;  %v2184_v4 = vpack.c.bf16 %v2160_v24, %v2152_v28 }
 0x436   : > { %v2183_v15 = vpack.c.bf16 %v2159_v63, %v2151_v20  ;;  %v2079_v21 = vpop.f32.mrb[76].mxu0  ;;  %v2185_v55 = vpack.c.bf16 %v2161_v12, %v2153_v35  ;;  %v2132_v38 = vpop.f32.mrb[76].mxu1 }
 0x437   : > { %v2080_v49 = vadd.f32 %v2079_v21, %v5393_v47  ;;  %v2081_v6 = vpop.f32.mrb[77].mxu0  ;;  %v2133_v36 = vadd.f32 %v2132_v38, %v5393_v47  ;;  %v2134_v16 = vpop.f32.mrb[77].mxu1  ;;  %v5470_v38 = vadd.f32 nan, %v5056_v18 }
 0x438   : > { %v2082_v2 = vadd.f32 %v2081_v6, %v5393_v47  ;;  %v2083_v42 = vpop.f32.mrb[78].mxu0  ;;  %2341 = vmatprep.subr.bf16.mxu0 %v2183_v15  ;;  %v2135_v29 = vadd.f32 %v2134_v16, %v5393_v47  ;;  %v2136_v57 = vpop.f32.mrb[78].mxu1  ;;  %2394 = vmatprep.subr.bf16.mxu1 %v2185_v55  ;;  %v1649_v55 = vadd.f32 %v5132_v53, %v5077_v45  ;;  %v6138_v53 = vld [vmem:[#allocation49_spill] sm:$0xff] }
 0x439   : > { %v2084_v5 = vadd.f32 %v2083_v42, %v5396_v34  ;;  %v2085_v43 = vpop.f32.mrb[79].mxu0  ;;  %2342 = vmatpush1.bf16.msra.mxu0 %v2182_v51  ;;  %v2166_v22 = vmax.f32 %v2080_v49, 0.0  ;;  %v2137_v50 = vadd.f32 %v2136_v57, %v5396_v34  ;;  %v2138_v28 = vpop.f32.mrb[79].mxu1  ;;  %2395 = vmatpush1.bf16.msra.mxu1 %v2184_v4  ;;  %v2168_v15 = vmax.f32 %v2133_v36, 0.0 }
 0x43a   : > { %v2086_v39 = vadd.f32 %v2085_v43, %v5396_v34  ;;  %v2167_v63 = vmax.f32 %v2082_v2, 0.0  ;;  %v2139_v51 = vadd.f32 %v2138_v28, %v5396_v34  ;;  %v2169_v12 = vmax.f32 %v2135_v29, 0.0  ;;  %v5461_v2 = vpop.permute.xlu0 %470  ;;  %v5487_v18 = vpop.permute.xlu1 %475 }
 0x43b   : > { %v2174_v20 = vmax.f32 %v2084_v5, 0.0  ;;  %v2176_v21 = vmax.f32 %v2137_v50, 0.0  ;;  %v1594_v34 = vadd.f32 %v5113_v33, %v5077_v45  ;;  %v1596_v4 = vadd.f32 %v5123_v1, %v5077_v45  ;;  %v6135_v33 = vld [vmem:[#allocation13_spill] sm:$0xff]  ;;  %v6136_v1 = vld [vmem:[#allocation48_spill] sm:$0xff] }
 0x43c   : > { %v2175_v17 = vmax.f32 %v2086_v39, 0.0  ;;  %v2177_v6 = vmax.f32 %v2139_v51, 0.0  ;;  %v1647_v42 = vadd.f32 %v5121_v61, %v5077_v45  ;;  %v1651_v43 = vadd.f32 %v6136_v1, %v5101_v13  ;;  %v6137_v61 = vld [vmem:[#allocation14_spill] sm:$0xff] }
 0x43d   : > { %v2190_v24 = vpack.c.bf16 %v2174_v20, %v2166_v22  ;;  %v2192_v49 = vpack.c.bf16 %v2176_v21, %v2168_v15  ;;  %v1771_v5 = vadd.f32 %v6135_v33, %v1594_v34  ;;  %v5479_v36 = vadd.f32 nan, %v5109_v10  ;;  %v6139_v22 = vld [vmem:[#allocation11_spill] sm:$0xff]  ;;  %v6140_v20 = vld [vmem:[#allocation50_spill] sm:$0xff]  ;;  %v6142_v10 = vld [vmem:[#allocation16_spill] sm:$0xff] }
 0x43e   : > { %v2191_v35 = vpack.c.bf16 %v2175_v17, %v2167_v63  ;;  %v2193_v47 = vpack.c.bf16 %v2177_v6, %v2169_v12  ;;  %v1772_v16 = vadd.f32 %v6137_v61, %v1596_v4  ;;  %v1653_v39 = vadd.f32 %v6138_v53, %v5101_v13  ;;  %v6143_v17 = vld [vmem:[#allocation15_spill] sm:$0xff]  ;;  %v6145_v15 = vld [vmem:[#allocation52_spill] sm:$0xff]  ;;  %v6147_v6 = vld [vmem:[#allocation53_spill] sm:$0xff]  ;;  %v5505_v34 = vpop.permute.xlu0 %2201 }
 0x43f   : > { %v1604_v57 = vadd.f32 %v6140_v20, %v5166_v41  ;;  %v1773_v50 = vadd.f32 %v6142_v10, %v1647_v42  ;;  %v1774_v28 = vadd.f32 %v6143_v17, %v1649_v55  ;;  %v1803_v21 = vadd.f32 %v1771_v5, %v5470_v38  ;;  %v6149_v5 = vld [vmem:[#allocation20_spill] sm:$0xff]  ;;  %v5522_v20 = vpop.permute.xlu1 %2206  ;;  %v6154_v17 = vld [vmem:[#allocation19_spill] sm:$0xff] }
 0x440   : > { %2343 = vmatprep.subr.bf16.mxu0 %v2191_v35  ;;  %2396 = vmatprep.subr.bf16.mxu1 %v2193_v47  ;;  %v6146_v35 = vld [vmem:[#allocation12_spill] sm:$0xff]  ;;  %v1608_v47 = vadd.f32 %v5182_v48, %v5197_v46  ;;  %v1804_v4 = vadd.f32 %v1772_v16, %v5470_v38  ;;  %v1661_v55 = vadd.f32 %v5186_v19, %v5197_v46 }
 0x441   : > { %2344 = vmatpush1.bf16.msra.mxu0 %v2190_v24  ;;  %2397 = vmatpush1.bf16.msra.mxu1 %v2192_v49  ;;  %v6144_v24 = vld [vmem:[#allocation9_spill] sm:$0xff]  ;;  %v1781_v12 = vadd.f32 %v6146_v35, %v1651_v43  ;;  %v1659_v49 = vadd.f32 %v6147_v6, %v5166_v41  ;;  %v1787_v1 = vadd.f32 %v6149_v5, %v1604_v57  ;;  %v6150_v43 = vld [vmem:[#allocation22_spill] sm:$0xff]  ;;  %v6156_v35 = vld [vmem:[#allocation24_spill] sm:$0xff] }
 0x442   : > { %v1663_v48 = vadd.f32 %v5195_v62, %v5197_v46  ;;  %v1805_v53 = vadd.f32 %v1773_v50, %v5470_v38  ;;  %v1806_v16 = vadd.f32 %v1774_v28, %v5470_v38  ;;  %v6153_v57 = vld [vmem:[#allocation18_spill] sm:$0xff]  ;;  %v1797_v50 = vadd.f32 %v6154_v17, %v1661_v55 }
 0x443   : > { %v1795_v10 = vadd.f32 %v6153_v57, %v1608_v47 }
 0x444   : > { %3652 = vmatmul.mubr.msk.bf16.vlgmr.msra.gmra.mrb[40].mxu0 %vm1248_vm2, %v5408_v56  ;;  %3654 = vmatmul.mubr.msk.bf16.vlgmr.msra.gmra.mrb[40].mxu1 %vm1248_vm2, %v5408_v56  ;;  %v1598_v56 = vadd.f32 %v5134_v8, %v5101_v13  ;;  %v5476_v8 = vadd.f32 nan, %v5072_v60  ;;  %v6141_v60 = vld [vmem:[#allocation51_spill] sm:$0xff]  ;;  %v3807_v47 = vadd.f32 %v1805_v53, %v5461_v2  ;;  %v5550_v53 = vpop.permute.xlu1 %485 }
 0x445   : > { %2383 = vmatprep.mubr.bf16.mxu0 %v6120_v3  ;;  %2436 = vmatprep.mubr.bf16.mxu1 %v6120_v3  ;;  %v1657_v63 = vadd.f32 %v6141_v60, %v5166_v41 }
 0x446   : > { %v1779_v29 = vadd.f32 %v6139_v22, %v1598_v56  ;;  %v6148_v56 = vld [vmem:[#allocation10_spill] sm:$0xff]  ;;  %v6151_v22 = vld [vmem:[#allocation17_spill] sm:$0xff] }
 0x447   : > { %v1782_v42 = vadd.f32 %v6148_v56, %v1653_v39  ;;  %v1789_v61 = vadd.f32 %v6150_v43, %v1657_v63  ;;  %v3743_v63 = vadd.f32 %v1803_v21, %v5461_v2  ;;  %v3810_v56 = vadd.f32 %v1806_v16, %v5461_v2 }
 0x448   : > { %v1811_v33 = vadd.f32 %v1779_v29, %v5476_v8  ;;  %v6152_v29 = vld [vmem:[#allocation21_spill] sm:$0xff] }
 0x449   : > { %v1790_v60 = vadd.f32 %v6152_v29, %v1659_v49  ;;  %v1814_v62 = vadd.f32 %v1782_v42, %v5476_v8  ;;  %v5536_v49 = vpop.permute.xlu0 %480  ;;  %v3808_v29 = vadd.f32 %v3807_v47, %v5505_v34  ;;  %v3811_v57 = vadd.f32 %v3810_v56, %v5505_v34 }
 0x44a   : > { %v3749_v6 = vadd.f32 %v1811_v33, %v5487_v18 }
 0x44c   : > { %3653 = vmatmul.mubr.msk.bf16.gmra.mrb[44].mxu0 %vm1248_vm2, %v5419_v40  ;;  %3655 = vmatmul.mubr.msk.bf16.gmra.mrb[44].mxu1 %vm1248_vm2, %v5419_v40  ;;  %v1600_v40 = vadd.f32 %v5143_v7, %v5101_v13  ;;  %v5485_v7 = vadd.f32 nan, %v5159_v32  ;;  %v1606_v32 = vadd.f32 %v6145_v15, %v5166_v41  ;;  %v1819_v15 = vadd.f32 %v1787_v1, %v5479_v36 }
 0x44d   : > { %2637 = vmatprep.mubr.bf16.mxu0 %v6120_v3  ;;  %2690 = vmatprep.mubr.bf16.mxu1 %v6120_v3 }
 0x44e   : > { %v1780_v51 = vadd.f32 %v6144_v24, %v1600_v40  ;;  %v1610_v40 = vadd.f32 %v5189_v0, %v5197_v46  ;;  %v1788_v19 = vadd.f32 %v6151_v22, %v1606_v32  ;;  %v1813_v0 = vadd.f32 %v1781_v12, %v5476_v8  ;;  %v6155_v24 = vld [vmem:[#allocation23_spill] sm:$0xff] }
 0x44f   : > { %v1821_v32 = vadd.f32 %v1789_v61, %v5479_v36  ;;  %v1798_v12 = vadd.f32 %v6156_v35, %v1663_v48  ;;  %v1827_v55 = vadd.f32 %v1795_v10, %v5485_v7  ;;  %v1829_v33 = vadd.f32 %v1797_v50, %v5485_v7 }
 0x450   : > { %v1812_v39 = vadd.f32 %v1780_v51, %v5476_v8  ;;  %v1796_v28 = vadd.f32 %v6155_v24, %v1610_v40  ;;  %v3746_v51 = vadd.f32 %v1804_v4, %v5461_v2  ;;  %v1820_v21 = vadd.f32 %v1788_v19, %v5479_v36 }
 0x451   : > { %v1822_v4 = vadd.f32 %v1790_v60, %v5479_v36  ;;  %v3744_v40 = vadd.f32 %v3743_v63, %v5505_v34  ;;  %v3813_v5 = vadd.f32 %v1813_v0, %v5487_v18  ;;  %v3816_v48 = vadd.f32 %v1814_v62, %v5487_v18 }
 0x452   : > { %v3752_v42 = vadd.f32 %v1812_v39, %v5487_v18  ;;  %v1828_v1 = vadd.f32 %v1796_v28, %v5485_v7  ;;  %v3747_v61 = vadd.f32 %v3746_v51, %v5505_v34  ;;  %v1830_v16 = vadd.f32 %v1798_v12, %v5485_v7 }
 0x453   : > { %v3750_v19 = vadd.f32 %v3749_v6, %v5522_v20  ;;  %v3755_v0 = vadd.f32 %v1819_v15, %v5536_v49  ;;  %v3814_v50 = vadd.f32 %v3813_v5, %v5522_v20  ;;  %v3819_v28 = vadd.f32 %v1821_v32, %v5536_v49  ;;  %v5567_v15 = vpop.permute.xlu0 %2211 }
 0x454   : > { %v3753_v63 = vadd.f32 %v3752_v42, %v5522_v20  ;;  %v3758_v51 = vadd.f32 %v1820_v21, %v5536_v49  ;;  %v3817_v47 = vadd.f32 %v3816_v48, %v5522_v20  ;;  %v3761_v56 = vadd.f32 %v1827_v55, %v5550_v53 }
 0x455   : > { %v3756_v32 = vadd.f32 %v3755_v0, %v5567_v15  ;;  %v3822_v21 = vadd.f32 %v1822_v4, %v5536_v49  ;;  %v3764_v48 = vadd.f32 %v1828_v1, %v5550_v53  ;;  %v3825_v0 = vadd.f32 %v1829_v33, %v5550_v53 }
 0x456   : > { %v3820_v33 = vadd.f32 %v3819_v28, %v5567_v15 }
 0x4d8   : > { %v2269_v43 = vpop.f32.mrb[16].mxu0 }
 0x4d9   : > { %v5553_v39 = vadd.f32 %v3744_v40, %v2269_v43  ;;  %v2271_v22 = vpop.f32.mrb[17].mxu0  ;;  %v2322_v62 = vpop.f32.mrb[16].mxu1 }
 0x4da   : > { %v5558_v60 = vadd.f32 %v3747_v61, %v2271_v22  ;;  %v2273_v10 = vpop.f32.mrb[18].mxu0  ;;  %v5569_v35 = vadd.f32 %v3808_v29, %v2322_v62  ;;  %v2324_v12 = vpop.f32.mrb[17].mxu1 }
 0x4db   : > { %v5562_v17 = vadd.f32 %v3750_v19, %v2273_v10  ;;  %v2275_v24 = vpop.f32.mrb[19].mxu0  ;;  %v5575_v42 = vadd.f32 %v3811_v57, %v2324_v12  ;;  %v2326_v5 = vpop.f32.mrb[18].mxu1  ;;  %v2516_v55 = vmax.f32 %v5553_v39, 0.0  ;;  %v3759_v10 = vadd.f32 %v3758_v51, %v5567_v15 }
 0x4dc   : > { %v5571_v6 = vadd.f32 %v3753_v63, %v2275_v24  ;;  %v2517_v43 = vmax.f32 %v5558_v60, 0.0  ;;  %v5581_v61 = vadd.f32 %v3814_v50, %v2326_v5  ;;  %v2328_v19 = vpop.f32.mrb[19].mxu1  ;;  %v5585_v29 = vpop.permute.xlu1 %2216  ;;  %v3828_v24 = vadd.f32 %v1830_v16, %v5550_v53 }
 0x4dd   : > { %v2524_v40 = vmax.f32 %v5562_v17, 0.0  ;;  %v5588_v57 = vadd.f32 %v3817_v47, %v2328_v19  ;;  %v3762_v62 = vadd.f32 %v3761_v56, %v5585_v29  ;;  %v2519_v1 = vmax.f32 %v5575_v42, 0.0 }
 0x4de   : > { %6157 = vst [vmem:[#allocation33_spill] sm:$0xff] %v5571_v6  ;;  %6158 = vst [vmem:[#allocation35_spill] sm:$0xff] %v5581_v61  ;;  %v2525_v22 = vmax.f32 %v5571_v6, 0.0  ;;  %v2526_v4 = vmax.f32 %v5581_v61, 0.0  ;;  %v2518_v51 = vmax.f32 %v5569_v35, 0.0  ;;  %v3765_v56 = vadd.f32 %v3764_v48, %v5585_v29 }
 0x4df   : > { %6159 = vst [vmem:[#allocation36_spill] sm:$0xff] %v5588_v57  ;;  %v2548_v12 = vpack.c.bf16 %v2524_v40, %v2516_v55  ;;  %v2527_v5 = vmax.f32 %v5588_v57, 0.0  ;;  %v3823_v16 = vadd.f32 %v3822_v21, %v5567_v15  ;;  %v3826_v28 = vadd.f32 %v3825_v0, %v5585_v29 }
 0x4e0   : > { %v2279_v63 = vpop.f32.mrb[20].mxu0  ;;  %v2549_v50 = vpack.c.bf16 %v2525_v22, %v2517_v43  ;;  %v3829_v21 = vadd.f32 %v3828_v24, %v5585_v29 }
 0x4e1   : > { %v5597_v6 = vadd.f32 %v3756_v32, %v2279_v63  ;;  %v2281_v47 = vpop.f32.mrb[21].mxu0  ;;  %v2332_v43 = vpop.f32.mrb[20].mxu1  ;;  %v2551_v40 = vpack.c.bf16 %v2527_v5, %v2519_v1  ;;  %v2550_v32 = vpack.c.bf16 %v2526_v4, %v2518_v51 }
 0x4e2   : > { %v5601_v19 = vadd.f32 %v3759_v10, %v2281_v47  ;;  %v2283_v61 = vpop.f32.mrb[22].mxu0  ;;  %2605 = vmatprep.subr.bf16.mxu0 %v2549_v50  ;;  %v5607_v63 = vadd.f32 %v3820_v33, %v2332_v43  ;;  %v2334_v57 = vpop.f32.mrb[21].mxu1  ;;  %v5630_v43 = vld [vmem:[%s6017_s3 + $0x20] sm:$0xff]  }
 0x4e3   : > { %v5605_v22 = vadd.f32 %v3762_v62, %v2283_v61  ;;  %v2285_v55 = vpop.f32.mrb[23].mxu0  ;;  %2606 = vmatpush1.bf16.msra.mxu0 %v2548_v12  ;;  %v5612_v47 = vadd.f32 %v3823_v16, %v2334_v57  ;;  %v2336_v50 = vpop.f32.mrb[22].mxu1  ;;  %2658 = vmatprep.subr.bf16.mxu1 %v2551_v40  ;;  %v2532_v0 = vmax.f32 %v5597_v6, 0.0 }
 0x4e4   : > { %v5610_v10 = vadd.f32 %v3765_v56, %v2285_v55  ;;  %v2533_v61 = vmax.f32 %v5601_v19, 0.0  ;;  %v5617_v62 = vadd.f32 %v3826_v28, %v2336_v50  ;;  %v2338_v1 = vpop.f32.mrb[23].mxu1  ;;  %2659 = vmatpush1.bf16.msra.mxu1 %v2550_v32  ;;  %v2534_v56 = vmax.f32 %v5607_v63, 0.0  ;;  %v5641_v55 = vld [vmem:[%s6017_s3 + $0x28] sm:$0xff]  }
 0x4e5   : > { %v2540_v48 = vmax.f32 %v5605_v22, 0.0  ;;  %v5621_v12 = vadd.f32 %v3829_v21, %v2338_v1  ;;  %v2535_v51 = vmax.f32 %v5612_v47, 0.0  ;;  %v1700_v32 = vadd.f32 %v5275_v58, %v5077_v45 }
 0x4e6   : > { %v2541_v4 = vmax.f32 %v5610_v10, 0.0  ;;  %v2542_v57 = vmax.f32 %v5617_v62, 0.0  ;;  %v1702_v28 = vadd.f32 %v5285_v52, %v5077_v45  ;;  %v1753_v50 = vadd.f32 %v5283_v54, %v5077_v45 }
 0x4e7   : > { %v2556_v33 = vpack.c.bf16 %v2540_v48, %v2532_v0  ;;  %v2543_v24 = vmax.f32 %v5621_v12, 0.0  ;;  %v1704_v48 = vadd.f32 %v5296_v27, %v5101_v13  ;;  %v1755_v21 = vadd.f32 %v5294_v9, %v5077_v45  ;;  %v6161_v0 = vld [vmem:[#allocation30_spill] sm:$0xff]  ;;  %v6162_v27 = vld [vmem:[#allocation27_spill] sm:$0xff] }
 0x4e8   : > { %v2557_v5 = vpack.c.bf16 %v2541_v4, %v2533_v61  ;;  %v2558_v40 = vpack.c.bf16 %v2542_v57, %v2534_v56  ;;  %v1706_v61 = vadd.f32 %v5305_v37, %v5101_v13  ;;  %v6160_v4 = vld [vmem:[#allocation29_spill] sm:$0xff]  ;;  %v1757_v58 = vadd.f32 %v5303_v23, %v5101_v13  ;;  %v6163_v9 = vld [vmem:[#allocation34_spill] sm:$0xff] }
 0x4e9   : > { %v2559_v16 = vpack.c.bf16 %v2543_v24, %v2535_v51  ;;  %v1775_v1 = vadd.f32 %v6160_v4, %v1700_v32  ;;  %v1776_v57 = vadd.f32 %v6161_v0, %v1702_v28  ;;  %v1759_v52 = vadd.f32 %v5310_v25, %v5101_v13  ;;  %v6164_v51 = vld [vmem:[#allocation31_spill] sm:$0xff]  ;;  %v6165_v24 = vld [vmem:[#allocation25_spill] sm:$0xff]  ;;  %v6166_v13 = vld [vmem:[#allocation28_spill] sm:$0xff] }
 0x4ea   : > { %2607 = vmatprep.subr.bf16.mxu0 %v2557_v5  ;;  %v1783_v5 = vadd.f32 %v6162_v27, %v1704_v48  ;;  %v1710_v54 = vadd.f32 %v5327_v11, %v5166_v41  ;;  %v1763_v45 = vadd.f32 %v5332_v26, %v5166_v41  ;;  %v1777_v37 = vadd.f32 %v6163_v9, %v1753_v50  ;;  %v6168_v28 = vld [vmem:[#allocation26_spill] sm:$0xff] }
 0x4eb   : > { %2608 = vmatpush1.bf16.msra.mxu0 %v2556_v33  ;;  %2660 = vmatprep.subr.bf16.mxu1 %v2559_v16  ;;  %v1778_v33 = vadd.f32 %v6164_v51, %v1755_v21  ;;  %v1784_v56 = vadd.f32 %v6165_v24, %v1706_v61  ;;  %v1712_v23 = vadd.f32 %v5334_v14, %v5166_v41  ;;  %v6169_v61 = vld [vmem:[#allocation43_spill] sm:$0xff]  ;;  %v6174_v24 = vld [vmem:[#allocation42_spill] sm:$0xff] }
 0x4ec   : > { %2661 = vmatpush1.bf16.msra.mxu1 %v2558_v40  ;;  %v1807_v16 = vadd.f32 %v1775_v1, %v5470_v38  ;;  %v1785_v25 = vadd.f32 %v6166_v13, %v1757_v58  ;;  %v6167_v40 = vld [vmem:[#allocation32_spill] sm:$0xff]  ;;  %v1714_v11 = vadd.f32 %v5340_v59, %v5197_v46  ;;  %v1808_v26 = vadd.f32 %v1776_v57, %v5470_v38  ;;  %v6170_v1 = vld [vmem:[#allocation45_spill] sm:$0xff] }
 0x4ed   : > { %v1765_v32 = vadd.f32 %v6167_v40, %v5166_v41  ;;  %v1786_v48 = vadd.f32 %v6168_v28, %v1759_v52  ;;  %v1767_v50 = vadd.f32 %v5344_v30, %v5197_v46  ;;  %v1716_v14 = vadd.f32 %v5347_v31, %v5197_v46  ;;  %v6171_v52 = vld [vmem:[#allocation40_spill] sm:$0xff] }
 0x4ee   : > { %3666 = vmatmul.mubr.msk.bf16.vlgmr.msra.gmra.mrb[80].mxu0 %vm1248_vm2, %v5630_v43  ;;  %v1815_v21 = vadd.f32 %v1783_v5, %v5476_v8  ;;  %v1791_v4 = vadd.f32 %v6169_v61, %v1710_v54  ;;  %v1793_v58 = vadd.f32 %v6170_v1, %v1763_v45  ;;  %v1769_v41 = vadd.f32 %v5353_v44, %v5197_v46  ;;  %v6172_v31 = vld [vmem:[#allocation44_spill] sm:$0xff]  ;;  %v6173_v5 = vld [vmem:[#allocation41_spill] sm:$0xff]  ;;  %v6175_v44 = vld [vmem:[#allocation46_spill] sm:$0xff] }
 0x4ef   : > { %2647 = vmatprep.mubr.bf16.mxu0 %v6120_v3  ;;  %3668 = vmatmul.mubr.msk.bf16.vlgmr.msra.gmra.mrb[80].mxu1 %vm1248_vm2, %v5630_v43  ;;  %v1809_v59 = vadd.f32 %v1777_v37, %v5470_v38  ;;  %v1810_v0 = vadd.f32 %v1778_v33, %v5470_v38  ;;  %v1816_v57 = vadd.f32 %v1784_v56, %v5476_v8 }
 0x4f0   : > { %2700 = vmatprep.mubr.bf16.mxu1 %v6120_v3  ;;  %v1792_v30 = vadd.f32 %v6171_v52, %v1712_v23  ;;  %v1817_v27 = vadd.f32 %v1785_v25, %v5476_v8  ;;  %v1794_v9 = vadd.f32 %v6172_v31, %v1765_v32  ;;  %v1799_v51 = vadd.f32 %v6173_v5, %v1714_v11  ;;  %v6176_v23 = vld [vmem:[#allocation47_spill] sm:$0xff] }
 0x4f1   : > { %v3871_v54 = vadd.f32 %v1807_v16, %v5461_v2  ;;  %v1818_v45 = vadd.f32 %v1786_v48, %v5476_v8  ;;  %v1801_v46 = vadd.f32 %v6174_v24, %v1767_v50  ;;  %v1800_v37 = vadd.f32 %v6175_v44, %v1716_v14 }
 0x4f2   : > { %v3874_v38 = vadd.f32 %v1808_v26, %v5461_v2  ;;  %v1823_v33 = vadd.f32 %v1791_v4, %v5479_v36  ;;  %v1825_v56 = vadd.f32 %v1793_v58, %v5479_v36  ;;  %v1802_v13 = vadd.f32 %v6176_v23, %v1769_v41 }
 0x4f3   : > { %v3877_v25 = vadd.f32 %v1815_v21, %v5487_v18  ;;  %v1824_v40 = vadd.f32 %v1792_v30, %v5479_v36  ;;  %v3935_v16 = vadd.f32 %v1809_v59, %v5461_v2  ;;  %v3938_v8 = vadd.f32 %v1810_v0, %v5461_v2 }
 0x4f4   : > { %v3880_v32 = vadd.f32 %v1816_v57, %v5487_v18  ;;  %v1826_v11 = vadd.f32 %v1794_v9, %v5479_v36  ;;  %v1831_v26 = vadd.f32 %v1799_v51, %v5485_v7  ;;  %v3872_v28 = vadd.f32 %v3871_v54, %v5505_v34 }
 0x4f5   : > { %v3941_v48 = vadd.f32 %v1817_v27, %v5487_v18  ;;  %v1833_v50 = vadd.f32 %v1801_v46, %v5485_v7  ;;  %v1832_v14 = vadd.f32 %v1800_v37, %v5485_v7  ;;  %v3875_v61 = vadd.f32 %v3874_v38, %v5505_v34 }
 0x4f6   : > { %3667 = vmatmul.mubr.msk.bf16.gmra.mrb[84].mxu0 %vm1248_vm2, %v5641_v55  ;;  %v3944_v4 = vadd.f32 %v1818_v45, %v5487_v18  ;;  %v1834_v2 = vadd.f32 %v1802_v13, %v5485_v7  ;;  %v3878_v58 = vadd.f32 %v3877_v25, %v5522_v20  ;;  %v3883_v41 = vadd.f32 %v1823_v33, %v5536_v49 }
 0x4f7   : > { %2743 = vmatprep.mubr.bf16.mxu0 %v6120_v3  ;;  %3669 = vmatmul.mubr.msk.bf16.gmra.mrb[84].mxu1 %vm1248_vm2, %v5641_v55  ;;  %v3936_v59 = vadd.f32 %v3935_v16, %v5505_v34  ;;  %v3939_v57 = vadd.f32 %v3938_v8, %v5505_v34  ;;  %v3881_v30 = vadd.f32 %v3880_v32, %v5522_v20 }
 0x4f8   : > { %2796 = vmatprep.mubr.bf16.mxu1 %v6120_v3  ;;  %v3942_v7 = vadd.f32 %v3941_v48, %v5522_v20  ;;  %v3947_v9 = vadd.f32 %v1825_v56, %v5536_v49  ;;  %v3886_v5 = vadd.f32 %v1824_v40, %v5536_v49  ;;  %v3945_v34 = vadd.f32 %v3944_v4, %v5522_v20 }
 0x4f9   : > { %v3889_v24 = vadd.f32 %v1831_v26, %v5550_v53  ;;  %v3884_v38 = vadd.f32 %v3883_v41, %v5567_v15  ;;  %v3950_v33 = vadd.f32 %v1826_v11, %v5536_v49  ;;  %v3892_v20 = vadd.f32 %v1832_v14, %v5550_v53 }
 0x4fa   : > { %v3887_v8 = vadd.f32 %v3886_v5, %v5567_v15  ;;  %v3953_v32 = vadd.f32 %v1833_v50, %v5550_v53  ;;  %v3956_v48 = vadd.f32 %v1834_v2, %v5550_v53  ;;  %v3948_v50 = vadd.f32 %v3947_v9, %v5567_v15 }
 0x4fb   : > { %v3890_v11 = vadd.f32 %v3889_v24, %v5585_v29  ;;  %v3951_v53 = vadd.f32 %v3950_v33, %v5567_v15 }
 0x4fc   : > { %v3954_v9 = vadd.f32 %v3953_v32, %v5585_v29  ;;  %v3957_v15 = vadd.f32 %v3956_v48, %v5585_v29 }
 0x517   : > { %v2375_v21 = vpop.f32.mrb[40].mxu0  ;;  %v2428_v27 = vpop.f32.mrb[40].mxu1 }
 0x518   : > { %v5723_v1 = vadd.f32 %v3872_v28, %v2375_v21  ;;  %v2377_v36 = vpop.f32.mrb[41].mxu0  ;;  %v5737_v51 = vadd.f32 %v3936_v59, %v2428_v27  ;;  %v2430_v54 = vpop.f32.mrb[41].mxu1 }
 0x519   : > { %v5728_v0 = vadd.f32 %v3875_v61, %v2377_v36  ;;  %v2379_v52 = vpop.f32.mrb[42].mxu0  ;;  %v5743_v46 = vadd.f32 %v3939_v57, %v2430_v54  ;;  %v2432_v37 = vpop.f32.mrb[42].mxu1  ;;  %v3893_v57 = vadd.f32 %v3892_v20, %v5585_v29 }
 0x51a   : > { %v5732_v18 = vadd.f32 %v3878_v58, %v2379_v52  ;;  %v2381_v31 = vpop.f32.mrb[43].mxu0  ;;  %v5749_v23 = vadd.f32 %v3942_v7, %v2432_v37  ;;  %v2434_v25 = vpop.f32.mrb[43].mxu1  ;;  %v2520_v40 = vmax.f32 %v5723_v1, 0.0  ;;  %v2522_v58 = vmax.f32 %v5737_v51, 0.0 }
 0x51b   : > { %v5739_v45 = vadd.f32 %v3881_v30, %v2381_v31  ;;  %v2521_v56 = vmax.f32 %v5728_v0, 0.0  ;;  %v5754_v16 = vadd.f32 %v3945_v34, %v2434_v25  ;;  %v2523_v21 = vmax.f32 %v5743_v46, 0.0 }
 0x51c   : > { %v2528_v44 = vmax.f32 %v5732_v18, 0.0  ;;  %v2530_v26 = vmax.f32 %v5749_v23, 0.0 }
 0x51d   : > { %v2529_v13 = vmax.f32 %v5739_v45, 0.0  ;;  %v2531_v14 = vmax.f32 %v5754_v16, 0.0 }
 0x51e   : > { %v2552_v61 = vpack.c.bf16 %v2528_v44, %v2520_v40  ;;  %v2554_v7 = vpack.c.bf16 %v2530_v26, %v2522_v58 }
 0x51f   : > { %v2385_v49 = vpop.f32.mrb[44].mxu0  ;;  %v2553_v28 = vpack.c.bf16 %v2529_v13, %v2521_v56  ;;  %v2438_v52 = vpop.f32.mrb[44].mxu1  ;;  %v2555_v30 = vpack.c.bf16 %v2531_v14, %v2523_v21 }
 0x520   : > { %v5763_v4 = vadd.f32 %v3884_v38, %v2385_v49  ;;  %v2387_v36 = vpop.f32.mrb[45].mxu0  ;;  %v5773_v31 = vadd.f32 %v3948_v50, %v2438_v52  ;;  %v2440_v5 = vpop.f32.mrb[45].mxu1 }
 0x521   : > { %v5767_v41 = vadd.f32 %v3887_v8, %v2387_v36  ;;  %v2389_v59 = vpop.f32.mrb[46].mxu0  ;;  %2711 = vmatprep.subr.bf16.mxu0 %v2553_v28  ;;  %v5778_v34 = vadd.f32 %v3951_v53, %v2440_v5  ;;  %v2442_v44 = vpop.f32.mrb[46].mxu1  ;;  %2764 = vmatprep.subr.bf16.mxu1 %v2555_v30 }
 0x522   : > { %v5771_v2 = vadd.f32 %v3890_v11, %v2389_v59  ;;  %v2391_v27 = vpop.f32.mrb[47].mxu0  ;;  %2712 = vmatpush1.bf16.msra.mxu0 %v2552_v61  ;;  %v5783_v38 = vadd.f32 %v3954_v9, %v2442_v44  ;;  %v2444_v56 = vpop.f32.mrb[47].mxu1  ;;  %2765 = vmatpush1.bf16.msra.mxu1 %v2554_v7  ;;  %v2536_v13 = vmax.f32 %v5763_v4, 0.0  ;;  %v2538_v26 = vmax.f32 %v5773_v31, 0.0 }
 0x523   : > { %v5776_v54 = vadd.f32 %v3893_v57, %v2391_v27  ;;  %v2537_v37 = vmax.f32 %v5767_v41, 0.0  ;;  %v5787_v25 = vadd.f32 %v3957_v15, %v2444_v56  ;;  %v2539_v8 = vmax.f32 %v5778_v34, 0.0  ;;  %v5805_v28 = vpop.permute.xlu0 %2571  ;;  %v5808_v14 = vpop.permute.xlu1 %2576 }
 0x524   : > { %v2544_v24 = vmax.f32 %v5771_v2, 0.0  ;;  %v2546_v20 = vmax.f32 %v5783_v38, 0.0 }
 0x525   : > { %v2545_v33 = vmax.f32 %v5776_v54, 0.0  ;;  %v2547_v29 = vmax.f32 %v5787_v25, 0.0 }
 0x526   : > { %v2560_v32 = vpack.c.bf16 %v2544_v24, %v2536_v13  ;;  %v2562_v11 = vpack.c.bf16 %v2546_v20, %v2538_v26 }
 0x527   : > { %v2561_v40 = vpack.c.bf16 %v2545_v33, %v2537_v37  ;;  %v2563_v49 = vpack.c.bf16 %v2547_v29, %v2539_v8  ;;  %v5817_v33 = vpop.permute.xlu0 %2581 }
 0x529   : > { %2713 = vmatprep.subr.bf16.mxu0 %v2561_v40  ;;  %2766 = vmatprep.subr.bf16.mxu1 %v2563_v49  ;;  %v5820_v49 = vpop.permute.xlu1 %2586 }
 0x52a   : > { %2714 = vmatpush1.bf16.msra.mxu0 %v2560_v32  ;;  %2767 = vmatpush1.bf16.msra.mxu1 %v2562_v11 }
 0x52d   : > { %3670 = vmatmul.mubr.msk.bf16.vlgmr.msra.gmra.mrb[88].mxu0 %vm1248_vm2, %v5630_v43  ;;  %3672 = vmatmul.mubr.msk.bf16.vlgmr.msra.gmra.mrb[88].mxu1 %vm1248_vm2, %v5630_v43 }
 0x52e   : > { %2753 = vmatprep.mubr.bf16.mxu0 %v6120_v3  ;;  %2806 = vmatprep.mubr.bf16.mxu1 %v6120_v3 }
 0x535   : > { %3671 = vmatmul.mubr.msk.bf16.gmra.mrb[92].mxu0 %vm1248_vm2, %v5641_v55  ;;  %3673 = vmatmul.mubr.msk.bf16.gmra.mrb[92].mxu1 %vm1248_vm2, %v5641_v55 }
 0x536   : > { %2943 = vmatprep.mubr.bf16.mxu0 %v6120_v3  ;;  %2996 = vmatprep.mubr.bf16.mxu1 %v6120_v3 }
 0x5c1   : > { %v2639_v48 = vpop.f32.mrb[80].mxu0 }
 0x5c2   : > { %v2640_v21 = vadd.f32 %v2639_v48, %v5805_v28  ;;  %v2641_v61 = vpop.f32.mrb[81].mxu0  ;;  %v2692_v58 = vpop.f32.mrb[80].mxu1 }
 0x5c3   : > { %v2642_v43 = vadd.f32 %v2641_v61, %v5805_v28  ;;  %v2643_v36 = vpop.f32.mrb[82].mxu0  ;;  %v2693_v57 = vadd.f32 %v2692_v58, %v5805_v28  ;;  %v2694_v55 = vpop.f32.mrb[81].mxu1 }
 0x5c4   : > { %v2644_v50 = vadd.f32 %v2643_v36, %v5808_v14  ;;  %v2645_v59 = vpop.f32.mrb[83].mxu0  ;;  %v2822_v53 = vmax.f32 %v2640_v21, 0.0  ;;  %v2695_v30 = vadd.f32 %v2694_v55, %v5805_v28  ;;  %v2696_v7 = vpop.f32.mrb[82].mxu1 }
 0x5c5   : > { %v2646_v52 = vadd.f32 %v2645_v59, %v5808_v14  ;;  %v2823_v5 = vmax.f32 %v2642_v43, 0.0  ;;  %v2697_v9 = vadd.f32 %v2696_v7, %v5808_v14  ;;  %v2698_v44 = vpop.f32.mrb[83].mxu1  ;;  %v2824_v56 = vmax.f32 %v2693_v57, 0.0 }
 0x5c6   : > { %v2830_v27 = vmax.f32 %v2644_v50, 0.0  ;;  %v2699_v37 = vadd.f32 %v2698_v44, %v5808_v14  ;;  %v2825_v8 = vmax.f32 %v2695_v30, 0.0 }
 0x5c7   : > { %v2831_v24 = vmax.f32 %v2646_v52, 0.0  ;;  %v2832_v13 = vmax.f32 %v2697_v9, 0.0 }
 0x5c8   : > { %v2854_v15 = vpack.c.bf16 %v2830_v27, %v2822_v53  ;;  %v2833_v32 = vmax.f32 %v2699_v37, 0.0 }
 0x5c9   : > { %v2855_v20 = vpack.c.bf16 %v2831_v24, %v2823_v5  ;;  %v2649_v40 = vpop.f32.mrb[84].mxu0  ;;  %v2856_v11 = vpack.c.bf16 %v2832_v13, %v2824_v56 }
 0x5ca   : > { %v2650_v29 = vadd.f32 %v2649_v40, %v5817_v33  ;;  %v2651_v26 = vpop.f32.mrb[85].mxu0  ;;  %v2857_v61 = vpack.c.bf16 %v2833_v32, %v2825_v8  ;;  %v2702_v43 = vpop.f32.mrb[84].mxu1  ;;  %v5832_v8 = vld [vmem:[%s6019_s5 + $0x20] sm:$0xff]  }
 0x5cb   : > { %v2652_v48 = vadd.f32 %v2651_v26, %v5817_v33  ;;  %v2653_v21 = vpop.f32.mrb[86].mxu0  ;;  %2911 = vmatprep.subr.bf16.mxu0 %v2855_v20  ;;  %v2703_v50 = vadd.f32 %v2702_v43, %v5817_v33  ;;  %v2704_v59 = vpop.f32.mrb[85].mxu1 }
 0x5cc   : > { %v2654_v36 = vadd.f32 %v2653_v21, %v5820_v49  ;;  %v2655_v58 = vpop.f32.mrb[87].mxu0  ;;  %2912 = vmatpush1.bf16.msra.mxu0 %v2854_v15  ;;  %v2838_v55 = vmax.f32 %v2650_v29, 0.0  ;;  %v2705_v52 = vadd.f32 %v2704_v59, %v5817_v33  ;;  %v2706_v30 = vpop.f32.mrb[86].mxu1  ;;  %2964 = vmatprep.subr.bf16.mxu1 %v2857_v61  ;;  %v5843_v29 = vld [vmem:[%s6019_s5 + $0x28] sm:$0xff]  }
 0x5cd   : > { %v2656_v57 = vadd.f32 %v2655_v58, %v5820_v49  ;;  %v2839_v27 = vmax.f32 %v2652_v48, 0.0  ;;  %v2707_v7 = vadd.f32 %v2706_v30, %v5820_v49  ;;  %v2708_v9 = vpop.f32.mrb[87].mxu1  ;;  %2965 = vmatpush1.bf16.msra.mxu1 %v2856_v11  ;;  %v2840_v15 = vmax.f32 %v2703_v50, 0.0 }
 0x5ce   : > { %v2846_v53 = vmax.f32 %v2654_v36, 0.0  ;;  %v2709_v44 = vadd.f32 %v2708_v9, %v5820_v49  ;;  %v2841_v13 = vmax.f32 %v2705_v52, 0.0 }
 0x5cf   : > { %v2847_v5 = vmax.f32 %v2656_v57, 0.0  ;;  %v2848_v37 = vmax.f32 %v2707_v7, 0.0 }
 0x5d0   : > { %v2862_v24 = vpack.c.bf16 %v2846_v53, %v2838_v55  ;;  %v2849_v20 = vmax.f32 %v2709_v44, 0.0 }
 0x5d1   : > { %v2863_v56 = vpack.c.bf16 %v2847_v5, %v2839_v27  ;;  %v2864_v40 = vpack.c.bf16 %v2848_v37, %v2840_v15 }
 0x5d2   : > { %v2865_v32 = vpack.c.bf16 %v2849_v20, %v2841_v13 }
 0x5d3   : > { %2913 = vmatprep.subr.bf16.mxu0 %v2863_v56 }
 0x5d4   : > { %2914 = vmatpush1.bf16.msra.mxu0 %v2862_v24  ;;  %2966 = vmatprep.subr.bf16.mxu1 %v2865_v32 }
 0x5d5   : > { %2967 = vmatpush1.bf16.msra.mxu1 %v2864_v40 }
 0x5d7   : > { %3684 = vmatmul.mubr.msk.bf16.vlgmr.msra.gmra.mrb[96].mxu0 %vm1248_vm2, %v5832_v8 }
 0x5d8   : > { %2953 = vmatprep.mubr.bf16.mxu0 %v6120_v3  ;;  %3686 = vmatmul.mubr.msk.bf16.vlgmr.msra.gmra.mrb[96].mxu1 %vm1248_vm2, %v5832_v8 }
 0x5d9   : > { %3006 = vmatprep.mubr.bf16.mxu1 %v6120_v3 }
 0x5df   : > { %3685 = vmatmul.mubr.msk.bf16.gmra.mrb[100].mxu0 %vm1248_vm2, %v5843_v29 }
 0x5e0   : > { %3049 = vmatprep.mubr.bf16.mxu0 %v6120_v3  ;;  %3687 = vmatmul.mubr.msk.bf16.gmra.mrb[100].mxu1 %vm1248_vm2, %v5843_v29 }
 0x5e1   : > { %3102 = vmatprep.mubr.bf16.mxu1 %v6120_v3 }
 0x600   : > { %v2745_v26 = vpop.f32.mrb[88].mxu0  ;;  %v2798_v43 = vpop.f32.mrb[88].mxu1 }
 0x601   : > { %v2746_v11 = vadd.f32 %v2745_v26, %v5805_v28  ;;  %v2747_v48 = vpop.f32.mrb[89].mxu0  ;;  %v2799_v50 = vadd.f32 %v2798_v43, %v5805_v28  ;;  %v2800_v59 = vpop.f32.mrb[89].mxu1 }
 0x602   : > { %v2748_v21 = vadd.f32 %v2747_v48, %v5805_v28  ;;  %v2749_v61 = vpop.f32.mrb[90].mxu0  ;;  %v2801_v52 = vadd.f32 %v2800_v59, %v5805_v28  ;;  %v2802_v30 = vpop.f32.mrb[90].mxu1 }
 0x603   : > { %v2750_v36 = vadd.f32 %v2749_v61, %v5808_v14  ;;  %v2751_v58 = vpop.f32.mrb[91].mxu0  ;;  %v2826_v55 = vmax.f32 %v2746_v11, 0.0  ;;  %v2803_v7 = vadd.f32 %v2802_v30, %v5808_v14  ;;  %v2804_v9 = vpop.f32.mrb[91].mxu1  ;;  %v2828_v15 = vmax.f32 %v2799_v50, 0.0 }
 0x604   : > { %v2752_v57 = vadd.f32 %v2751_v58, %v5808_v14  ;;  %v2827_v27 = vmax.f32 %v2748_v21, 0.0  ;;  %v2805_v44 = vadd.f32 %v2804_v9, %v5808_v14  ;;  %v2829_v20 = vmax.f32 %v2801_v52, 0.0 }
 0x605   : > { %v2834_v53 = vmax.f32 %v2750_v36, 0.0  ;;  %v2836_v37 = vmax.f32 %v2803_v7, 0.0 }
 0x606   : > { %v2835_v5 = vmax.f32 %v2752_v57, 0.0  ;;  %v2837_v40 = vmax.f32 %v2805_v44, 0.0 }
 0x607   : > { %v2858_v24 = vpack.c.bf16 %v2834_v53, %v2826_v55  ;;  %v2860_v28 = vpack.c.bf16 %v2836_v37, %v2828_v15 }
 0x608   : > { %v2859_v56 = vpack.c.bf16 %v2835_v5, %v2827_v27  ;;  %v2755_v13 = vpop.f32.mrb[92].mxu0  ;;  %v2861_v21 = vpack.c.bf16 %v2837_v40, %v2829_v20  ;;  %v2808_v61 = vpop.f32.mrb[92].mxu1 }
 0x609   : > { %v2756_v32 = vadd.f32 %v2755_v13, %v5817_v33  ;;  %v2757_v26 = vpop.f32.mrb[93].mxu0  ;;  %v2809_v14 = vadd.f32 %v2808_v61, %v5817_v33  ;;  %v2810_v58 = vpop.f32.mrb[93].mxu1 }
 0x60a   : > { %v2758_v11 = vadd.f32 %v2757_v26, %v5817_v33  ;;  %v2759_v48 = vpop.f32.mrb[94].mxu0  ;;  %3017 = vmatprep.subr.bf16.mxu0 %v2859_v56  ;;  %v2811_v57 = vadd.f32 %v2810_v58, %v5817_v33  ;;  %v2812_v52 = vpop.f32.mrb[94].mxu1  ;;  %3070 = vmatprep.subr.bf16.mxu1 %v2861_v21 }
 0x60b   : > { %v2760_v43 = vadd.f32 %v2759_v48, %v5820_v49  ;;  %v2761_v36 = vpop.f32.mrb[95].mxu0  ;;  %3018 = vmatpush1.bf16.msra.mxu0 %v2858_v24  ;;  %v2842_v59 = vmax.f32 %v2756_v32, 0.0  ;;  %v2813_v30 = vadd.f32 %v2812_v52, %v5820_v49  ;;  %v2814_v7 = vpop.f32.mrb[95].mxu1  ;;  %3071 = vmatpush1.bf16.msra.mxu1 %v2860_v28  ;;  %v2844_v24 = vmax.f32 %v2809_v14, 0.0 }
 0x60c   : > { %v2762_v50 = vadd.f32 %v2761_v36, %v5820_v49  ;;  %v2843_v53 = vmax.f32 %v2758_v11, 0.0  ;;  %v2815_v9 = vadd.f32 %v2814_v7, %v5820_v49  ;;  %v2845_v37 = vmax.f32 %v2811_v57, 0.0  ;;  %v5879_v49 = vpop.permute.xlu0 %2877  ;;  %v5882_v26 = vpop.permute.xlu1 %2882 }
 0x60d   : > { %v2850_v55 = vmax.f32 %v2760_v43, 0.0  ;;  %v2852_v44 = vmax.f32 %v2813_v30, 0.0 }
 0x60e   : > { %v2851_v27 = vmax.f32 %v2762_v50, 0.0  ;;  %v2853_v56 = vmax.f32 %v2815_v9, 0.0 }
 0x60f   : > { %v2866_v5 = vpack.c.bf16 %v2850_v55, %v2842_v59  ;;  %v2868_v13 = vpack.c.bf16 %v2852_v44, %v2844_v24  ;;  %v6177_v55 = vld [vmem:[#allocation33_spill] sm:$0xff]  ;;  %v6178_v24 = vld [vmem:[#allocation35_spill] sm:$0xff] }
 0x610   : > { %v2867_v15 = vpack.c.bf16 %v2851_v27, %v2843_v53  ;;  %v2869_v33 = vpack.c.bf16 %v2853_v56, %v2845_v37 }
 0x612   : > { %3019 = vmatprep.subr.bf16.mxu0 %v2867_v15  ;;  %3072 = vmatprep.subr.bf16.mxu1 %v2869_v33 }
 0x613   : > { %3020 = vmatpush1.bf16.msra.mxu0 %v2866_v5  ;;  %3073 = vmatpush1.bf16.msra.mxu1 %v2868_v13  ;;  %v5897_v5 = vpop.permute.xlu0 %2887 }
 0x616   : > { %3688 = vmatmul.mubr.msk.bf16.vlgmr.msra.gmra.mrb[104].mxu0 %vm1248_vm2, %v5832_v8  ;;  %3690 = vmatmul.mubr.msk.bf16.vlgmr.msra.gmra.mrb[104].mxu1 %vm1248_vm2, %v5832_v8 }
 0x617   : > { %3059 = vmatprep.mubr.bf16.mxu0 %v6120_v3  ;;  %3112 = vmatprep.mubr.bf16.mxu1 %v6120_v3 }
 0x61e   : > { %3689 = vmatmul.mubr.msk.bf16.gmra.mrb[108].mxu0 %vm1248_vm2, %v5843_v29  ;;  %3691 = vmatmul.mubr.msk.bf16.gmra.mrb[108].mxu1 %vm1248_vm2, %v5843_v29 }
 0x61f   : > { %3249 = vmatprep.mubr.bf16.mxu0 %v6120_v3  ;;  %3290 = vmatprep.mubr.bf16.mxu1 %v6120_v3 }
 0x6aa   : > { %v2945_v20 = vpop.f32.mrb[96].mxu0 }
 0x6ab   : > { %v2946_v40 = vadd.f32 %v2945_v20, %v5879_v49  ;;  %v2947_v32 = vpop.f32.mrb[97].mxu0  ;;  %v2998_v48 = vpop.f32.mrb[96].mxu1 }
 0x6ac   : > { %v2948_v8 = vadd.f32 %v2947_v32, %v5879_v49  ;;  %v2949_v28 = vpop.f32.mrb[98].mxu0  ;;  %v2999_v29 = vadd.f32 %v2998_v48, %v5879_v49  ;;  %v3000_v36 = vpop.f32.mrb[97].mxu1 }
 0x6ad   : > { %v3123_v11 = vadd.f32 %v5553_v39, %v2946_v40  ;;  %v2950_v21 = vadd.f32 %v2949_v28, %v5882_v26  ;;  %v2951_v61 = vpop.f32.mrb[99].mxu0  ;;  %v3001_v58 = vadd.f32 %v3000_v36, %v5879_v49  ;;  %v3002_v59 = vpop.f32.mrb[98].mxu1 }
 0x6ae   : > { %v3124_v43 = vadd.f32 %v5558_v60, %v2948_v8  ;;  %v2952_v14 = vadd.f32 %v2951_v61, %v5882_v26  ;;  %v3125_v57 = vadd.f32 %v5569_v35, %v2999_v29  ;;  %v3003_v39 = vadd.f32 %v3002_v59, %v5882_v26  ;;  %v3004_v53 = vpop.f32.mrb[99].mxu1  ;;  %v6179_v35 = vld [vmem:[#allocation36_spill] sm:$0xff]  ;;  %v5902_v20 = vpop.permute.xlu1 %2892 }
 0x6af   : > { %v3131_v50 = vadd.f32 %v5562_v17, %v2950_v21  ;;  %v3156_v30 = vmax.f32 %v3123_v11, 0.0  ;;  %v3126_v27 = vadd.f32 %v5575_v42, %v3001_v58  ;;  %v3005_v60 = vadd.f32 %v3004_v53, %v5882_v26 }
 0x6b0   : > { %v3132_v52 = vadd.f32 %v6177_v55, %v2952_v14  ;;  %v3157_v9 = vmax.f32 %v3124_v43, 0.0  ;;  %v3133_v44 = vadd.f32 %v6178_v24, %v3003_v39  ;;  %v3158_v40 = vmax.f32 %v3125_v57, 0.0 }
 0x6b1   : > { %v3164_v7 = vmax.f32 %v3131_v50, 0.0  ;;  %v3134_v56 = vadd.f32 %v6179_v35, %v3005_v60  ;;  %v3159_v11 = vmax.f32 %v3126_v27, 0.0 }
 0x6b2   : > { %v3165_v17 = vmax.f32 %v3132_v52, 0.0  ;;  %v2955_v15 = vpop.f32.mrb[100].mxu0  ;;  %v3166_v42 = vmax.f32 %v3133_v44, 0.0 }
 0x6b3   : > { %v3188_v37 = vpack.c.bf16 %v3164_v7, %v3156_v30  ;;  %v2956_v13 = vadd.f32 %v2955_v15, %v5897_v5  ;;  %v2957_v33 = vpop.f32.mrb[101].mxu0  ;;  %v3167_v48 = vmax.f32 %v3134_v56, 0.0  ;;  %v3008_v61 = vpop.f32.mrb[100].mxu1 }
 0x6b4   : > { %v2958_v32 = vadd.f32 %v2957_v33, %v5897_v5  ;;  %v2959_v8 = vpop.f32.mrb[102].mxu0  ;;  %v3189_v28 = vpack.c.bf16 %v3165_v17, %v3157_v9  ;;  %v3190_v36 = vpack.c.bf16 %v3166_v42, %v3158_v40  ;;  %v3009_v14 = vadd.f32 %v3008_v61, %v5897_v5  ;;  %v3010_v50 = vpop.f32.mrb[101].mxu1  ;;  %v5922_v33 = vld [vmem:[%s6021_s7] sm:$0x1] }
 0x6b5   : > { %v3139_v21 = vadd.f32 %v5597_v6, %v2956_v13  ;;  %v2960_v29 = vadd.f32 %v2959_v8, %v5902_v20  ;;  %v2961_v43 = vpop.f32.mrb[103].mxu0  ;;  %v3011_v57 = vadd.f32 %v3010_v50, %v5897_v5  ;;  %v3012_v55 = vpop.f32.mrb[102].mxu1  ;;  %v3191_v52 = vpack.c.bf16 %v3167_v48, %v3159_v11 }
 0x6b6   : > { %v3140_v58 = vadd.f32 %v5601_v19, %v2958_v32  ;;  %v2962_v59 = vadd.f32 %v2961_v43, %v5902_v20  ;;  %3217 = vmatprep.subr.bf16.mxu0 %v3189_v28  ;;  %v3141_v6 = vadd.f32 %v5607_v63, %v3009_v14  ;;  %v3013_v53 = vadd.f32 %v3012_v55, %v5902_v20  ;;  %v3014_v27 = vpop.f32.mrb[103].mxu1 }
 0x6b7   : > { %v3147_v39 = vadd.f32 %v5605_v22, %v2960_v29  ;;  %3218 = vmatpush1.bf16.msra.mxu0 %v3188_v37  ;;  %v3172_v7 = vmax.f32 %v3139_v21, 0.0  ;;  %v3142_v19 = vadd.f32 %v5612_v47, %v3011_v57  ;;  %v3015_v9 = vadd.f32 %v3014_v27, %v5902_v20  ;;  %3258 = vmatprep.subr.bf16.mxu1 %v3191_v52 }
 0x6b8   : > { %v3148_v30 = vadd.f32 %v5610_v10, %v2962_v59  ;;  %v3173_v24 = vmax.f32 %v3140_v58, 0.0  ;;  %v3149_v22 = vadd.f32 %v5617_v62, %v3013_v53  ;;  %3259 = vmatpush1.bf16.msra.mxu1 %v3190_v36  ;;  %v3174_v15 = vmax.f32 %v3141_v6, 0.0 }
 0x6b9   : > { %v3180_v60 = vmax.f32 %v3147_v39, 0.0  ;;  %v3150_v63 = vadd.f32 %v5621_v12, %v3015_v9  ;;  %v3175_v10 = vmax.f32 %v3142_v19, 0.0 }
 0x6ba   : > { %v3181_v44 = vmax.f32 %v3148_v30, 0.0  ;;  %v3182_v37 = vmax.f32 %v3149_v22, 0.0 }
 0x6bb   : > { %v3196_v17 = vpack.c.bf16 %v3180_v60, %v3172_v7  ;;  %v3183_v56 = vmax.f32 %v3150_v63, 0.0 }
 0x6bc   : > { %v3197_v35 = vpack.c.bf16 %v3181_v44, %v3173_v24  ;;  %v3198_v13 = vpack.c.bf16 %v3182_v37, %v3174_v15 }
 0x6bd   : > { %v3199_v47 = vpack.c.bf16 %v3183_v56, %v3175_v10 }
 0x6be   : > { %3219 = vmatprep.subr.bf16.mxu0 %v3197_v35 }
 0x6bf   : > { %3220 = vmatpush1.bf16.msra.mxu0 %v3196_v17  ;;  %3260 = vmatprep.subr.bf16.mxu1 %v3199_v47 }
 0x6c0   : > { %3261 = vmatpush1.bf16.msra.mxu1 %v3198_v13 }
 0x6c2   : > { %3692 = vmatmul.mubr.msk.bf16.vlgmr.msra.gmra.mrb[112].mxu0 %vm1248_vm2, %v5922_v33 }
 0x6c3   : > { %3331 = vmatprep.mubr.bf16.mxu0 %v6120_v3  ;;  %3693 = vmatmul.mubr.msk.bf16.vlgmr.msra.gmra.mrb[112].mxu1 %vm1248_vm2, %v5922_v33 }
 0x6c4   : > { %3372 = vmatprep.mubr.bf16.mxu1 %v6120_v3 }
 0x6e9   : > { %v3051_v62 = vpop.f32.mrb[104].mxu0  ;;  %v3104_v28 = vpop.f32.mrb[104].mxu1 }
 0x6ea   : > { %v3052_v12 = vadd.f32 %v3051_v62, %v5879_v49  ;;  %v3053_v40 = vpop.f32.mrb[105].mxu0  ;;  %v3105_v21 = vadd.f32 %v3104_v28, %v5879_v49  ;;  %v3106_v29 = vpop.f32.mrb[105].mxu1 }
 0x6eb   : > { %v3054_v42 = vadd.f32 %v3053_v40, %v5879_v49  ;;  %v3055_v32 = vpop.f32.mrb[106].mxu0  ;;  %v3107_v43 = vadd.f32 %v3106_v29, %v5879_v49  ;;  %v3108_v14 = vpop.f32.mrb[106].mxu1 }
 0x6ec   : > { %v3127_v8 = vadd.f32 %v5723_v1, %v3052_v12  ;;  %v3056_v11 = vadd.f32 %v3055_v32, %v5882_v26  ;;  %v3057_v48 = vpop.f32.mrb[107].mxu0  ;;  %v3129_v58 = vadd.f32 %v5737_v51, %v3105_v21  ;;  %v3109_v1 = vadd.f32 %v3108_v14, %v5882_v26  ;;  %v3110_v59 = vpop.f32.mrb[107].mxu1 }
 0x6ed   : > { %v3128_v61 = vadd.f32 %v5728_v0, %v3054_v42  ;;  %v3058_v3 = vadd.f32 %v3057_v48, %v5882_v26  ;;  %v3130_v39 = vadd.f32 %v5743_v46, %v3107_v43  ;;  %v3111_v0 = vadd.f32 %v3110_v59, %v5882_v26 }
 0x6ee   : > { %v3135_v36 = vadd.f32 %v5732_v18, %v3056_v11  ;;  %v3160_v57 = vmax.f32 %v3127_v8, 0.0  ;;  %v3137_v6 = vadd.f32 %v5749_v23, %v3109_v1  ;;  %v3162_v7 = vmax.f32 %v3129_v58, 0.0 }
 0x6ef   : > { %v3136_v50 = vadd.f32 %v5739_v45, %v3058_v3  ;;  %v3161_v52 = vmax.f32 %v3128_v61, 0.0  ;;  %v3138_v30 = vadd.f32 %v5754_v16, %v3111_v0  ;;  %v3163_v9 = vmax.f32 %v3130_v39, 0.0 }
 0x6f0   : > { %v3168_v55 = vmax.f32 %v3135_v36, 0.0  ;;  %v3170_v45 = vmax.f32 %v3137_v6, 0.0  ;;  %v4241_v3 = vmov 1966171168   ;;  %v3208_v36 = vpop.permute.xlu0 %3207 }
 0x6f1   : > { %v3169_v49 = vmax.f32 %v3136_v50, 0.0  ;;  %v3061_v53 = vpop.f32.mrb[108].mxu0  ;;  %v3171_v24 = vmax.f32 %v3138_v30, 0.0  ;;  %v3114_v22 = vpop.f32.mrb[108].mxu1  ;;  %v3394_v43 = vunpack.c.l.s4 %v4241_v3 }
 0x6f2   : > { %v3192_v18 = vpack.c.bf16 %v3168_v55, %v3160_v57  ;;  %v3062_v51 = vadd.f32 %v3061_v53, %v5897_v5  ;;  %v3063_v27 = vpop.f32.mrb[109].mxu0  ;;  %v3194_v17 = vpack.c.bf16 %v3170_v45, %v3162_v7  ;;  %v3115_v16 = vadd.f32 %v3114_v22, %v5897_v5  ;;  %v3116_v15 = vpop.f32.mrb[109].mxu1 }
 0x6f3   : > { %v3064_v19 = vadd.f32 %v3063_v27, %v5897_v5  ;;  %v3065_v60 = vpop.f32.mrb[110].mxu0  ;;  %v3193_v46 = vpack.c.bf16 %v3169_v49, %v3161_v52  ;;  %v3117_v35 = vadd.f32 %v3116_v15, %v5897_v5  ;;  %v3118_v56 = vpop.f32.mrb[110].mxu1  ;;  %v3195_v13 = vpack.c.bf16 %v3171_v24, %v3163_v9 }
 0x6f4   : > { %v3143_v26 = vadd.f32 %v5763_v4, %v3062_v51  ;;  %v3066_v23 = vadd.f32 %v3065_v60, %v5902_v20  ;;  %v3067_v44 = vpop.f32.mrb[111].mxu0  ;;  %v3145_v4 = vadd.f32 %v5773_v31, %v3115_v16  ;;  %v3119_v47 = vadd.f32 %v3118_v56, %v5902_v20  ;;  %v3120_v12 = vpop.f32.mrb[111].mxu1 }
 0x6f5   : > { %v3144_v63 = vadd.f32 %v5767_v41, %v3064_v19  ;;  %v3068_v37 = vadd.f32 %v3067_v44, %v5902_v20  ;;  %3299 = vmatprep.subr.bf16.mxu0 %v3193_v46  ;;  %v3146_v41 = vadd.f32 %v5778_v34, %v3117_v35  ;;  %v3121_v32 = vadd.f32 %v3120_v12, %v5902_v20 }
 0x6f6   : > { %v3151_v10 = vadd.f32 %v5771_v2, %v3066_v23  ;;  %3300 = vmatpush1.bf16.msra.mxu0 %v3192_v18  ;;  %v3176_v40 = vmax.f32 %v3143_v26, 0.0  ;;  %3340 = vmatprep.subr.bf16.mxu1 %v3195_v13  ;;  %v3153_v2 = vadd.f32 %v5783_v38, %v3119_v47  ;;  %v3178_v11 = vmax.f32 %v3145_v4, 0.0 }
 0x6f7   : > { %v3152_v62 = vadd.f32 %v5776_v54, %v3068_v37  ;;  %v3177_v5 = vmax.f32 %v3144_v63, 0.0  ;;  %3341 = vmatpush1.bf16.msra.mxu1 %v3194_v17  ;;  %v3154_v31 = vadd.f32 %v5787_v25, %v3121_v32  ;;  %v3179_v54 = vmax.f32 %v3146_v41, 0.0 }
 0x6f8   : > { %v3184_v42 = vmax.f32 %v3151_v10, 0.0  ;;  %v3186_v48 = vmax.f32 %v3153_v2, 0.0  ;;  %v3210_v38 = vlaneseq  ;;  %v3395_v14 = vunpack.c.0.s8 %v3394_v43 }
 0x6f9   : > { %v3185_v8 = vmax.f32 %v3152_v62, 0.0  ;;  %v3187_v61 = vmax.f32 %v3154_v31, 0.0 }
 0x6fa   : > { %v3200_v28 = vpack.c.bf16 %v3184_v42, %v3176_v40  ;;  %v3202_v29 = vpack.c.bf16 %v3186_v48, %v3178_v11  ;;  %v3211_v20 = vshrl.u32 %v3210_v38, 7 }
 0x6fb   : > { %v3201_v21 = vpack.c.bf16 %v3185_v8, %v3177_v5  ;;  %v3203_v34 = vpack.c.bf16 %v3187_v61, %v3179_v54 }
 0x6fc   : > { %v3212_v25 = vsub.s32 0, %v3211_v20  ;;  %v3398_v55 = vsub.s32 %v3395_v14, %v3211_v20 }
 0x6fd   : > { %3301 = vmatprep.subr.bf16.mxu0 %v3201_v21  ;;  %3342 = vmatprep.subr.bf16.mxu1 %v3203_v34 }
 0x6fe   : > { %3302 = vmatpush1.bf16.msra.mxu0 %v3200_v28  ;;  %3343 = vmatpush1.bf16.msra.mxu1 %v3202_v29  ;;  %v3213_v58 = vrot.slane %v3208_v36, %v3212_v25 }
 0x701   : > { %3694 = vmatmul.mubr.msk.bf16.vlgmr.msra.gmra.mrb[116].mxu0 %vm1248_vm2, %v5922_v33  ;;  %3695 = vmatmul.mubr.msk.bf16.vlgmr.msra.gmra.mrb[116].mxu1 %vm1248_vm2, %v5922_v33 }
 0x795   : > { %v3251_v1 = vpop.f32.mrb[112].mxu0 }
 0x796   : > { %v3252_v50 = vadd.f32 %v3251_v1, %v3213_v58  ;;  %v3253_v59 = vpop.f32.mrb[113].mxu0  ;;  %v3292_v0 = vpop.f32.mrb[112].mxu1 }
 0x797   : > { %v3254_v57 = vadd.f32 %v3253_v59, %v3213_v58  ;;  %v3255_v39 = vpop.f32.mrb[114].mxu0  ;;  %v3293_v6 = vadd.f32 %v3292_v0, %v3213_v58  ;;  %v3294_v53 = vpop.f32.mrb[113].mxu1 }
 0x798   : > { %v3256_v52 = vpop.f32.mrb[115].mxu0  ;;  %v3295_v33 = vadd.f32 %v3294_v53, %v3213_v58  ;;  %v3296_v18 = vpop.f32.mrb[114].mxu1 }
 0x799   : > { %v3389_v49 = vcombine.low %v3252_v50, %v3254_v57  ;;  %v3297_v30 = vpop.f32.mrb[115].mxu1 }
 0x79a   : > { %v3390_v27 = vcombine.low %v3293_v6, %v3295_v33 }
 0x79b   : > { %v3399_v51 = vrot.slane %v3389_v49, %v3398_v55 }
 0x79c   : > { %v3406_v7 = vrot.slane %v3390_v27, %v3398_v55 }
 0x79e   : > { %v3421_v45 = vcombine.low %v3399_v51, %v3406_v7 }
 0x7a0   : > { %v3429_v13 = vrot.slane %v3421_v45, %v3398_v55 }
 0x7d4   : > { %v3333_v19 = vpop.f32.mrb[116].mxu0  ;;  %v3374_v26 = vpop.f32.mrb[116].mxu1 }
 0x7d5   : > { %v3334_v60 = vadd.f32 %v3333_v19, %v3213_v58  ;;  %v3335_v46 = vpop.f32.mrb[117].mxu0  ;;  %v3375_v23 = vadd.f32 %v3374_v26, %v3213_v58  ;;  %v3376_v17 = vpop.f32.mrb[117].mxu1 }
 0x7d6   : > { %v3336_v9 = vadd.f32 %v3335_v46, %v3213_v58  ;;  %v3337_v24 = vpop.f32.mrb[118].mxu0  ;;  %v3377_v16 = vadd.f32 %v3376_v17, %v3213_v58  ;;  %v3378_v63 = vpop.f32.mrb[118].mxu1 }
 0x7d7   : > { %v3338_v22 = vpop.f32.mrb[119].mxu0  ;;  %v3379_v15 = vpop.f32.mrb[119].mxu1 }
 0x7d8   : > { %v3391_v44 = vcombine.low %v3334_v60, %v3336_v9  ;;  %v3392_v35 = vcombine.low %v3375_v23, %v3377_v16 }
 0x7da   : > { %v3413_v37 = vrot.slane %v3391_v44, %v3398_v55  ;;  %v3420_v10 = vrot.slane %v3392_v35, %v3398_v55 }
 0x7dc   : > { %v3422_v56 = vcombine.low %v3413_v37, %v3420_v10 }
 0x7de   : > { %v3436_v4 = vrot.slane %v3422_v56, %v3398_v55 }
 0x7e0   : > { %v3437_v47 = vcombine.low %v3429_v13, %v3436_v4 }
 0x7e2   : > { %3439 = vst [vmem:[%s352_s24] sm:$0xff] %v3437_v47 }
 0x7e3   : > { %4181 = shalt.err (!%p4178_p2)
}
 0x7e4   : > { %s4182_s25 = scalar_lea.hbm %s5971_s27, 128  ;;  %s4186_s15 = scalar_lea.hbm %s6023_s9, 512 }
 0x7e5   : > { %p4183_p4 = scmp.ne.s32.totalorder %s5971_s27, %s4182_s25  ;;  %p4187_p13 = scmp.lt.u32.totalorder %s5971_s27, %s6023_s9 }
 0x7e6   : > { %p4188_p1 = scmp.lt.u32.totalorder %s4186_s15, %s4182_s25  ;;  %p4190_p6 = scmp.lt.u32.totalorder %s4182_s25, %s5971_s27 }
 0x7e7   : > { %p4184_p5 = pnand %p4183_p4, %p6180_p10 }
 0x7e8   : > { %p4189_p3 = por %p4188_p1, %p4187_p13 }
 0x7e9   : > { %p4185_p7 = pneg %p4184_p5 }
 0x7ea   : > { %p4191_p11 = por %p4190_p6, %p4189_p3 }
 0x7ec   : > { %p4192_p12 = pnand %p4191_p11, %p4185_p7 }
 0x7ee   : > { %4195 = shalt.err (!%p4192_p12)
}
 0x7ef   : > { %4059 = dma.vmem_to_hbm [thread:$0]  (%p6180_p10), %s5973_s17, 128, %s5971_s27, %s3441_s23  }
 0x7f0 PF: > { %p4070_p8 = scmp.ge.s32.totalorder %s4234_s14, 2  ;;  %s3467_s26 = sand.u32 1, %s4222_s11  }
 0x7f1   : > { %p6181_p9 = scmp.ne.s32.totalorder %s6078_s22, 0  ;;  %s3468_s30 = scalar_lea.sflag [#allocation5], %s3467_s26 }
 0x7f3   : > { %p4066_p0 = pnand %p4070_p8, %p6181_p9 }
 0x7f5   : > { %4217 = dma.done.wait (!%p4066_p0), %s3468_s30, 128  }
 0x7f6   : > { %4219 = vsyncadd (!%p4066_p0), %s3468_s30, 4294967168  ;;  %p24_p2 = scmp.ge.s32.totalorder %s4321_s16, 6   ;;  %s6182_s11 = smov %s4226_s12 }
 0x7f7   : > { %s6183_s12 = smov %s4230_s13  ;;  %s6184_s13 = smov %s4333_s19 }
 0x7f8   : > { %s6185_s14 = smov %s4321_s16  ;;  %26 = sbr.rel (!%p24_p2) target bundleno = 8 (0x8), region = 109 }
 0x7ff   :  { %3473 = vsyncpa [#allocation4], 1 }
 0x800   :  { %3475 = vsyncpa [#allocation4 + $0x1], 1 }
 0x801   :  { %3476 = vsyncpa [#allocation5], 1 }
 0x802   :  { %3478 = vsyncpa [#allocation5 + $0x1], 1 }

</bundles_post_ra>
